<compile_context>
chip_gen: v7x
topology: tpu7x:2x2x1
jax: 0.10.0
libtpu: 0.0.40
codegen_flags: <defaults>
</compile_context>

<pallas_src>
import functools

import jax
import jax.numpy as jnp
from jax.experimental import pallas as pl
from jax.experimental.pallas import tpu as pltpu

EPS = 1e-5  # PyTorch LayerNorm default


# ----------------------------- in-kernel helpers -----------------------------
def _layernorm(x, g, b):
    # x: (N, D), g/b: (1, D)
    mu = jnp.mean(x, axis=-1, keepdims=True)
    xc = x - mu
    var = jnp.mean(xc * xc, axis=-1, keepdims=True)
    return xc * jax.lax.rsqrt(var + EPS) * g + b


def _softmax(s):
    s = s - jnp.max(s, axis=-1, keepdims=True)
    p = jnp.exp(s)
    # reciprocal on the EUP slot instead of a VALU divide (approx, inference-ok)
    return p * pl.reciprocal(jnp.sum(p, axis=-1, keepdims=True), approx=True)


def _bf16(x):
    return x.astype(jnp.bfloat16)


# ------------------------------- fused kernel --------------------------------
def fused_encoder_kernel(rgb_ref, dep_ref,
                         wqkv_ref, bqkv_ref, wo_ref,
                         w1_ref, bf1_ref, w2_ref,
                         enc_vec_ref,
                         ca_w_rgb_ref, ca_b_rgb_ref,
                         ca_w_dep_ref, ca_b_dep_ref,
                         wf_ref, fin_vec_ref,
                         o_ref,
                         *, n_layers, n_heads, seq, d_model, d_attn, bpb):
    S, D, H, A = seq, d_model, n_heads, d_attn
    hd = D // H
    G = 2 * bpb            # (stream, batch) groups handled in this grid step
    R = G * S              # total folded rows
    attn_scale = 1.0 / (hd ** 0.5)

    # Batch + both modality streams folded into rows (weights are shared):
    #   rows [0        : bpb*S)  -> rgb   (batch-major)
    #   rows [bpb*S    : 2*bpb*S)-> depth (batch-major)
    x = jnp.concatenate([rgb_ref[...], dep_ref[...]], axis=0).reshape(R, D)

    # ------------------- shared encoder layers (unrolled) -------------------
    # TODO(synk): if n_layers grows beyond a handful, switch to lax.fori_loop
    # with dynamic leading-axis weight indexing and/or stream per-layer weights
    # (pl.Buffered) instead of keeping the whole stack VMEM-resident (v7x has
    # only 64 MiB VMEM); at these toy shapes the full stack is < 1 MiB.
    for l in range(n_layers):
        vec = enc_vec_ref[l]                           # (6, D) f32, packed
        g1, b1 = vec[0:1], vec[1:2]                    # norm1
        g2, b2 = vec[2:3], vec[3:4]                    # norm2
        bo, b2f = vec[4:5], vec[5:6]                   # out-proj / linear2 bias

        xn1 = _layernorm(x, g1, b1)

        # Fused Q/K/V: one (D, 3D) matmul (3D = 96 lanes -> single lane tile),
        # static lane slices back out.
        qkv = jnp.dot(_bf16(xn1), wqkv_ref[l],
                      preferred_element_type=jnp.float32) + bqkv_ref[l]
        q, k, v = qkv[:, 0:D], qkv[:, D:2 * D], qkv[:, 2 * D:3 * D]

        # Stream+batch+head batched self-attention: one einsum over G*H heads.
        # (rgb/depth/batch elements never attend across each other.)
        def to_heads(t):
            return _bf16(jnp.swapaxes(t.reshape(G, S, H, hd), 1, 2)
                         .reshape(G * H, S, hd))

        qh, kh, vh = to_heads(q), to_heads(k), to_heads(v)
        sc = jnp.einsum('hqd,hkd->hqk', qh, kh,
                        preferred_element_type=jnp.float32) * attn_scale
        p = _bf16(_softmax(sc))
        oh = jnp.einsum('hqk,hkd->hqd', p, vh,
                        preferred_element_type=jnp.float32)
        ctx = jnp.swapaxes(oh.reshape(G, H, S, hd), 1, 2).reshape(R, D)

        attn = jnp.dot(_bf16(ctx), wo_ref[l],
                       preferred_element_type=jnp.float32) + bo

        # norm2 -> FFN (relu); dropout == identity (eval); NO residual (per spec)
        xn2 = _layernorm(attn, g2, b2)
        f1 = jnp.maximum(
            jnp.dot(_bf16(xn2), w1_ref[l],
                    preferred_element_type=jnp.float32) + bf1_ref[l], 0.0)
        x = jnp.dot(_bf16(f1), w2_ref[l],
                    preferred_element_type=jnp.float32) + b2f

    # ------------- final norm_rgb / norm_depth + CrossAttention --------------
    fin = fin_vec_ref[...]                              # (9, D) f32, packed
    rgb = _layernorm(x[0:bpb * S], fin[0:1], fin[1:2])  # norm_rgb
    dep = _layernorm(x[bpb * S:R], fin[2:3], fin[3:4])  # norm_depth
    ni_g, ni_b = fin[4:5], fin[5:6]                     # cross-attn norm_image
    nd_g, nd_b = fin[6:7], fin[7:8]                     # cross-attn norm_depth
    bf_final = fin[8:9]                                 # W_final bias
    ca_scale = 1.0 / (A ** 0.5)

    # Three image-LHS and three depth-LHS projections fused into two matmuls:
    #   rgb-LHS: [W_Q_image | W_K_image | W_V_image]
    #   dep-LHS: [W_Q_depth | W_K_depth | W_V_depth]
    rp = jnp.dot(_bf16(rgb), ca_w_rgb_ref[...],
                 preferred_element_type=jnp.float32) + ca_b_rgb_ref[...]
    dp = jnp.dot(_bf16(dep), ca_w_dep_ref[...],
                 preferred_element_type=jnp.float32) + ca_b_dep_ref[...]
    q_img = _layernorm(rp[:, 0:A], ni_g, ni_b)
    k_img = _layernorm(rp[:, A:2 * A], ni_g, ni_b)
    v_img = rp[:, 2 * A:3 * A]
    q_dep = _layernorm(dp[:, 0:A], nd_g, nd_b)
    k_dep = _layernorm(dp[:, A:2 * A], nd_g, nd_b)
    v_dep = dp[:, 2 * A:3 * A]

    def batched(t):                                     # (bpb*S, A) -> (bpb, S, A) bf16
        return _bf16(t.reshape(bpb, S, A))

    # image -> depth attention
    p1 = _softmax(jnp.einsum('bqd,bkd->bqk', batched(q_img), batched(k_dep),
                             preferred_element_type=jnp.float32) * ca_scale)
    o1 = jnp.einsum('bqk,bkd->bqd', _bf16(p1), batched(v_dep),
                    preferred_element_type=jnp.float32)
    # depth -> image attention
    p2 = _softmax(jnp.einsum('bqd,bkd->bqk', batched(q_dep), batched(k_img),
                             preferred_element_type=jnp.float32) * ca_scale)
    o2 = jnp.einsum('bqk,bkd->bqd', _bf16(p2), batched(v_img),
                    preferred_element_type=jnp.float32)

    # W_final on cat([o1, o2], -1) == o1 @ Wf[0] + o2 @ Wf[1]
    out = (jnp.dot(_bf16(o1.reshape(bpb * S, A)), wf_ref[0],
                   preferred_element_type=jnp.float32)
           + jnp.dot(_bf16(o2.reshape(bpb * S, A)), wf_ref[1],
                     preferred_element_type=jnp.float32)
           + bf_final)
    o_ref[...] = out.reshape(bpb, S, A)
    # TODO(synk): output stays 32-lane (d_attn=32<128); a lane-dense relayout is
    # not worthwhile at these shapes (would cost more than the store it saves).


# ---------------------------------- wrapper -----------------------------------
def transformer_encoder(rgb, depth, params, n_heads):
    """rgb/depth: (B, S, D) float32. Returns (B, S, d_attn)."""
    B, S, D = rgb.shape
    A = params['d_attn']
    n_layers = params['wqkv'].shape[0]
    assert D % n_heads == 0

    # Two fat parallel grid steps (one per v7x TensorCore), batch folded into
    # rows inside each step; degrades to two cheap serial steps on v5e/v6e.
    num_blocks = 2 if (B >= 2 and B % 2 == 0) else 1
    bpb = B // num_blocks

    weights = [params[k] for k in (
        'wqkv', 'bqkv', 'wo', 'w1', 'bf1', 'w2', 'enc_vec',
        'ca_w_rgb', 'ca_b_rgb', 'ca_w_dep', 'ca_b_dep', 'wf', 'fin_vec')]

    def _const_spec(a):
        nd = a.ndim
        return pl.BlockSpec(a.shape, lambda b, _nd=nd: (0,) * _nd)

    in_specs = ([pl.BlockSpec((bpb, S, D), lambda b: (b, 0, 0)),
                 pl.BlockSpec((bpb, S, D), lambda b: (b, 0, 0))]
                + [_const_spec(w) for w in weights])

    kern = functools.partial(
        fused_encoder_kernel, n_layers=n_layers, n_heads=n_heads,
        seq=S, d_model=D, d_attn=A, bpb=bpb)

    return pl.pallas_call(
        kern,
        out_shape=jax.ShapeDtypeStruct((B, S, A), jnp.float32),
        grid=(num_blocks,),
        in_specs=in_specs,
        out_specs=pl.BlockSpec((bpb, S, A), lambda b: (b, 0, 0)),
        compiler_params=pltpu.CompilerParams(
            dimension_semantics=("parallel",),        # v7x: one step per TC
            vmem_limit_bytes=32 * 1024 * 1024),       # safe on v7x (64 MiB phys)
    )(rgb, depth, *weights)


# ------------------------------- parameter init -------------------------------
def _xavier(key, shape):
    # xavier over the last two dims (weights stored as (in_features, out_features))
    fan_in, fan_out = shape[-2], shape[-1]
    lim = (6.0 / (fan_in + fan_out)) ** 0.5
    return jax.random.uniform(key, shape, jnp.float32, -lim, lim)


def init_params(key, d_model, n_heads, n_layers, d_ff):
    # The reference TransformerEncoder builds CrossAttention(d_model, d_model,
    # d_model), so d_attn == d_model (the packed `fin_vec` relies on that).
    D, F, A = d_model, d_ff, d_model
    ks = iter(jax.random.split(key, 16))
    nxt = lambda: next(ks)
    zeros = lambda *s: jnp.zeros(s, jnp.float32)

    # MHA in-proj: three per-layer (D, D) xavier matrices fused to (D, 3D)
    w3 = _xavier(nxt(), (n_layers, 3, D, D))
    wqkv = jnp.concatenate([w3[:, 0], w3[:, 1], w3[:, 2]], axis=-1)

    # packed per-layer vectors: [norm1 g, norm1 b, norm2 g, norm2 b,
    #                            out-proj bias, linear2 bias]
    enc_vec = jnp.stack([
        jnp.ones((n_layers, D)), jnp.zeros((n_layers, D)),
        jnp.ones((n_layers, D)), jnp.zeros((n_layers, D)),
        jnp.zeros((n_layers, D)),
        0.01 * jax.random.normal(nxt(), (n_layers, D)),
    ], axis=1).astype(jnp.float32)

    # CrossAttention linears, fused per shared LHS:
    #   image-LHS: [W_Q_image | W_K_image | W_V_image]
    #   depth-LHS: [W_Q_depth | W_K_depth | W_V_depth]
    cr = _xavier(nxt(), (3, D, A))
    cd = _xavier(nxt(), (3, D, A))
    ca_w_rgb = jnp.concatenate([cr[0], cr[1], cr[2]], axis=-1)
    ca_w_dep = jnp.concatenate([cd[0], cd[1], cd[2]], axis=-1)

    # packed final vectors: [norm_rgb g/b, norm_depth g/b,
    #                        ca norm_image g/b, ca norm_depth g/b, W_final bias]
    fin_vec = jnp.stack([
        jnp.ones(D), jnp.zeros(D), jnp.ones(D), jnp.zeros(D),
        jnp.ones(A), jnp.zeros(A), jnp.ones(A), jnp.zeros(A),
        jnp.zeros(A)], axis=0).astype(jnp.float32)

    bf16 = jnp.bfloat16
    return dict(
        d_attn=A,
        # --- encoder layer weights, stacked over layers (shared by rgb & depth) ---
        wqkv=wqkv.astype(bf16),                       # (L, D, 3D) fused in-proj
        bqkv=zeros(n_layers, 1, 3 * D),
        wo=_xavier(nxt(), (n_layers, D, D)).astype(bf16),
        w1=_xavier(nxt(), (n_layers, D, F)).astype(bf16),
        bf1=(0.01 * jax.random.normal(nxt(), (n_layers, 1, F))).astype(jnp.float32),
        w2=_xavier(nxt(), (n_layers, F, D)).astype(bf16),
        enc_vec=enc_vec,
        # --- CrossAttention ---
        ca_w_rgb=ca_w_rgb.astype(bf16), ca_b_rgb=zeros(1, 3 * A),
        ca_w_dep=ca_w_dep.astype(bf16), ca_b_dep=zeros(1, 3 * A),
        wf=_xavier(nxt(), (2, A, A)).astype(bf16),    # W_final split for cat([o1,o2])
        fin_vec=fin_vec,
    )


# ------------------------------------ main ------------------------------------
if __name__ == "__main__":
    d_model, n_heads, n_layers, d_ff = 32, 4, 2, 64
    B, S = 2, 8

    key = jax.random.PRNGKey(0)
    kp, kr, kd = jax.random.split(key, 3)
    params = init_params(kp, d_model, n_heads, n_layers, d_ff)

    rgb_features = jax.random.normal(kr, (B, S, d_model), jnp.float32)
    depth_features = jax.random.normal(kd, (B, S, d_model), jnp.float32)

    out = transformer_encoder(rgb_features, depth_features, params, n_heads)
    out = jax.block_until_ready(out)

    assert out.shape == (B, S, params['d_attn']), out.shape
    assert bool(jnp.all(jnp.isfinite(out)))
    print("KERNEL_OK")
</pallas_src>

<mosaic_0001>
module attributes {stable_mosaic.version = 11 : i64} {
  func.func @fused_encoder_kernel(%arg0: i32, %arg1: memref<1x8x32xf32, #tpu.memory_space<vmem>>, %arg2: memref<1x8x32xf32, #tpu.memory_space<vmem>>, %arg3: memref<2x32x96xbf16, #tpu.memory_space<vmem>>, %arg4: memref<2x1x96xf32, #tpu.memory_space<vmem>>, %arg5: memref<2x32x32xbf16, #tpu.memory_space<vmem>>, %arg6: memref<2x32x64xbf16, #tpu.memory_space<vmem>>, %arg7: memref<2x1x64xf32, #tpu.memory_space<vmem>>, %arg8: memref<2x64x32xbf16, #tpu.memory_space<vmem>>, %arg9: memref<2x6x32xf32, #tpu.memory_space<vmem>>, %arg10: memref<32x96xbf16, #tpu.memory_space<vmem>>, %arg11: memref<1x96xf32, #tpu.memory_space<vmem>>, %arg12: memref<32x96xbf16, #tpu.memory_space<vmem>>, %arg13: memref<1x96xf32, #tpu.memory_space<vmem>>, %arg14: memref<2x32x32xbf16, #tpu.memory_space<vmem>>, %arg15: memref<9x32xf32, #tpu.memory_space<vmem>>, %arg16: memref<1x8x32xf32, #tpu.memory_space<vmem>>) attributes {dimension_semantics = [#tpu.dimension_semantics<parallel>], iteration_bounds = array<i64: 2>, scalar_prefetch = 0 : i64, scratch_operands = 0 : i64, tpu.core_type = #tpu.core_type<tc>, window_params = [{transform_indices = @transform_0, window_bounds = array<i64: 1, 8, 32>}, {transform_indices = @transform_1, window_bounds = array<i64: 1, 8, 32>}, {pipeline_mode = #tpu.pipeline_mode<synchronous>, transform_indices = @transform_2, window_bounds = array<i64: 2, 32, 96>}, {pipeline_mode = #tpu.pipeline_mode<synchronous>, transform_indices = @transform_3, window_bounds = array<i64: 2, 1, 96>}, {pipeline_mode = #tpu.pipeline_mode<synchronous>, transform_indices = @transform_4, window_bounds = array<i64: 2, 32, 32>}, {pipeline_mode = #tpu.pipeline_mode<synchronous>, transform_indices = @transform_5, window_bounds = array<i64: 2, 32, 64>}, {pipeline_mode = #tpu.pipeline_mode<synchronous>, transform_indices = @transform_6, window_bounds = array<i64: 2, 1, 64>}, {pipeline_mode = #tpu.pipeline_mode<synchronous>, transform_indices = @transform_7, window_bounds = array<i64: 2, 64, 32>}, {pipeline_mode = #tpu.pipeline_mode<synchronous>, transform_indices = @transform_8, window_bounds = array<i64: 2, 6, 32>}, {pipeline_mode = #tpu.pipeline_mode<synchronous>, transform_indices = @transform_9, window_bounds = array<i64: 32, 96>}, {pipeline_mode = #tpu.pipeline_mode<synchronous>, transform_indices = @transform_10, window_bounds = array<i64: 1, 96>}, {pipeline_mode = #tpu.pipeline_mode<synchronous>, transform_indices = @transform_11, window_bounds = array<i64: 32, 96>}, {pipeline_mode = #tpu.pipeline_mode<synchronous>, transform_indices = @transform_12, window_bounds = array<i64: 1, 96>}, {pipeline_mode = #tpu.pipeline_mode<synchronous>, transform_indices = @transform_13, window_bounds = array<i64: 2, 32, 32>}, {pipeline_mode = #tpu.pipeline_mode<synchronous>, transform_indices = @transform_14, window_bounds = array<i64: 9, 32>}, {transform_indices = @transform_15, window_bounds = array<i64: 1, 8, 32>}]} {
    %c0 = arith.constant 0 : index
    %c0_0 = arith.constant 0 : index
    %c0_1 = arith.constant 0 : index
    %0 = vector.load %arg1[%c0, %c0_0, %c0_1] : memref<1x8x32xf32, #tpu.memory_space<vmem>>, vector<1x8x32xf32>
    %c0_2 = arith.constant 0 : index
    %c0_3 = arith.constant 0 : index
    %c0_4 = arith.constant 0 : index
    %1 = vector.load %arg2[%c0_2, %c0_3, %c0_4] : memref<1x8x32xf32, #tpu.memory_space<vmem>>, vector<1x8x32xf32>
    %2 = tpu.concatenate %0, %1 in 0 : vector<1x8x32xf32>, vector<1x8x32xf32> -> vector<2x8x32xf32>
    %3 = vector.shape_cast %2 : vector<2x8x32xf32> to vector<16x32xf32>
    %c0_5 = arith.constant 0 : index
    %c0_6 = arith.constant 0 : index
    %c0_7 = arith.constant 0 : index
    %4 = vector.load %arg9[%c0_5, %c0_6, %c0_7] : memref<2x6x32xf32, #tpu.memory_space<vmem>>, vector<1x6x32xf32>
    %5 = vector.shape_cast %4 : vector<1x6x32xf32> to vector<6x32xf32>
    %6 = vector.extract_strided_slice %5 {offsets = [0, 0], sizes = [1, 32], strides = [1, 1]} : vector<6x32xf32> to vector<1x32xf32>
    %7 = vector.extract_strided_slice %5 {offsets = [1, 0], sizes = [1, 32], strides = [1, 1]} : vector<6x32xf32> to vector<1x32xf32>
    %8 = vector.extract_strided_slice %5 {offsets = [2, 0], sizes = [1, 32], strides = [1, 1]} : vector<6x32xf32> to vector<1x32xf32>
    %9 = vector.extract_strided_slice %5 {offsets = [3, 0], sizes = [1, 32], strides = [1, 1]} : vector<6x32xf32> to vector<1x32xf32>
    %10 = vector.extract_strided_slice %5 {offsets = [4, 0], sizes = [1, 32], strides = [1, 1]} : vector<6x32xf32> to vector<1x32xf32>
    %11 = vector.extract_strided_slice %5 {offsets = [5, 0], sizes = [1, 32], strides = [1, 1]} : vector<6x32xf32> to vector<1x32xf32>
    %cst = arith.constant dense<0.000000e+00> : vector<16xf32>
    %12 = vector.multi_reduction <add>, %3, %cst [1] : vector<16x32xf32> to vector<16xf32>
    %13 = vector.shape_cast %12 : vector<16xf32> to vector<16x1xf32>
    %cst_8 = arith.constant 3.200000e+01 : f32
    %14 = vector.broadcast %cst_8 : f32 to vector<16x1xf32>
    %15 = arith.divf %13, %14 : vector<16x1xf32>
    %16 = vector.broadcast %15 : vector<16x1xf32> to vector<16x32xf32>
    %17 = arith.subf %3, %16 : vector<16x32xf32>
    %18 = arith.mulf %17, %17 : vector<16x32xf32>
    %cst_9 = arith.constant dense<0.000000e+00> : vector<16xf32>
    %19 = vector.multi_reduction <add>, %18, %cst_9 [1] : vector<16x32xf32> to vector<16xf32>
    %20 = vector.shape_cast %19 : vector<16xf32> to vector<16x1xf32>
    %cst_10 = arith.constant 3.200000e+01 : f32
    %21 = vector.broadcast %cst_10 : f32 to vector<16x1xf32>
    %22 = arith.divf %20, %21 : vector<16x1xf32>
    %cst_11 = arith.constant 9.99999974E-6 : f32
    %23 = vector.broadcast %cst_11 : f32 to vector<16x1xf32>
    %24 = arith.addf %22, %23 : vector<16x1xf32>
    %25 = math.rsqrt %24 : vector<16x1xf32>
    %26 = vector.broadcast %25 : vector<16x1xf32> to vector<16x32xf32>
    %27 = arith.mulf %17, %26 : vector<16x32xf32>
    %28 = vector.broadcast %6 : vector<1x32xf32> to vector<16x32xf32>
    %29 = arith.mulf %27, %28 : vector<16x32xf32>
    %30 = vector.broadcast %7 : vector<1x32xf32> to vector<16x32xf32>
    %31 = arith.addf %29, %30 : vector<16x32xf32>
    %32 = arith.truncf %31 : vector<16x32xf32> to vector<16x32xbf16>
    %c0_12 = arith.constant 0 : index
    %c0_13 = arith.constant 0 : index
    %c0_14 = arith.constant 0 : index
    %33 = vector.load %arg3[%c0_12, %c0_13, %c0_14] : memref<2x32x96xbf16, #tpu.memory_space<vmem>>, vector<1x32x96xbf16>
    %34 = vector.shape_cast %33 : vector<1x32x96xbf16> to vector<32x96xbf16>
    %cst_15 = arith.constant dense<0.000000e+00> : vector<16x96xf32>
    %35 = tpu.matmul %32, %34, %cst_15 {dimension_numbers = #tpu.dot_dimension_numbers<[1], [0], [0], [1], [0, 0, 1, 1], [], []>} : vector<16x32xbf16>, vector<32x96xbf16>, vector<16x96xf32> -> vector<16x96xf32>
    %c0_16 = arith.constant 0 : index
    %c0_17 = arith.constant 0 : index
    %c0_18 = arith.constant 0 : index
    %36 = vector.load %arg4[%c0_16, %c0_17, %c0_18] : memref<2x1x96xf32, #tpu.memory_space<vmem>>, vector<1x1x96xf32>
    %37 = vector.shape_cast %36 : vector<1x1x96xf32> to vector<1x96xf32>
    %38 = vector.broadcast %37 : vector<1x96xf32> to vector<16x96xf32>
    %39 = arith.addf %35, %38 : vector<16x96xf32>
    %40 = vector.extract_strided_slice %39 {offsets = [0, 0], sizes = [16, 32], strides = [1, 1]} : vector<16x96xf32> to vector<16x32xf32>
    %41 = vector.extract_strided_slice %39 {offsets = [0, 32], sizes = [16, 32], strides = [1, 1]} : vector<16x96xf32> to vector<16x32xf32>
    %42 = vector.extract_strided_slice %39 {offsets = [0, 64], sizes = [16, 32], strides = [1, 1]} : vector<16x96xf32> to vector<16x32xf32>
    %43 = vector.shape_cast %40 : vector<16x32xf32> to vector<2x8x4x8xf32>
    %44 = tpu.transpose %43, [0, 2, 1, 3] : vector<2x8x4x8xf32> -> vector<2x4x8x8xf32>
    %45 = vector.shape_cast %44 : vector<2x4x8x8xf32> to vector<8x8x8xf32>
    %46 = arith.truncf %45 : vector<8x8x8xf32> to vector<8x8x8xbf16>
    %47 = vector.shape_cast %41 : vector<16x32xf32> to vector<2x8x4x8xf32>
    %48 = tpu.transpose %47, [0, 2, 1, 3] : vector<2x8x4x8xf32> -> vector<2x4x8x8xf32>
    %49 = vector.shape_cast %48 : vector<2x4x8x8xf32> to vector<8x8x8xf32>
    %50 = arith.truncf %49 : vector<8x8x8xf32> to vector<8x8x8xbf16>
    %51 = vector.shape_cast %42 : vector<16x32xf32> to vector<2x8x4x8xf32>
    %52 = tpu.transpose %51, [0, 2, 1, 3] : vector<2x8x4x8xf32> -> vector<2x4x8x8xf32>
    %53 = vector.shape_cast %52 : vector<2x4x8x8xf32> to vector<8x8x8xf32>
    %54 = arith.truncf %53 : vector<8x8x8xf32> to vector<8x8x8xbf16>
    "tpu.trace_start"() <{level = 10 : i32, message = "hqd,hkd->hqk"}> : () -> ()
    %cst_19 = arith.constant dense<0.000000e+00> : vector<8x8x8xf32>
    %55 = tpu.matmul %46, %50, %cst_19 {dimension_numbers = #tpu.dot_dimension_numbers<[2], [2], [1], [1], [0, 0, 0, 1, 1, 1], [0], [0]>} : vector<8x8x8xbf16>, vector<8x8x8xbf16>, vector<8x8x8xf32> -> vector<8x8x8xf32>
    "tpu.trace_stop"() : () -> ()
    %cst_20 = arith.constant 0.353553385 : f32
    %56 = vector.broadcast %cst_20 : f32 to vector<8x8x8xf32>
    %57 = arith.mulf %55, %56 : vector<8x8x8xf32>
    %cst_21 = arith.constant dense<0xFF800000> : vector<8x8xf32>
    %58 = vector.multi_reduction <maximumf>, %57, %cst_21 [2] : vector<8x8x8xf32> to vector<8x8xf32>
    %59 = vector.shape_cast %58 : vector<8x8xf32> to vector<8x8x1xf32>
    %60 = vector.broadcast %59 : vector<8x8x1xf32> to vector<8x8x8xf32>
    %61 = arith.subf %57, %60 : vector<8x8x8xf32>
    %62 = math.exp %61 : vector<8x8x8xf32>
    %cst_22 = arith.constant dense<0.000000e+00> : vector<8x8xf32>
    %63 = vector.multi_reduction <add>, %62, %cst_22 [2] : vector<8x8x8xf32> to vector<8x8xf32>
    %64 = vector.shape_cast %63 : vector<8x8xf32> to vector<8x8x1xf32>
    %65 = tpu.reciprocal %64 {approx = true} : vector<8x8x1xf32> -> vector<8x8x1xf32>
    %66 = vector.broadcast %65 : vector<8x8x1xf32> to vector<8x8x8xf32>
    %67 = arith.mulf %62, %66 : vector<8x8x8xf32>
    %68 = arith.truncf %67 : vector<8x8x8xf32> to vector<8x8x8xbf16>
    "tpu.trace_start"() <{level = 10 : i32, message = "hqk,hkd->hqd"}> : () -> ()
    %cst_23 = arith.constant dense<0.000000e+00> : vector<8x8x8xf32>
    %69 = tpu.matmul %68, %54, %cst_23 {dimension_numbers = #tpu.dot_dimension_numbers<[2], [1], [1], [2], [0, 0, 0, 1, 1, 2], [0], [0]>} : vector<8x8x8xbf16>, vector<8x8x8xbf16>, vector<8x8x8xf32> -> vector<8x8x8xf32>
    "tpu.trace_stop"() : () -> ()
    %70 = vector.shape_cast %69 : vector<8x8x8xf32> to vector<2x4x8x8xf32>
    %71 = tpu.transpose %70, [0, 2, 1, 3] : vector<2x4x8x8xf32> -> vector<2x8x4x8xf32>
    %72 = vector.shape_cast %71 : vector<2x8x4x8xf32> to vector<16x32xf32>
    %73 = arith.truncf %72 : vector<16x32xf32> to vector<16x32xbf16>
    %c0_24 = arith.constant 0 : index
    %c0_25 = arith.constant 0 : index
    %c0_26 = arith.constant 0 : index
    %74 = vector.load %arg5[%c0_24, %c0_25, %c0_26] : memref<2x32x32xbf16, #tpu.memory_space<vmem>>, vector<1x32x32xbf16>
    %75 = vector.shape_cast %74 : vector<1x32x32xbf16> to vector<32x32xbf16>
    %cst_27 = arith.constant dense<0.000000e+00> : vector<16x32xf32>
    %76 = tpu.matmul %73, %75, %cst_27 {dimension_numbers = #tpu.dot_dimension_numbers<[1], [0], [0], [1], [0, 0, 1, 1], [], []>} : vector<16x32xbf16>, vector<32x32xbf16>, vector<16x32xf32> -> vector<16x32xf32>
    %77 = vector.broadcast %10 : vector<1x32xf32> to vector<16x32xf32>
    %78 = arith.addf %76, %77 : vector<16x32xf32>
    %cst_28 = arith.constant dense<0.000000e+00> : vector<16xf32>
    %79 = vector.multi_reduction <add>, %78, %cst_28 [1] : vector<16x32xf32> to vector<16xf32>
    %80 = vector.shape_cast %79 : vector<16xf32> to vector<16x1xf32>
    %cst_29 = arith.constant 3.200000e+01 : f32
    %81 = vector.broadcast %cst_29 : f32 to vector<16x1xf32>
    %82 = arith.divf %80, %81 : vector<16x1xf32>
    %83 = vector.broadcast %82 : vector<16x1xf32> to vector<16x32xf32>
    %84 = arith.subf %78, %83 : vector<16x32xf32>
    %85 = arith.mulf %84, %84 : vector<16x32xf32>
    %cst_30 = arith.constant dense<0.000000e+00> : vector<16xf32>
    %86 = vector.multi_reduction <add>, %85, %cst_30 [1] : vector<16x32xf32> to vector<16xf32>
    %87 = vector.shape_cast %86 : vector<16xf32> to vector<16x1xf32>
    %cst_31 = arith.constant 3.200000e+01 : f32
    %88 = vector.broadcast %cst_31 : f32 to vector<16x1xf32>
    %89 = arith.divf %87, %88 : vector<16x1xf32>
    %cst_32 = arith.constant 9.99999974E-6 : f32
    %90 = vector.broadcast %cst_32 : f32 to vector<16x1xf32>
    %91 = arith.addf %89, %90 : vector<16x1xf32>
    %92 = math.rsqrt %91 : vector<16x1xf32>
    %93 = vector.broadcast %92 : vector<16x1xf32> to vector<16x32xf32>
    %94 = arith.mulf %84, %93 : vector<16x32xf32>
    %95 = vector.broadcast %8 : vector<1x32xf32> to vector<16x32xf32>
    %96 = arith.mulf %94, %95 : vector<16x32xf32>
    %97 = vector.broadcast %9 : vector<1x32xf32> to vector<16x32xf32>
    %98 = arith.addf %96, %97 : vector<16x32xf32>
    %99 = arith.truncf %98 : vector<16x32xf32> to vector<16x32xbf16>
    %c0_33 = arith.constant 0 : index
    %c0_34 = arith.constant 0 : index
    %c0_35 = arith.constant 0 : index
    %100 = vector.load %arg6[%c0_33, %c0_34, %c0_35] : memref<2x32x64xbf16, #tpu.memory_space<vmem>>, vector<1x32x64xbf16>
    %101 = vector.shape_cast %100 : vector<1x32x64xbf16> to vector<32x64xbf16>
    %cst_36 = arith.constant dense<0.000000e+00> : vector<16x64xf32>
    %102 = tpu.matmul %99, %101, %cst_36 {dimension_numbers = #tpu.dot_dimension_numbers<[1], [0], [0], [1], [0, 0, 1, 1], [], []>} : vector<16x32xbf16>, vector<32x64xbf16>, vector<16x64xf32> -> vector<16x64xf32>
    %c0_37 = arith.constant 0 : index
    %c0_38 = arith.constant 0 : index
    %c0_39 = arith.constant 0 : index
    %103 = vector.load %arg7[%c0_37, %c0_38, %c0_39] : memref<2x1x64xf32, #tpu.memory_space<vmem>>, vector<1x1x64xf32>
    %104 = vector.shape_cast %103 : vector<1x1x64xf32> to vector<1x64xf32>
    %105 = vector.broadcast %104 : vector<1x64xf32> to vector<16x64xf32>
    %106 = arith.addf %102, %105 : vector<16x64xf32>
    %cst_40 = arith.constant 0.000000e+00 : f32
    %107 = vector.broadcast %cst_40 : f32 to vector<16x64xf32>
    %108 = arith.maximumf %106, %107 : vector<16x64xf32>
    %109 = arith.truncf %108 : vector<16x64xf32> to vector<16x64xbf16>
    %c0_41 = arith.constant 0 : index
    %c0_42 = arith.constant 0 : index
    %c0_43 = arith.constant 0 : index
    %110 = vector.load %arg8[%c0_41, %c0_42, %c0_43] : memref<2x64x32xbf16, #tpu.memory_space<vmem>>, vector<1x64x32xbf16>
    %111 = vector.shape_cast %110 : vector<1x64x32xbf16> to vector<64x32xbf16>
    %cst_44 = arith.constant dense<0.000000e+00> : vector<16x32xf32>
    %112 = tpu.matmul %109, %111, %cst_44 {dimension_numbers = #tpu.dot_dimension_numbers<[1], [0], [0], [1], [0, 0, 1, 1], [], []>} : vector<16x64xbf16>, vector<64x32xbf16>, vector<16x32xf32> -> vector<16x32xf32>
    %113 = vector.broadcast %11 : vector<1x32xf32> to vector<16x32xf32>
    %114 = arith.addf %112, %113 : vector<16x32xf32>
    %c1 = arith.constant 1 : index
    %c0_45 = arith.constant 0 : index
    %c0_46 = arith.constant 0 : index
    %115 = vector.load %arg9[%c1, %c0_45, %c0_46] : memref<2x6x32xf32, #tpu.memory_space<vmem>>, vector<1x6x32xf32>
    %116 = vector.shape_cast %115 : vector<1x6x32xf32> to vector<6x32xf32>
    %117 = vector.extract_strided_slice %116 {offsets = [0, 0], sizes = [1, 32], strides = [1, 1]} : vector<6x32xf32> to vector<1x32xf32>
    %118 = vector.extract_strided_slice %116 {offsets = [1, 0], sizes = [1, 32], strides = [1, 1]} : vector<6x32xf32> to vector<1x32xf32>
    %119 = vector.extract_strided_slice %116 {offsets = [2, 0], sizes = [1, 32], strides = [1, 1]} : vector<6x32xf32> to vector<1x32xf32>
    %120 = vector.extract_strided_slice %116 {offsets = [3, 0], sizes = [1, 32], strides = [1, 1]} : vector<6x32xf32> to vector<1x32xf32>
    %121 = vector.extract_strided_slice %116 {offsets = [4, 0], sizes = [1, 32], strides = [1, 1]} : vector<6x32xf32> to vector<1x32xf32>
    %122 = vector.extract_strided_slice %116 {offsets = [5, 0], sizes = [1, 32], strides = [1, 1]} : vector<6x32xf32> to vector<1x32xf32>
    %cst_47 = arith.constant dense<0.000000e+00> : vector<16xf32>
    %123 = vector.multi_reduction <add>, %114, %cst_47 [1] : vector<16x32xf32> to vector<16xf32>
    %124 = vector.shape_cast %123 : vector<16xf32> to vector<16x1xf32>
    %cst_48 = arith.constant 3.200000e+01 : f32
    %125 = vector.broadcast %cst_48 : f32 to vector<16x1xf32>
    %126 = arith.divf %124, %125 : vector<16x1xf32>
    %127 = vector.broadcast %126 : vector<16x1xf32> to vector<16x32xf32>
    %128 = arith.subf %114, %127 : vector<16x32xf32>
    %129 = arith.mulf %128, %128 : vector<16x32xf32>
    %cst_49 = arith.constant dense<0.000000e+00> : vector<16xf32>
    %130 = vector.multi_reduction <add>, %129, %cst_49 [1] : vector<16x32xf32> to vector<16xf32>
    %131 = vector.shape_cast %130 : vector<16xf32> to vector<16x1xf32>
    %cst_50 = arith.constant 3.200000e+01 : f32
    %132 = vector.broadcast %cst_50 : f32 to vector<16x1xf32>
    %133 = arith.divf %131, %132 : vector<16x1xf32>
    %cst_51 = arith.constant 9.99999974E-6 : f32
    %134 = vector.broadcast %cst_51 : f32 to vector<16x1xf32>
    %135 = arith.addf %133, %134 : vector<16x1xf32>
    %136 = math.rsqrt %135 : vector<16x1xf32>
    %137 = vector.broadcast %136 : vector<16x1xf32> to vector<16x32xf32>
    %138 = arith.mulf %128, %137 : vector<16x32xf32>
    %139 = vector.broadcast %117 : vector<1x32xf32> to vector<16x32xf32>
    %140 = arith.mulf %138, %139 : vector<16x32xf32>
    %141 = vector.broadcast %118 : vector<1x32xf32> to vector<16x32xf32>
    %142 = arith.addf %140, %141 : vector<16x32xf32>
    %143 = arith.truncf %142 : vector<16x32xf32> to vector<16x32xbf16>
    %c1_52 = arith.constant 1 : index
    %c0_53 = arith.constant 0 : index
    %c0_54 = arith.constant 0 : index
    %144 = vector.load %arg3[%c1_52, %c0_53, %c0_54] : memref<2x32x96xbf16, #tpu.memory_space<vmem>>, vector<1x32x96xbf16>
    %145 = vector.shape_cast %144 : vector<1x32x96xbf16> to vector<32x96xbf16>
    %cst_55 = arith.constant dense<0.000000e+00> : vector<16x96xf32>
    %146 = tpu.matmul %143, %145, %cst_55 {dimension_numbers = #tpu.dot_dimension_numbers<[1], [0], [0], [1], [0, 0, 1, 1], [], []>} : vector<16x32xbf16>, vector<32x96xbf16>, vector<16x96xf32> -> vector<16x96xf32>
    %c1_56 = arith.constant 1 : index
    %c0_57 = arith.constant 0 : index
    %c0_58 = arith.constant 0 : index
    %147 = vector.load %arg4[%c1_56, %c0_57, %c0_58] : memref<2x1x96xf32, #tpu.memory_space<vmem>>, vector<1x1x96xf32>
    %148 = vector.shape_cast %147 : vector<1x1x96xf32> to vector<1x96xf32>
    %149 = vector.broadcast %148 : vector<1x96xf32> to vector<16x96xf32>
    %150 = arith.addf %146, %149 : vector<16x96xf32>
    %151 = vector.extract_strided_slice %150 {offsets = [0, 0], sizes = [16, 32], strides = [1, 1]} : vector<16x96xf32> to vector<16x32xf32>
    %152 = vector.extract_strided_slice %150 {offsets = [0, 32], sizes = [16, 32], strides = [1, 1]} : vector<16x96xf32> to vector<16x32xf32>
    %153 = vector.extract_strided_slice %150 {offsets = [0, 64], sizes = [16, 32], strides = [1, 1]} : vector<16x96xf32> to vector<16x32xf32>
    %154 = vector.shape_cast %151 : vector<16x32xf32> to vector<2x8x4x8xf32>
    %155 = tpu.transpose %154, [0, 2, 1, 3] : vector<2x8x4x8xf32> -> vector<2x4x8x8xf32>
    %156 = vector.shape_cast %155 : vector<2x4x8x8xf32> to vector<8x8x8xf32>
    %157 = arith.truncf %156 : vector<8x8x8xf32> to vector<8x8x8xbf16>
    %158 = vector.shape_cast %152 : vector<16x32xf32> to vector<2x8x4x8xf32>
    %159 = tpu.transpose %158, [0, 2, 1, 3] : vector<2x8x4x8xf32> -> vector<2x4x8x8xf32>
    %160 = vector.shape_cast %159 : vector<2x4x8x8xf32> to vector<8x8x8xf32>
    %161 = arith.truncf %160 : vector<8x8x8xf32> to vector<8x8x8xbf16>
    %162 = vector.shape_cast %153 : vector<16x32xf32> to vector<2x8x4x8xf32>
    %163 = tpu.transpose %162, [0, 2, 1, 3] : vector<2x8x4x8xf32> -> vector<2x4x8x8xf32>
    %164 = vector.shape_cast %163 : vector<2x4x8x8xf32> to vector<8x8x8xf32>
    %165 = arith.truncf %164 : vector<8x8x8xf32> to vector<8x8x8xbf16>
    "tpu.trace_start"() <{level = 10 : i32, message = "hqd,hkd->hqk"}> : () -> ()
    %cst_59 = arith.constant dense<0.000000e+00> : vector<8x8x8xf32>
    %166 = tpu.matmul %157, %161, %cst_59 {dimension_numbers = #tpu.dot_dimension_numbers<[2], [2], [1], [1], [0, 0, 0, 1, 1, 1], [0], [0]>} : vector<8x8x8xbf16>, vector<8x8x8xbf16>, vector<8x8x8xf32> -> vector<8x8x8xf32>
    "tpu.trace_stop"() : () -> ()
    %cst_60 = arith.constant 0.353553385 : f32
    %167 = vector.broadcast %cst_60 : f32 to vector<8x8x8xf32>
    %168 = arith.mulf %166, %167 : vector<8x8x8xf32>
    %cst_61 = arith.constant dense<0xFF800000> : vector<8x8xf32>
    %169 = vector.multi_reduction <maximumf>, %168, %cst_61 [2] : vector<8x8x8xf32> to vector<8x8xf32>
    %170 = vector.shape_cast %169 : vector<8x8xf32> to vector<8x8x1xf32>
    %171 = vector.broadcast %170 : vector<8x8x1xf32> to vector<8x8x8xf32>
    %172 = arith.subf %168, %171 : vector<8x8x8xf32>
    %173 = math.exp %172 : vector<8x8x8xf32>
    %cst_62 = arith.constant dense<0.000000e+00> : vector<8x8xf32>
    %174 = vector.multi_reduction <add>, %173, %cst_62 [2] : vector<8x8x8xf32> to vector<8x8xf32>
    %175 = vector.shape_cast %174 : vector<8x8xf32> to vector<8x8x1xf32>
    %176 = tpu.reciprocal %175 {approx = true} : vector<8x8x1xf32> -> vector<8x8x1xf32>
    %177 = vector.broadcast %176 : vector<8x8x1xf32> to vector<8x8x8xf32>
    %178 = arith.mulf %173, %177 : vector<8x8x8xf32>
    %179 = arith.truncf %178 : vector<8x8x8xf32> to vector<8x8x8xbf16>
    "tpu.trace_start"() <{level = 10 : i32, message = "hqk,hkd->hqd"}> : () -> ()
    %cst_63 = arith.constant dense<0.000000e+00> : vector<8x8x8xf32>
    %180 = tpu.matmul %179, %165, %cst_63 {dimension_numbers = #tpu.dot_dimension_numbers<[2], [1], [1], [2], [0, 0, 0, 1, 1, 2], [0], [0]>} : vector<8x8x8xbf16>, vector<8x8x8xbf16>, vector<8x8x8xf32> -> vector<8x8x8xf32>
    "tpu.trace_stop"() : () -> ()
    %181 = vector.shape_cast %180 : vector<8x8x8xf32> to vector<2x4x8x8xf32>
    %182 = tpu.transpose %181, [0, 2, 1, 3] : vector<2x4x8x8xf32> -> vector<2x8x4x8xf32>
    %183 = vector.shape_cast %182 : vector<2x8x4x8xf32> to vector<16x32xf32>
    %184 = arith.truncf %183 : vector<16x32xf32> to vector<16x32xbf16>
    %c1_64 = arith.constant 1 : index
    %c0_65 = arith.constant 0 : index
    %c0_66 = arith.constant 0 : index
    %185 = vector.load %arg5[%c1_64, %c0_65, %c0_66] : memref<2x32x32xbf16, #tpu.memory_space<vmem>>, vector<1x32x32xbf16>
    %186 = vector.shape_cast %185 : vector<1x32x32xbf16> to vector<32x32xbf16>
    %cst_67 = arith.constant dense<0.000000e+00> : vector<16x32xf32>
    %187 = tpu.matmul %184, %186, %cst_67 {dimension_numbers = #tpu.dot_dimension_numbers<[1], [0], [0], [1], [0, 0, 1, 1], [], []>} : vector<16x32xbf16>, vector<32x32xbf16>, vector<16x32xf32> -> vector<16x32xf32>
    %188 = vector.broadcast %121 : vector<1x32xf32> to vector<16x32xf32>
    %189 = arith.addf %187, %188 : vector<16x32xf32>
    %cst_68 = arith.constant dense<0.000000e+00> : vector<16xf32>
    %190 = vector.multi_reduction <add>, %189, %cst_68 [1] : vector<16x32xf32> to vector<16xf32>
    %191 = vector.shape_cast %190 : vector<16xf32> to vector<16x1xf32>
    %cst_69 = arith.constant 3.200000e+01 : f32
    %192 = vector.broadcast %cst_69 : f32 to vector<16x1xf32>
    %193 = arith.divf %191, %192 : vector<16x1xf32>
    %194 = vector.broadcast %193 : vector<16x1xf32> to vector<16x32xf32>
    %195 = arith.subf %189, %194 : vector<16x32xf32>
    %196 = arith.mulf %195, %195 : vector<16x32xf32>
    %cst_70 = arith.constant dense<0.000000e+00> : vector<16xf32>
    %197 = vector.multi_reduction <add>, %196, %cst_70 [1] : vector<16x32xf32> to vector<16xf32>
    %198 = vector.shape_cast %197 : vector<16xf32> to vector<16x1xf32>
    %cst_71 = arith.constant 3.200000e+01 : f32
    %199 = vector.broadcast %cst_71 : f32 to vector<16x1xf32>
    %200 = arith.divf %198, %199 : vector<16x1xf32>
    %cst_72 = arith.constant 9.99999974E-6 : f32
    %201 = vector.broadcast %cst_72 : f32 to vector<16x1xf32>
    %202 = arith.addf %200, %201 : vector<16x1xf32>
    %203 = math.rsqrt %202 : vector<16x1xf32>
    %204 = vector.broadcast %203 : vector<16x1xf32> to vector<16x32xf32>
    %205 = arith.mulf %195, %204 : vector<16x32xf32>
    %206 = vector.broadcast %119 : vector<1x32xf32> to vector<16x32xf32>
    %207 = arith.mulf %205, %206 : vector<16x32xf32>
    %208 = vector.broadcast %120 : vector<1x32xf32> to vector<16x32xf32>
    %209 = arith.addf %207, %208 : vector<16x32xf32>
    %210 = arith.truncf %209 : vector<16x32xf32> to vector<16x32xbf16>
    %c1_73 = arith.constant 1 : index
    %c0_74 = arith.constant 0 : index
    %c0_75 = arith.constant 0 : index
    %211 = vector.load %arg6[%c1_73, %c0_74, %c0_75] : memref<2x32x64xbf16, #tpu.memory_space<vmem>>, vector<1x32x64xbf16>
    %212 = vector.shape_cast %211 : vector<1x32x64xbf16> to vector<32x64xbf16>
    %cst_76 = arith.constant dense<0.000000e+00> : vector<16x64xf32>
    %213 = tpu.matmul %210, %212, %cst_76 {dimension_numbers = #tpu.dot_dimension_numbers<[1], [0], [0], [1], [0, 0, 1, 1], [], []>} : vector<16x32xbf16>, vector<32x64xbf16>, vector<16x64xf32> -> vector<16x64xf32>
    %c1_77 = arith.constant 1 : index
    %c0_78 = arith.constant 0 : index
    %c0_79 = arith.constant 0 : index
    %214 = vector.load %arg7[%c1_77, %c0_78, %c0_79] : memref<2x1x64xf32, #tpu.memory_space<vmem>>, vector<1x1x64xf32>
    %215 = vector.shape_cast %214 : vector<1x1x64xf32> to vector<1x64xf32>
    %216 = vector.broadcast %215 : vector<1x64xf32> to vector<16x64xf32>
    %217 = arith.addf %213, %216 : vector<16x64xf32>
    %cst_80 = arith.constant 0.000000e+00 : f32
    %218 = vector.broadcast %cst_80 : f32 to vector<16x64xf32>
    %219 = arith.maximumf %217, %218 : vector<16x64xf32>
    %220 = arith.truncf %219 : vector<16x64xf32> to vector<16x64xbf16>
    %c1_81 = arith.constant 1 : index
    %c0_82 = arith.constant 0 : index
    %c0_83 = arith.constant 0 : index
    %221 = vector.load %arg8[%c1_81, %c0_82, %c0_83] : memref<2x64x32xbf16, #tpu.memory_space<vmem>>, vector<1x64x32xbf16>
    %222 = vector.shape_cast %221 : vector<1x64x32xbf16> to vector<64x32xbf16>
    %cst_84 = arith.constant dense<0.000000e+00> : vector<16x32xf32>
    %223 = tpu.matmul %220, %222, %cst_84 {dimension_numbers = #tpu.dot_dimension_numbers<[1], [0], [0], [1], [0, 0, 1, 1], [], []>} : vector<16x64xbf16>, vector<64x32xbf16>, vector<16x32xf32> -> vector<16x32xf32>
    %224 = vector.broadcast %122 : vector<1x32xf32> to vector<16x32xf32>
    %225 = arith.addf %223, %224 : vector<16x32xf32>
    %c0_85 = arith.constant 0 : index
    %c0_86 = arith.constant 0 : index
    %226 = vector.load %arg15[%c0_85, %c0_86] : memref<9x32xf32, #tpu.memory_space<vmem>>, vector<9x32xf32>
    %227 = vector.extract_strided_slice %225 {offsets = [0, 0], sizes = [8, 32], strides = [1, 1]} : vector<16x32xf32> to vector<8x32xf32>
    %228 = vector.extract_strided_slice %226 {offsets = [0, 0], sizes = [1, 32], strides = [1, 1]} : vector<9x32xf32> to vector<1x32xf32>
    %229 = vector.extract_strided_slice %226 {offsets = [1, 0], sizes = [1, 32], strides = [1, 1]} : vector<9x32xf32> to vector<1x32xf32>
    %cst_87 = arith.constant dense<0.000000e+00> : vector<8xf32>
    %230 = vector.multi_reduction <add>, %227, %cst_87 [1] : vector<8x32xf32> to vector<8xf32>
    %231 = vector.shape_cast %230 : vector<8xf32> to vector<8x1xf32>
    %cst_88 = arith.constant 3.200000e+01 : f32
    %232 = vector.broadcast %cst_88 : f32 to vector<8x1xf32>
    %233 = arith.divf %231, %232 : vector<8x1xf32>
    %234 = vector.broadcast %233 : vector<8x1xf32> to vector<8x32xf32>
    %235 = arith.subf %227, %234 : vector<8x32xf32>
    %236 = arith.mulf %235, %235 : vector<8x32xf32>
    %cst_89 = arith.constant dense<0.000000e+00> : vector<8xf32>
    %237 = vector.multi_reduction <add>, %236, %cst_89 [1] : vector<8x32xf32> to vector<8xf32>
    %238 = vector.shape_cast %237 : vector<8xf32> to vector<8x1xf32>
    %cst_90 = arith.constant 3.200000e+01 : f32
    %239 = vector.broadcast %cst_90 : f32 to vector<8x1xf32>
    %240 = arith.divf %238, %239 : vector<8x1xf32>
    %cst_91 = arith.constant 9.99999974E-6 : f32
    %241 = vector.broadcast %cst_91 : f32 to vector<8x1xf32>
    %242 = arith.addf %240, %241 : vector<8x1xf32>
    %243 = math.rsqrt %242 : vector<8x1xf32>
    %244 = vector.broadcast %243 : vector<8x1xf32> to vector<8x32xf32>
    %245 = arith.mulf %235, %244 : vector<8x32xf32>
    %246 = vector.broadcast %228 : vector<1x32xf32> to vector<8x32xf32>
    %247 = arith.mulf %245, %246 : vector<8x32xf32>
    %248 = vector.broadcast %229 : vector<1x32xf32> to vector<8x32xf32>
    %249 = arith.addf %247, %248 : vector<8x32xf32>
    %250 = vector.extract_strided_slice %225 {offsets = [8, 0], sizes = [8, 32], strides = [1, 1]} : vector<16x32xf32> to vector<8x32xf32>
    %251 = vector.extract_strided_slice %226 {offsets = [2, 0], sizes = [1, 32], strides = [1, 1]} : vector<9x32xf32> to vector<1x32xf32>
    %252 = vector.extract_strided_slice %226 {offsets = [3, 0], sizes = [1, 32], strides = [1, 1]} : vector<9x32xf32> to vector<1x32xf32>
    %cst_92 = arith.constant dense<0.000000e+00> : vector<8xf32>
    %253 = vector.multi_reduction <add>, %250, %cst_92 [1] : vector<8x32xf32> to vector<8xf32>
    %254 = vector.shape_cast %253 : vector<8xf32> to vector<8x1xf32>
    %cst_93 = arith.constant 3.200000e+01 : f32
    %255 = vector.broadcast %cst_93 : f32 to vector<8x1xf32>
    %256 = arith.divf %254, %255 : vector<8x1xf32>
    %257 = vector.broadcast %256 : vector<8x1xf32> to vector<8x32xf32>
    %258 = arith.subf %250, %257 : vector<8x32xf32>
    %259 = arith.mulf %258, %258 : vector<8x32xf32>
    %cst_94 = arith.constant dense<0.000000e+00> : vector<8xf32>
    %260 = vector.multi_reduction <add>, %259, %cst_94 [1] : vector<8x32xf32> to vector<8xf32>
    %261 = vector.shape_cast %260 : vector<8xf32> to vector<8x1xf32>
    %cst_95 = arith.constant 3.200000e+01 : f32
    %262 = vector.broadcast %cst_95 : f32 to vector<8x1xf32>
    %263 = arith.divf %261, %262 : vector<8x1xf32>
    %cst_96 = arith.constant 9.99999974E-6 : f32
    %264 = vector.broadcast %cst_96 : f32 to vector<8x1xf32>
    %265 = arith.addf %263, %264 : vector<8x1xf32>
    %266 = math.rsqrt %265 : vector<8x1xf32>
    %267 = vector.broadcast %266 : vector<8x1xf32> to vector<8x32xf32>
    %268 = arith.mulf %258, %267 : vector<8x32xf32>
    %269 = vector.broadcast %251 : vector<1x32xf32> to vector<8x32xf32>
    %270 = arith.mulf %268, %269 : vector<8x32xf32>
    %271 = vector.broadcast %252 : vector<1x32xf32> to vector<8x32xf32>
    %272 = arith.addf %270, %271 : vector<8x32xf32>
    %273 = vector.extract_strided_slice %226 {offsets = [4, 0], sizes = [1, 32], strides = [1, 1]} : vector<9x32xf32> to vector<1x32xf32>
    %274 = vector.extract_strided_slice %226 {offsets = [5, 0], sizes = [1, 32], strides = [1, 1]} : vector<9x32xf32> to vector<1x32xf32>
    %275 = vector.extract_strided_slice %226 {offsets = [6, 0], sizes = [1, 32], strides = [1, 1]} : vector<9x32xf32> to vector<1x32xf32>
    %276 = vector.extract_strided_slice %226 {offsets = [7, 0], sizes = [1, 32], strides = [1, 1]} : vector<9x32xf32> to vector<1x32xf32>
    %277 = vector.extract_strided_slice %226 {offsets = [8, 0], sizes = [1, 32], strides = [1, 1]} : vector<9x32xf32> to vector<1x32xf32>
    %278 = arith.truncf %249 : vector<8x32xf32> to vector<8x32xbf16>
    %c0_97 = arith.constant 0 : index
    %c0_98 = arith.constant 0 : index
    %279 = vector.load %arg10[%c0_97, %c0_98] : memref<32x96xbf16, #tpu.memory_space<vmem>>, vector<32x96xbf16>
    %cst_99 = arith.constant dense<0.000000e+00> : vector<8x96xf32>
    %280 = tpu.matmul %278, %279, %cst_99 {dimension_numbers = #tpu.dot_dimension_numbers<[1], [0], [0], [1], [0, 0, 1, 1], [], []>} : vector<8x32xbf16>, vector<32x96xbf16>, vector<8x96xf32> -> vector<8x96xf32>
    %c0_100 = arith.constant 0 : index
    %c0_101 = arith.constant 0 : index
    %281 = vector.load %arg11[%c0_100, %c0_101] : memref<1x96xf32, #tpu.memory_space<vmem>>, vector<1x96xf32>
    %282 = vector.broadcast %281 : vector<1x96xf32> to vector<8x96xf32>
    %283 = arith.addf %280, %282 : vector<8x96xf32>
    %284 = arith.truncf %272 : vector<8x32xf32> to vector<8x32xbf16>
    %c0_102 = arith.constant 0 : index
    %c0_103 = arith.constant 0 : index
    %285 = vector.load %arg12[%c0_102, %c0_103] : memref<32x96xbf16, #tpu.memory_space<vmem>>, vector<32x96xbf16>
    %cst_104 = arith.constant dense<0.000000e+00> : vector<8x96xf32>
    %286 = tpu.matmul %284, %285, %cst_104 {dimension_numbers = #tpu.dot_dimension_numbers<[1], [0], [0], [1], [0, 0, 1, 1], [], []>} : vector<8x32xbf16>, vector<32x96xbf16>, vector<8x96xf32> -> vector<8x96xf32>
    %c0_105 = arith.constant 0 : index
    %c0_106 = arith.constant 0 : index
    %287 = vector.load %arg13[%c0_105, %c0_106] : memref<1x96xf32, #tpu.memory_space<vmem>>, vector<1x96xf32>
    %288 = vector.broadcast %287 : vector<1x96xf32> to vector<8x96xf32>
    %289 = arith.addf %286, %288 : vector<8x96xf32>
    %290 = vector.extract_strided_slice %283 {offsets = [0, 0], sizes = [8, 32], strides = [1, 1]} : vector<8x96xf32> to vector<8x32xf32>
    %cst_107 = arith.constant dense<0.000000e+00> : vector<8xf32>
    %291 = vector.multi_reduction <add>, %290, %cst_107 [1] : vector<8x32xf32> to vector<8xf32>
    %292 = vector.shape_cast %291 : vector<8xf32> to vector<8x1xf32>
    %cst_108 = arith.constant 3.200000e+01 : f32
    %293 = vector.broadcast %cst_108 : f32 to vector<8x1xf32>
    %294 = arith.divf %292, %293 : vector<8x1xf32>
    %295 = vector.broadcast %294 : vector<8x1xf32> to vector<8x32xf32>
    %296 = arith.subf %290, %295 : vector<8x32xf32>
    %297 = arith.mulf %296, %296 : vector<8x32xf32>
    %cst_109 = arith.constant dense<0.000000e+00> : vector<8xf32>
    %298 = vector.multi_reduction <add>, %297, %cst_109 [1] : vector<8x32xf32> to vector<8xf32>
    %299 = vector.shape_cast %298 : vector<8xf32> to vector<8x1xf32>
    %cst_110 = arith.constant 3.200000e+01 : f32
    %300 = vector.broadcast %cst_110 : f32 to vector<8x1xf32>
    %301 = arith.divf %299, %300 : vector<8x1xf32>
    %cst_111 = arith.constant 9.99999974E-6 : f32
    %302 = vector.broadcast %cst_111 : f32 to vector<8x1xf32>
    %303 = arith.addf %301, %302 : vector<8x1xf32>
    %304 = math.rsqrt %303 : vector<8x1xf32>
    %305 = vector.broadcast %304 : vector<8x1xf32> to vector<8x32xf32>
    %306 = arith.mulf %296, %305 : vector<8x32xf32>
    %307 = vector.broadcast %273 : vector<1x32xf32> to vector<8x32xf32>
    %308 = arith.mulf %306, %307 : vector<8x32xf32>
    %309 = vector.broadcast %274 : vector<1x32xf32> to vector<8x32xf32>
    %310 = arith.addf %308, %309 : vector<8x32xf32>
    %311 = vector.extract_strided_slice %283 {offsets = [0, 32], sizes = [8, 32], strides = [1, 1]} : vector<8x96xf32> to vector<8x32xf32>
    %cst_112 = arith.constant dense<0.000000e+00> : vector<8xf32>
    %312 = vector.multi_reduction <add>, %311, %cst_112 [1] : vector<8x32xf32> to vector<8xf32>
    %313 = vector.shape_cast %312 : vector<8xf32> to vector<8x1xf32>
    %cst_113 = arith.constant 3.200000e+01 : f32
    %314 = vector.broadcast %cst_113 : f32 to vector<8x1xf32>
    %315 = arith.divf %313, %314 : vector<8x1xf32>
    %316 = vector.broadcast %315 : vector<8x1xf32> to vector<8x32xf32>
    %317 = arith.subf %311, %316 : vector<8x32xf32>
    %318 = arith.mulf %317, %317 : vector<8x32xf32>
    %cst_114 = arith.constant dense<0.000000e+00> : vector<8xf32>
    %319 = vector.multi_reduction <add>, %318, %cst_114 [1] : vector<8x32xf32> to vector<8xf32>
    %320 = vector.shape_cast %319 : vector<8xf32> to vector<8x1xf32>
    %cst_115 = arith.constant 3.200000e+01 : f32
    %321 = vector.broadcast %cst_115 : f32 to vector<8x1xf32>
    %322 = arith.divf %320, %321 : vector<8x1xf32>
    %cst_116 = arith.constant 9.99999974E-6 : f32
    %323 = vector.broadcast %cst_116 : f32 to vector<8x1xf32>
    %324 = arith.addf %322, %323 : vector<8x1xf32>
    %325 = math.rsqrt %324 : vector<8x1xf32>
    %326 = vector.broadcast %325 : vector<8x1xf32> to vector<8x32xf32>
    %327 = arith.mulf %317, %326 : vector<8x32xf32>
    %328 = vector.broadcast %273 : vector<1x32xf32> to vector<8x32xf32>
    %329 = arith.mulf %327, %328 : vector<8x32xf32>
    %330 = vector.broadcast %274 : vector<1x32xf32> to vector<8x32xf32>
    %331 = arith.addf %329, %330 : vector<8x32xf32>
    %332 = vector.extract_strided_slice %283 {offsets = [0, 64], sizes = [8, 32], strides = [1, 1]} : vector<8x96xf32> to vector<8x32xf32>
    %333 = vector.extract_strided_slice %289 {offsets = [0, 0], sizes = [8, 32], strides = [1, 1]} : vector<8x96xf32> to vector<8x32xf32>
    %cst_117 = arith.constant dense<0.000000e+00> : vector<8xf32>
    %334 = vector.multi_reduction <add>, %333, %cst_117 [1] : vector<8x32xf32> to vector<8xf32>
    %335 = vector.shape_cast %334 : vector<8xf32> to vector<8x1xf32>
    %cst_118 = arith.constant 3.200000e+01 : f32
    %336 = vector.broadcast %cst_118 : f32 to vector<8x1xf32>
    %337 = arith.divf %335, %336 : vector<8x1xf32>
    %338 = vector.broadcast %337 : vector<8x1xf32> to vector<8x32xf32>
    %339 = arith.subf %333, %338 : vector<8x32xf32>
    %340 = arith.mulf %339, %339 : vector<8x32xf32>
    %cst_119 = arith.constant dense<0.000000e+00> : vector<8xf32>
    %341 = vector.multi_reduction <add>, %340, %cst_119 [1] : vector<8x32xf32> to vector<8xf32>
    %342 = vector.shape_cast %341 : vector<8xf32> to vector<8x1xf32>
    %cst_120 = arith.constant 3.200000e+01 : f32
    %343 = vector.broadcast %cst_120 : f32 to vector<8x1xf32>
    %344 = arith.divf %342, %343 : vector<8x1xf32>
    %cst_121 = arith.constant 9.99999974E-6 : f32
    %345 = vector.broadcast %cst_121 : f32 to vector<8x1xf32>
    %346 = arith.addf %344, %345 : vector<8x1xf32>
    %347 = math.rsqrt %346 : vector<8x1xf32>
    %348 = vector.broadcast %347 : vector<8x1xf32> to vector<8x32xf32>
    %349 = arith.mulf %339, %348 : vector<8x32xf32>
    %350 = vector.broadcast %275 : vector<1x32xf32> to vector<8x32xf32>
    %351 = arith.mulf %349, %350 : vector<8x32xf32>
    %352 = vector.broadcast %276 : vector<1x32xf32> to vector<8x32xf32>
    %353 = arith.addf %351, %352 : vector<8x32xf32>
    %354 = vector.extract_strided_slice %289 {offsets = [0, 32], sizes = [8, 32], strides = [1, 1]} : vector<8x96xf32> to vector<8x32xf32>
    %cst_122 = arith.constant dense<0.000000e+00> : vector<8xf32>
    %355 = vector.multi_reduction <add>, %354, %cst_122 [1] : vector<8x32xf32> to vector<8xf32>
    %356 = vector.shape_cast %355 : vector<8xf32> to vector<8x1xf32>
    %cst_123 = arith.constant 3.200000e+01 : f32
    %357 = vector.broadcast %cst_123 : f32 to vector<8x1xf32>
    %358 = arith.divf %356, %357 : vector<8x1xf32>
    %359 = vector.broadcast %358 : vector<8x1xf32> to vector<8x32xf32>
    %360 = arith.subf %354, %359 : vector<8x32xf32>
    %361 = arith.mulf %360, %360 : vector<8x32xf32>
    %cst_124 = arith.constant dense<0.000000e+00> : vector<8xf32>
    %362 = vector.multi_reduction <add>, %361, %cst_124 [1] : vector<8x32xf32> to vector<8xf32>
    %363 = vector.shape_cast %362 : vector<8xf32> to vector<8x1xf32>
    %cst_125 = arith.constant 3.200000e+01 : f32
    %364 = vector.broadcast %cst_125 : f32 to vector<8x1xf32>
    %365 = arith.divf %363, %364 : vector<8x1xf32>
    %cst_126 = arith.constant 9.99999974E-6 : f32
    %366 = vector.broadcast %cst_126 : f32 to vector<8x1xf32>
    %367 = arith.addf %365, %366 : vector<8x1xf32>
    %368 = math.rsqrt %367 : vector<8x1xf32>
    %369 = vector.broadcast %368 : vector<8x1xf32> to vector<8x32xf32>
    %370 = arith.mulf %360, %369 : vector<8x32xf32>
    %371 = vector.broadcast %275 : vector<1x32xf32> to vector<8x32xf32>
    %372 = arith.mulf %370, %371 : vector<8x32xf32>
    %373 = vector.broadcast %276 : vector<1x32xf32> to vector<8x32xf32>
    %374 = arith.addf %372, %373 : vector<8x32xf32>
    %375 = vector.extract_strided_slice %289 {offsets = [0, 64], sizes = [8, 32], strides = [1, 1]} : vector<8x96xf32> to vector<8x32xf32>
    %376 = vector.shape_cast %310 : vector<8x32xf32> to vector<1x8x32xf32>
    %377 = arith.truncf %376 : vector<1x8x32xf32> to vector<1x8x32xbf16>
    %378 = vector.shape_cast %374 : vector<8x32xf32> to vector<1x8x32xf32>
    %379 = arith.truncf %378 : vector<1x8x32xf32> to vector<1x8x32xbf16>
    "tpu.trace_start"() <{level = 10 : i32, message = "bqd,bkd->bqk"}> : () -> ()
    %cst_127 = arith.constant dense<0.000000e+00> : vector<1x8x8xf32>
    %380 = tpu.matmul %377, %379, %cst_127 {dimension_numbers = #tpu.dot_dimension_numbers<[2], [2], [1], [1], [0, 0, 0, 1, 1, 1], [0], [0]>} : vector<1x8x32xbf16>, vector<1x8x32xbf16>, vector<1x8x8xf32> -> vector<1x8x8xf32>
    "tpu.trace_stop"() : () -> ()
    %cst_128 = arith.constant 0.176776692 : f32
    %381 = vector.broadcast %cst_128 : f32 to vector<1x8x8xf32>
    %382 = arith.mulf %380, %381 : vector<1x8x8xf32>
    %cst_129 = arith.constant dense<0xFF800000> : vector<1x8xf32>
    %383 = vector.multi_reduction <maximumf>, %382, %cst_129 [2] : vector<1x8x8xf32> to vector<1x8xf32>
    %384 = vector.shape_cast %383 : vector<1x8xf32> to vector<1x8x1xf32>
    %385 = vector.broadcast %384 : vector<1x8x1xf32> to vector<1x8x8xf32>
    %386 = arith.subf %382, %385 : vector<1x8x8xf32>
    %387 = math.exp %386 : vector<1x8x8xf32>
    %cst_130 = arith.constant dense<0.000000e+00> : vector<1x8xf32>
    %388 = vector.multi_reduction <add>, %387, %cst_130 [2] : vector<1x8x8xf32> to vector<1x8xf32>
    %389 = vector.shape_cast %388 : vector<1x8xf32> to vector<1x8x1xf32>
    %390 = tpu.reciprocal %389 {approx = true} : vector<1x8x1xf32> -> vector<1x8x1xf32>
    %391 = vector.broadcast %390 : vector<1x8x1xf32> to vector<1x8x8xf32>
    %392 = arith.mulf %387, %391 : vector<1x8x8xf32>
    %393 = arith.truncf %392 : vector<1x8x8xf32> to vector<1x8x8xbf16>
    %394 = vector.shape_cast %375 : vector<8x32xf32> to vector<1x8x32xf32>
    %395 = arith.truncf %394 : vector<1x8x32xf32> to vector<1x8x32xbf16>
    "tpu.trace_start"() <{level = 10 : i32, message = "bqk,bkd->bqd"}> : () -> ()
    %cst_131 = arith.constant dense<0.000000e+00> : vector<1x8x32xf32>
    %396 = tpu.matmul %393, %395, %cst_131 {dimension_numbers = #tpu.dot_dimension_numbers<[2], [1], [1], [2], [0, 0, 0, 1, 1, 2], [0], [0]>} : vector<1x8x8xbf16>, vector<1x8x32xbf16>, vector<1x8x32xf32> -> vector<1x8x32xf32>
    "tpu.trace_stop"() : () -> ()
    %397 = vector.shape_cast %353 : vector<8x32xf32> to vector<1x8x32xf32>
    %398 = arith.truncf %397 : vector<1x8x32xf32> to vector<1x8x32xbf16>
    %399 = vector.shape_cast %331 : vector<8x32xf32> to vector<1x8x32xf32>
    %400 = arith.truncf %399 : vector<1x8x32xf32> to vector<1x8x32xbf16>
    "tpu.trace_start"() <{level = 10 : i32, message = "bqd,bkd->bqk"}> : () -> ()
    %cst_132 = arith.constant dense<0.000000e+00> : vector<1x8x8xf32>
    %401 = tpu.matmul %398, %400, %cst_132 {dimension_numbers = #tpu.dot_dimension_numbers<[2], [2], [1], [1], [0, 0, 0, 1, 1, 1], [0], [0]>} : vector<1x8x32xbf16>, vector<1x8x32xbf16>, vector<1x8x8xf32> -> vector<1x8x8xf32>
    "tpu.trace_stop"() : () -> ()
    %cst_133 = arith.constant 0.176776692 : f32
    %402 = vector.broadcast %cst_133 : f32 to vector<1x8x8xf32>
    %403 = arith.mulf %401, %402 : vector<1x8x8xf32>
    %cst_134 = arith.constant dense<0xFF800000> : vector<1x8xf32>
    %404 = vector.multi_reduction <maximumf>, %403, %cst_134 [2] : vector<1x8x8xf32> to vector<1x8xf32>
    %405 = vector.shape_cast %404 : vector<1x8xf32> to vector<1x8x1xf32>
    %406 = vector.broadcast %405 : vector<1x8x1xf32> to vector<1x8x8xf32>
    %407 = arith.subf %403, %406 : vector<1x8x8xf32>
    %408 = math.exp %407 : vector<1x8x8xf32>
    %cst_135 = arith.constant dense<0.000000e+00> : vector<1x8xf32>
    %409 = vector.multi_reduction <add>, %408, %cst_135 [2] : vector<1x8x8xf32> to vector<1x8xf32>
    %410 = vector.shape_cast %409 : vector<1x8xf32> to vector<1x8x1xf32>
    %411 = tpu.reciprocal %410 {approx = true} : vector<1x8x1xf32> -> vector<1x8x1xf32>
    %412 = vector.broadcast %411 : vector<1x8x1xf32> to vector<1x8x8xf32>
    %413 = arith.mulf %408, %412 : vector<1x8x8xf32>
    %414 = arith.truncf %413 : vector<1x8x8xf32> to vector<1x8x8xbf16>
    %415 = vector.shape_cast %332 : vector<8x32xf32> to vector<1x8x32xf32>
    %416 = arith.truncf %415 : vector<1x8x32xf32> to vector<1x8x32xbf16>
    "tpu.trace_start"() <{level = 10 : i32, message = "bqk,bkd->bqd"}> : () -> ()
    %cst_136 = arith.constant dense<0.000000e+00> : vector<1x8x32xf32>
    %417 = tpu.matmul %414, %416, %cst_136 {dimension_numbers = #tpu.dot_dimension_numbers<[2], [1], [1], [2], [0, 0, 0, 1, 1, 2], [0], [0]>} : vector<1x8x8xbf16>, vector<1x8x32xbf16>, vector<1x8x32xf32> -> vector<1x8x32xf32>
    "tpu.trace_stop"() : () -> ()
    %418 = vector.shape_cast %396 : vector<1x8x32xf32> to vector<8x32xf32>
    %419 = arith.truncf %418 : vector<8x32xf32> to vector<8x32xbf16>
    %c0_137 = arith.constant 0 : index
    %c0_138 = arith.constant 0 : index
    %c0_139 = arith.constant 0 : index
    %420 = vector.load %arg14[%c0_137, %c0_138, %c0_139] : memref<2x32x32xbf16, #tpu.memory_space<vmem>>, vector<1x32x32xbf16>
    %421 = vector.shape_cast %420 : vector<1x32x32xbf16> to vector<32x32xbf16>
    %cst_140 = arith.constant dense<0.000000e+00> : vector<8x32xf32>
    %422 = tpu.matmul %419, %421, %cst_140 {dimension_numbers = #tpu.dot_dimension_numbers<[1], [0], [0], [1], [0, 0, 1, 1], [], []>} : vector<8x32xbf16>, vector<32x32xbf16>, vector<8x32xf32> -> vector<8x32xf32>
    %423 = vector.shape_cast %417 : vector<1x8x32xf32> to vector<8x32xf32>
    %424 = arith.truncf %423 : vector<8x32xf32> to vector<8x32xbf16>
    %c1_141 = arith.constant 1 : index
    %c0_142 = arith.constant 0 : index
    %c0_143 = arith.constant 0 : index
    %425 = vector.load %arg14[%c1_141, %c0_142, %c0_143] : memref<2x32x32xbf16, #tpu.memory_space<vmem>>, vector<1x32x32xbf16>
    %426 = vector.shape_cast %425 : vector<1x32x32xbf16> to vector<32x32xbf16>
    %cst_144 = arith.constant dense<0.000000e+00> : vector<8x32xf32>
    %427 = tpu.matmul %424, %426, %cst_144 {dimension_numbers = #tpu.dot_dimension_numbers<[1], [0], [0], [1], [0, 0, 1, 1], [], []>} : vector<8x32xbf16>, vector<32x32xbf16>, vector<8x32xf32> -> vector<8x32xf32>
    %428 = arith.addf %422, %427 : vector<8x32xf32>
    %429 = vector.broadcast %277 : vector<1x32xf32> to vector<8x32xf32>
    %430 = arith.addf %428, %429 : vector<8x32xf32>
    %431 = vector.shape_cast %430 : vector<8x32xf32> to vector<1x8x32xf32>
    %c0_145 = arith.constant 0 : index
    %c0_146 = arith.constant 0 : index
    %c0_147 = arith.constant 0 : index
    %432 = vector.load %arg16[%c0_145, %c0_146, %c0_147] : memref<1x8x32xf32, #tpu.memory_space<vmem>>, vector<1x8x32xf32>
    tpu.vector_store %arg16[%c0_145, %c0_146, %c0_147], %431 {strides = array<i32>} : memref<1x8x32xf32, #tpu.memory_space<vmem>>, vector<1x8x32xf32>,
    return
  }
  func.func @transform_0(%arg0: i32) -> (i32, i32, i32) {
    %c0_i32 = arith.constant 0 : i32
    %c0_i32_0 = arith.constant 0 : i32
    %c0_i32_1 = arith.constant 0 : i32
    return %arg0, %c0_i32, %c0_i32_0 : i32, i32, i32
  }
  func.func @transform_1(%arg0: i32) -> (i32, i32, i32) {
    %c0_i32 = arith.constant 0 : i32
    %c0_i32_0 = arith.constant 0 : i32
    %c0_i32_1 = arith.constant 0 : i32
    return %arg0, %c0_i32, %c0_i32_0 : i32, i32, i32
  }
  func.func @transform_2(%arg0: i32) -> (i32, i32, i32) {
    %c0_i32 = arith.constant 0 : i32
    %c0_i32_0 = arith.constant 0 : i32
    %c0_i32_1 = arith.constant 0 : i32
    %c0_i32_2 = arith.constant 0 : i32
    return %c0_i32, %c0_i32_0, %c0_i32_1 : i32, i32, i32
  }
  func.func @transform_3(%arg0: i32) -> (i32, i32, i32) {
    %c0_i32 = arith.constant 0 : i32
    %c0_i32_0 = arith.constant 0 : i32
    %c0_i32_1 = arith.constant 0 : i32
    %c0_i32_2 = arith.constant 0 : i32
    return %c0_i32, %c0_i32_0, %c0_i32_1 : i32, i32, i32
  }
  func.func @transform_4(%arg0: i32) -> (i32, i32, i32) {
    %c0_i32 = arith.constant 0 : i32
    %c0_i32_0 = arith.constant 0 : i32
    %c0_i32_1 = arith.constant 0 : i32
    %c0_i32_2 = arith.constant 0 : i32
    return %c0_i32, %c0_i32_0, %c0_i32_1 : i32, i32, i32
  }
  func.func @transform_5(%arg0: i32) -> (i32, i32, i32) {
    %c0_i32 = arith.constant 0 : i32
    %c0_i32_0 = arith.constant 0 : i32
    %c0_i32_1 = arith.constant 0 : i32
    %c0_i32_2 = arith.constant 0 : i32
    return %c0_i32, %c0_i32_0, %c0_i32_1 : i32, i32, i32
  }
  func.func @transform_6(%arg0: i32) -> (i32, i32, i32) {
    %c0_i32 = arith.constant 0 : i32
    %c0_i32_0 = arith.constant 0 : i32
    %c0_i32_1 = arith.constant 0 : i32
    %c0_i32_2 = arith.constant 0 : i32
    return %c0_i32, %c0_i32_0, %c0_i32_1 : i32, i32, i32
  }
  func.func @transform_7(%arg0: i32) -> (i32, i32, i32) {
    %c0_i32 = arith.constant 0 : i32
    %c0_i32_0 = arith.constant 0 : i32
    %c0_i32_1 = arith.constant 0 : i32
    %c0_i32_2 = arith.constant 0 : i32
    return %c0_i32, %c0_i32_0, %c0_i32_1 : i32, i32, i32
  }
  func.func @transform_8(%arg0: i32) -> (i32, i32, i32) {
    %c0_i32 = arith.constant 0 : i32
    %c0_i32_0 = arith.constant 0 : i32
    %c0_i32_1 = arith.constant 0 : i32
    %c0_i32_2 = arith.constant 0 : i32
    return %c0_i32, %c0_i32_0, %c0_i32_1 : i32, i32, i32
  }
  func.func @transform_9(%arg0: i32) -> (i32, i32) {
    %c0_i32 = arith.constant 0 : i32
    %c0_i32_0 = arith.constant 0 : i32
    %c0_i32_1 = arith.constant 0 : i32
    return %c0_i32, %c0_i32_0 : i32, i32
  }
  func.func @transform_10(%arg0: i32) -> (i32, i32) {
    %c0_i32 = arith.constant 0 : i32
    %c0_i32_0 = arith.constant 0 : i32
    %c0_i32_1 = arith.constant 0 : i32
    return %c0_i32, %c0_i32_0 : i32, i32
  }
  func.func @transform_11(%arg0: i32) -> (i32, i32) {
    %c0_i32 = arith.constant 0 : i32
    %c0_i32_0 = arith.constant 0 : i32
    %c0_i32_1 = arith.constant 0 : i32
    return %c0_i32, %c0_i32_0 : i32, i32
  }
  func.func @transform_12(%arg0: i32) -> (i32, i32) {
    %c0_i32 = arith.constant 0 : i32
    %c0_i32_0 = arith.constant 0 : i32
    %c0_i32_1 = arith.constant 0 : i32
    return %c0_i32, %c0_i32_0 : i32, i32
  }
  func.func @transform_13(%arg0: i32) -> (i32, i32, i32) {
    %c0_i32 = arith.constant 0 : i32
    %c0_i32_0 = arith.constant 0 : i32
    %c0_i32_1 = arith.constant 0 : i32
    %c0_i32_2 = arith.constant 0 : i32
    return %c0_i32, %c0_i32_0, %c0_i32_1 : i32, i32, i32
  }
  func.func @transform_14(%arg0: i32) -> (i32, i32) {
    %c0_i32 = arith.constant 0 : i32
    %c0_i32_0 = arith.constant 0 : i32
    %c0_i32_1 = arith.constant 0 : i32
    return %c0_i32, %c0_i32_0 : i32, i32
  }
  func.func @transform_15(%arg0: i32) -> (i32, i32, i32) {
    %c0_i32 = arith.constant 0 : i32
    %c0_i32_0 = arith.constant 0 : i32
    %c0_i32_1 = arith.constant 0 : i32
    return %arg0, %c0_i32, %c0_i32_0 : i32, i32, i32
  }
}

</mosaic_0001>

<bundles_post_ra>
// kernel: tpu_custom_call.1
= control target key start
LH: loop header
LB: loop body
LE: loop exit
PB: predicated region body
PF: predicated region fallthrough
CT: control target
= control target key end

     0   :  { %s9068_s0 = inlined_call_operand.hbm [shape: f32[2,8,32], index: 0, kind: input, shape index: {}]   ;;  %s9069_s1 = inlined_call_operand.hbm [shape: f32[2,8,32], index: 1, kind: input, shape index: {}]   ;;  %s9070_s2 = inlined_call_operand.vmem [shape: bf16[2,32,96], index: 2, kind: input, shape index: {}]   ;;  %s9071_s3 = inlined_call_operand.hbm [shape: f32[2,1,96], index: 3, kind: input, shape index: {}]   ;;  %s9072_s4 = inlined_call_operand.vmem [shape: bf16[2,32,32], index: 4, kind: input, shape index: {}]   ;;  %s9073_s5 = inlined_call_operand.vmem [shape: bf16[2,32,64], index: 5, kind: input, shape index: {}]   ;;  %s9074_s6 = inlined_call_operand.hbm [shape: f32[2,1,64], index: 6, kind: input, shape index: {}]   ;;  %s9075_s7 = inlined_call_operand.vmem [shape: bf16[2,64,32], index: 7, kind: input, shape index: {}]   ;;  %s9076_s8 = inlined_call_operand.vmem [shape: f32[2,6,32], index: 8, kind: input, shape index: {}]   ;;  %s9077_s9 = inlined_call_operand.hbm [shape: bf16[32,96], index: 9, kind: input, shape index: {}]   ;;  %s9078_s10 = inlined_call_operand.hbm [shape: f32[1,96], index: 10, kind: input, shape index: {}]   ;;  %s9079_s11 = inlined_call_operand.hbm [shape: bf16[32,96], index: 11, kind: input, shape index: {}]   ;;  %s9080_s12 = inlined_call_operand.hbm [shape: f32[1,96], index: 12, kind: input, shape index: {}]   ;;  %s9081_s13 = inlined_call_operand.vmem [shape: bf16[2,32,32], index: 13, kind: input, shape index: {}]   ;;  %s9082_s14 = inlined_call_operand.vmem [shape: f32[9,32], index: 14, kind: input, shape index: {}]   ;;  %s9083_s15 = inlined_call_operand.hbm [shape: f32[2,8,32], index: 15, kind: output, shape index: {}]  }
   0x1   :  { %9100 = sst [smem:[#allocation24_spill]] %s9071_s3 }
   0x2   :  { %9101 = sst [smem:[#allocation25_spill]] %s9072_s4 }
   0x3   :  { %9102 = sst [smem:[#allocation26_spill]] %s9073_s5 }
   0x4   :  { %9103 = sst [smem:[#allocation27_spill]] %s9074_s6 }
   0x5   :  { %9104 = sst [smem:[#allocation28_spill]] %s9075_s7 }
   0x6   :  { %9105 = sst [smem:[#allocation29_spill]] %s9076_s8 }
   0x7   :  { %9106 = sst [smem:[#allocation30_spill]] %s9077_s9 }
   0x8   :  { %9107 = sst [smem:[#allocation31_spill]] %s9078_s10 }
   0x9   :  { %9108 = sst [smem:[#allocation32_spill]] %s9079_s11 }
   0xa   :  { %9109 = sst [smem:[#allocation33_spill]] %s9081_s13 }
   0xb   :  { %9110 = sst [smem:[#allocation34_spill]] %s9082_s14 }
   0xc   :  { %9111 = sst [smem:[#allocation35_spill]] %s9083_s15 }
   0xd   :  { %20 = vsyncpa [#allocation3], 0 }
   0xe   :  { %22 = vsyncpa [#allocation3 + $0x1], 0 }
   0xf   :  { %23 = vsyncpa [#allocation6], 0 }
  0x10   :  { %25 = vsyncpa [#allocation6 + $0x1], 0 }
  0x11   :  { %26 = vsyncpa [#allocation9], 0 }
  0x12   :  { %27 = vsyncpa [#allocation12], 0 }
  0x13   :  { %28 = vsyncpa [#allocation15], 0 }
  0x14   :  { %29 = vsyncpa [#allocation4], 0 }
  0x15   :  { %31 = vsyncpa [#allocation4 + $0x1], 0  ;;  %s7588_s18 = smov 0   ;;  %s7590_s19 = smov 0  }
  0x16   :  { %s7592_s20 = smov 0   ;;  %s7594_s21 = smov 0  }
  0x17 LB: > { %s7482_s22 = smov [#allocation7]   ;;  %s7609_s24 = sadd.s32 4294967295, %s7480_s21   ;;  %s7480_s21 = sphi %s7594_s21, %s9153_s21   ;;  %s7476_s20 = sphi %s7592_s20, %s9152_s20   ;;  %s7472_s19 = sphi %s7590_s19, %s9151_s19   ;;  %s7468_s18 = sphi %s7588_s18, %s9150_s18  }
  0x18   : > { %s408_s23 = sshll.u32 %s7482_s22, 4  ;;  %p6279_p0 = scmp.ge.s32.totalorder %s7480_s21, 1  ;;  %s7614_s23 = int_to_ptr.vmem [resolvable:$true] %s408_s23 }
  0x19   : > { %p9091_p1 = scmp.eq.s32.totalorder %s7609_s24, 0  ;;  %p393_p2 = scmp.lt.s32.totalorder %s7480_s21, 3 }
  0x1a   : > { %s7483_s26 = smov [#allocation8]   ;;  %s7484_s29 = smov [#allocation11]  }
  0x1b   : > { %p7616_p3 = pnand %p6279_p0, %p393_p2  ;;  %s427_s27 = sshll.u32 %s7483_s26, 4  ;;  %s7629_s27 = int_to_ptr.vmem [resolvable:$true] %s427_s27 }
  0x1c   : > { %s460_s30 = sshll.u32 %s7484_s29, 4  ;;  %s9114_s3 = sld [smem:[#allocation24_spill]]  ;;  %s7631_s30 = int_to_ptr.vmem [resolvable:$true] %s460_s30 }
  0x1d   : > { %s9112_s25 = scalar_select %p7616_p3, 1, 0 }
  0x1e   : > { %p6907_p5 = pneg %p7616_p3 }
  0x20   : > { %p7625_p6 = pnand %p6907_p5, %p9091_p1 }
  0x22   : > { %s7166_s22 = scalar_lea.hbm %s9114_s3, 32  ;;  %p7641_p8 = pneg %p7625_p6 }
  0x23   : > { %p7167_p7 = scmp.ne.s32.totalorder %s9114_s3, %s7166_s22  ;;  %p7173_p11 = scmp.lt.u32.totalorder %s7166_s22, %s9114_s3 }
  0x25   : > { %p7169_p9 = pnand %p7641_p8, %p7167_p7 }
  0x27   : > { %p7170_p10 = pneg %p7169_p9 }
  0x29   : > { %p7175_p12 = pnand %p7173_p11, %p7170_p10 }
  0x2b   : > { %7178 = shalt.err (!%p7175_p12)
}
  0x2c   : > { %s7179_s13 = scalar_lea.vmem %s7614_s23, 32  ;;  %p7187_p5 = scmp.lt.s32.totalorder %s7614_s23, %s7614_s23 }
  0x2d   : > { %p7180_p13 = scmp.ne.s32.totalorder %s7614_s23, %s7179_s13  ;;  %p7188_p4 = scmp.lt.s32.totalorder %s7179_s13, %s7179_s13 }
  0x2f   : > { %p7182_p0 = pnand %p7180_p13, %p7641_p8  ;;  %p7189_p7 = por %p7188_p4, %p7187_p5 }
  0x31   : > { %p7183_p2 = pneg %p7182_p0 }
  0x33   : > { %p7190_p9 = pnand %p7189_p7, %p7183_p2 }
  0x35   : > { %7193 = shalt.err (!%p7190_p9)
}
  0x36   : > { %s7485_s15 = smov 16   ;;  %s7486_s14 = smov 1  }
  0x37   : > { %6910 = dma.hbm_to_vmem [thread:$0]  (!%p7625_p6), %s9114_s3, 32, %s7614_s23, [#allocation6], %s7485_s15, %s7485_s15, %s7486_s14  }
  0x38   : > { %s9116_s6 = sld [smem:[#allocation27_spill]] }
  0x3e   : > { %s7194_s7 = scalar_lea.hbm %s9116_s6, 32 }
  0x3f   : > { %p7195_p4 = scmp.ne.s32.totalorder %s9116_s6, %s7194_s7  ;;  %p7201_p12 = scmp.lt.u32.totalorder %s7194_s7, %s9116_s6 }
  0x41   : > { %p7197_p10 = pnand %p7195_p4, %p7641_p8 }
  0x43   : > { %p7198_p11 = pneg %p7197_p10 }
  0x45   : > { %p7203_p13 = pnand %p7201_p12, %p7198_p11 }
  0x47   : > { %7206 = shalt.err (!%p7203_p13)
}
  0x48   : > { %s7207_s23 = scalar_lea.vmem %s7629_s27, 32  ;;  %p7215_p7 = scmp.lt.s32.totalorder %s7629_s27, %s7629_s27 }
  0x49   : > { %p7208_p0 = scmp.ne.s32.totalorder %s7629_s27, %s7207_s23  ;;  %p7216_p9 = scmp.lt.s32.totalorder %s7207_s23, %s7207_s23 }
  0x4b   : > { %p7210_p2 = pnand %p7208_p0, %p7641_p8  ;;  %p7217_p4 = por %p7216_p9, %p7215_p7 }
  0x4d   : > { %p7211_p5 = pneg %p7210_p2 }
  0x4f   : > { %p7218_p10 = pnand %p7217_p4, %p7211_p5 }
  0x51   : > { %7221 = shalt.err (!%p7218_p10)
}
  0x52   : > { %6913 = dma.hbm_to_vmem [thread:$0]  (!%p7625_p6), %s9116_s6, 32, %s7629_s27, [#allocation9], %s7485_s15, %s7485_s15, %s7486_s14  }
  0x53   : > { %s9117_s10 = sld [smem:[#allocation31_spill]] }
  0x59   : > { %s7222_s16 = scalar_lea.hbm %s9117_s10, 16 }
  0x5a   : > { %p7223_p11 = scmp.ne.s32.totalorder %s9117_s10, %s7222_s16  ;;  %p7229_p0 = scmp.lt.u32.totalorder %s7222_s16, %s9117_s10 }
  0x5c   : > { %p7225_p12 = pnand %p7223_p11, %p7641_p8 }
  0x5e   : > { %p7226_p13 = pneg %p7225_p12 }
  0x60   : > { %p7231_p2 = pnand %p7229_p0, %p7226_p13 }
  0x62   : > { %7234 = shalt.err (!%p7231_p2)
}
  0x63   : > { %s7235_s27 = scalar_lea.vmem %s7631_s30, 16  ;;  %s7242_s15 = scalar_lea.vmem %s7631_s30, 32 }
  0x64   : > { %p7236_p5 = scmp.ne.s32.totalorder %s7631_s30, %s7235_s27  ;;  %p7243_p4 = scmp.lt.s32.totalorder %s7631_s30, %s7631_s30 }
  0x65   : > { %p7244_p10 = scmp.lt.s32.totalorder %s7242_s15, %s7235_s27 }
  0x66   : > { %p7238_p7 = pnand %p7236_p5, %p7641_p8 }
  0x67   : > { %p7245_p11 = por %p7244_p10, %p7243_p4 }
  0x68   : > { %p7239_p9 = pneg %p7238_p7 }
  0x6a   : > { %p7246_p12 = pnand %p7245_p11, %p7239_p9 }
  0x6c   : > { %7249 = shalt.err (!%p7246_p12)
}
  0x6d   : > { %6919 = dma.hbm_to_vmem [thread:$0]  (!%p7625_p6), %s9117_s10, 16, %s7631_s30, [#allocation12]  }
  0x6e   : > { %s7487_s4 = smov [#allocation10]   ;;  %s9118_s9 = sld [smem:[#allocation30_spill]] }
  0x6f   : > { %s446_s5 = sshll.u32 %s7487_s4, 4  ;;  %s447_s5 = int_to_ptr.vmem [resolvable:$true] %s446_s5 }
  0x74   : > { %s7250_s16 = scalar_lea.hbm %s9118_s9, 256 }
  0x75   : > { %p7251_p13 = scmp.ne.s32.totalorder %s9118_s9, %s7250_s16  ;;  %p7257_p5 = scmp.lt.u32.totalorder %s7250_s16, %s9118_s9 }
  0x77   : > { %p7253_p0 = pnand %p7251_p13, %p7641_p8 }
  0x79   : > { %p7254_p2 = pneg %p7253_p0 }
  0x7b   : > { %p7259_p7 = pnand %p7257_p5, %p7254_p2 }
  0x7d   : > { %7262 = shalt.err (!%p7259_p7)
}
  0x7e   : > { %s7263_s30 = scalar_lea.vmem %s447_s5, 256  ;;  %p7271_p11 = scmp.lt.s32.totalorder %s447_s5, %s447_s5 }
  0x7f   : > { %p7264_p9 = scmp.ne.s32.totalorder %s447_s5, %s7263_s30  ;;  %p7272_p12 = scmp.lt.s32.totalorder %s7263_s30, %s7263_s30 }
  0x81   : > { %p7266_p4 = pnand %p7264_p9, %p7641_p8  ;;  %p7273_p1 = por %p7272_p12, %p7271_p11 }
  0x83   : > { %p7267_p10 = pneg %p7266_p4 }
  0x85   : > { %p7274_p3 = pnand %p7273_p1, %p7267_p10 }
  0x87   : > { %7277 = shalt.err (!%p7274_p3)
}
  0x88   : > { %s7488_s27 = smov 64   ;;  %s7489_s15 = smov 4  }
  0x89   : > { %6916 = dma.hbm_to_vmem [thread:$0]  (!%p7625_p6), %s9118_s9, 256, %s447_s5, [#allocation9], %s7488_s27, %s7488_s27, %s7489_s15  }
  0x8a   : > { %s7490_s4 = smov [#allocation13]   ;;  %s7491_s8 = smov [#allocation14]  }
  0x8b   : > { %s470_s7 = sshll.u32 %s7490_s4, 4  ;;  %s484_s16 = sshll.u32 %s7491_s8, 4  ;;  %s471_s7 = int_to_ptr.vmem [resolvable:$true] %s470_s7  ;;  %s7727_s16 = int_to_ptr.vmem [resolvable:$true] %s484_s16 }
  0x8c   : > { %s9119_s11 = sld [smem:[#allocation32_spill]] }
  0x92   : > { %s7278_s29 = scalar_lea.hbm %s9119_s11, 256 }
  0x93   : > { %p7279_p1 = scmp.ne.s32.totalorder %s9119_s11, %s7278_s29  ;;  %p7285_p0 = scmp.lt.u32.totalorder %s7278_s29, %s9119_s11 }
  0x95   : > { %p7281_p3 = pnand %p7279_p1, %p7641_p8 }
  0x97   : > { %p7282_p13 = pneg %p7281_p3 }
  0x99   : > { %p7287_p2 = pnand %p7285_p0, %p7282_p13 }
  0x9b   : > { %7290 = shalt.err (!%p7287_p2)
}
  0x9c   : > { %s7291_s23 = scalar_lea.vmem %s471_s7, 256  ;;  %p7299_p4 = scmp.lt.s32.totalorder %s471_s7, %s471_s7 }
  0x9d   : > { %p7292_p5 = scmp.ne.s32.totalorder %s471_s7, %s7291_s23  ;;  %p7300_p10 = scmp.lt.s32.totalorder %s7291_s23, %s7291_s23 }
  0x9f   : > { %p7294_p7 = pnand %p7292_p5, %p7641_p8  ;;  %p7301_p11 = por %p7300_p10, %p7299_p4 }
  0xa1   : > { %p7295_p9 = pneg %p7294_p7 }
  0xa3   : > { %p7302_p12 = pnand %p7301_p11, %p7295_p9 }
  0xa5   : > { %7305 = shalt.err (!%p7302_p12)
}
  0xa6   : > { %6922 = dma.hbm_to_vmem [thread:$0]  (!%p7625_p6), %s9119_s11, 256, %s471_s7, [#allocation12], %s7488_s27, %s7488_s27, %s7489_s15  }
  0xa7   : > { %s7306_s29 = scalar_lea.hbm %s9080_s12, 16 }
  0xa8   : > { %p7307_p1 = scmp.ne.s32.totalorder %s9080_s12, %s7306_s29  ;;  %p7313_p0 = scmp.lt.u32.totalorder %s7306_s29, %s9080_s12 }
  0xaa   : > { %p7309_p3 = pnand %p7307_p1, %p7641_p8 }
  0xac   : > { %p7310_p13 = pneg %p7309_p3 }
  0xae   : > { %p7315_p2 = pnand %p7313_p0, %p7310_p13 }
  0xb0   : > { %7318 = shalt.err (!%p7315_p2)
}
  0xb1   : > { %s7319_s27 = scalar_lea.vmem %s7727_s16, 16  ;;  %s7326_s15 = scalar_lea.vmem %s7727_s16, 32 }
  0xb2   : > { %p7320_p5 = scmp.ne.s32.totalorder %s7727_s16, %s7319_s27  ;;  %p7327_p4 = scmp.lt.s32.totalorder %s7727_s16, %s7727_s16 }
  0xb3   : > { %p7328_p10 = scmp.lt.s32.totalorder %s7326_s15, %s7319_s27 }
  0xb4   : > { %p7322_p7 = pnand %p7320_p5, %p7641_p8 }
  0xb5   : > { %p7329_p11 = por %p7328_p10, %p7327_p4 }
  0xb6   : > { %p7323_p9 = pneg %p7322_p7 }
  0xb8   : > { %p7330_p12 = pnand %p7329_p11, %p7323_p9 }
  0xba   : > { %7333 = shalt.err (!%p7330_p12)
}
  0xbb   : > { %6925 = dma.hbm_to_vmem [thread:$0]  (!%p7625_p6), %s9080_s12, 16, %s7727_s16, [#allocation15]  }
  0xbc   : > { %s6278_s28 = sadd.s32 4294967294, %s7480_s21   ;;  %s7773_s26 = sadd.s32 1, %s7480_s21  }
  0xbd   : > { %s41_s4 = ssub.s32 %s7480_s21, %s7773_s26  ;;  %s44_s8 = sadd.s32 1, %s7476_s20 }
  0xbe   : > { %p42_p8 = scmp.eq.s32.totalorder %s41_s4, 0  ;;  %p51_p1 = scmp.ne.s32.totalorder %s7476_s20, %s7472_s19 }
  0xbf   : > { %p52_p3 = scmp.eq.s32.totalorder %s7480_s21, 0  ;;  %p57_p13 = scmp.ne.s32.totalorder %s7472_s19, %s7468_s18 }
  0xc0   : > { %s7784_s17 = scalar_select %p42_p8, %s7476_s20, %s44_s8  }
  0xc1   : > { %p7786_p0 = por %p52_p3, %p51_p1  ;;  %p9121_p2 = scmp.eq.s32.totalorder %s7609_s24, 0 }
  0xc2   : > { %p380_p5 = scmp.eq.s32.totalorder %s7609_s24, 1  ;;  %p386_p7 = scmp.eq.s32.totalorder %s6278_s28, 1 }
  0xc3   : > { %p7792_p6 = por %p9121_p2, %p57_p13  ;;  %p6943_p9 = scmp.lt.s32.totalorder %s7480_s21, 2 }
  0xc4   : > { %s501_s29 = sand.u32 1, %s7476_s20   ;;  %p7799_p4 = por %p380_p5, %p51_p1 }
  0xc5   : > { %s9122_s16 = scalar_select %p7792_p6, 1, 0 }
  0xc6   : > { %s9123_s13 = scalar_select %p7799_p4, 1, 0 }
  0xc7   : > { %p7803_p10 = por %p386_p7, %p57_p13  ;;  %s7807_s14 = sshll.u32 %s501_s29, 3 }
  0xc8   : > { %s6288_s5 = sshll.u32 %s7480_s21, 7  ;;  %s505_s23 = scalar_lea.vmem [#allocation2], %s7807_s14 }
  0xc9   : > { %s9124_s30 = scalar_select %p7803_p10, 1, 0 }
  0xca   : > { %s7813_s7 = scalar_lea.hbm %s9068_s0, %s6288_s5  ;;  %s512_s28 = sshll.u32 %s505_s23, 4  ;;  %s7816_s28 = int_to_ptr.vmem [resolvable:$true] %s512_s28 }
  0xcb   : > { %p7820_p11 = pnand %p6943_p9, %p7786_p0  ;;  %s7827_s27 = scalar_lea.hbm %s9069_s1, %s6288_s5 }
  0xcc   : > { %s519_s15 = sand.u32 1, %s7480_s21   ;;  %s502_s6 = scalar_lea.sflag [#allocation3], %s501_s29 }
  0xcd   : > { %s7334_s9 = scalar_lea.hbm %s7813_s7, 128  ;;  %p7336_p8 = pneg %p7820_p11 }
  0xce   : > { %p7335_p12 = scmp.ne.s32.totalorder %s7813_s7, %s7334_s9  ;;  %s7339_s10 = scalar_lea.hbm %s9068_s0, 256 }
  0xcf   : > { %p7340_p13 = scmp.lt.u32.totalorder %s7813_s7, %s9068_s0  ;;  %p7341_p0 = scmp.lt.u32.totalorder %s7339_s10, %s7334_s9 }
  0xd0   : > { %p7337_p1 = pnand %p7336_p8, %p7335_p12  ;;  %p7343_p5 = scmp.lt.u32.totalorder %s7334_s9, %s7813_s7 }
  0xd1   : > { %p7342_p2 = por %p7341_p0, %p7340_p13 }
  0xd2   : > { %p7338_p3 = pneg %p7337_p1 }
  0xd3   : > { %p7344_p7 = por %p7343_p5, %p7342_p2 }
  0xd5   : > { %p7345_p9 = pnand %p7344_p7, %p7338_p3 }
  0xd7   : > { %7348 = shalt.err (!%p7345_p9)
}
  0xd8   : > { %s7349_s29 = scalar_lea.vmem %s7816_s28, 128  ;;  %s7492_s5 = smov [#allocation2]  }
  0xd9   : > { %p7350_p12 = scmp.ne.s32.totalorder %s7816_s28, %s7349_s29  ;;  %s7354_s8 = sshll.u32 %s7492_s5, 4  ;;  %s7355_s8 = int_to_ptr.vmem [resolvable:$false] %s7354_s8 }
  0xda   : > { %s7356_s11 = scalar_lea.vmem %s7355_s8, 256  ;;  %p7357_p4 = scmp.lt.s32.totalorder %s7816_s28, %s7355_s8 }
  0xdb   : > { %p7352_p1 = pnand %p7350_p12, %p7336_p8  ;;  %p7358_p13 = scmp.lt.s32.totalorder %s7356_s11, %s7349_s29 }
  0xdd   : > { %p7353_p10 = pneg %p7352_p1  ;;  %p7359_p0 = por %p7358_p13, %p7357_p4 }
  0xdf   : > { %p7360_p2 = pnand %p7359_p0, %p7353_p10 }
  0xe1   : > { %7363 = shalt.err (!%p7360_p2)
}
  0xe2   : > { %6929 = dma.hbm_to_vmem [thread:$0]  (!%p7820_p11), %s7813_s7, 128, %s7816_s28, %s502_s6  }
  0xe3   : > { %s523_s9 = scalar_lea.vmem [#allocation5], %s7807_s14  ;;  %s520_s22 = scalar_lea.sflag [#allocation6], %s519_s15 }
  0xe4   : > { %s530_s10 = sshll.u32 %s523_s9, 4  ;;  %s7364_s23 = scalar_lea.hbm %s7827_s27, 128  ;;  %s531_s10 = int_to_ptr.vmem [resolvable:$true] %s530_s10 }
  0xe5   : > { %p7365_p4 = scmp.ne.s32.totalorder %s7827_s27, %s7364_s23  ;;  %s7369_s5 = scalar_lea.hbm %s9069_s1, 256 }
  0xe6   : > { %p7370_p5 = scmp.lt.u32.totalorder %s7827_s27, %s9069_s1  ;;  %p7371_p7 = scmp.lt.u32.totalorder %s7369_s5, %s7364_s23 }
  0xe7   : > { %p7367_p10 = pnand %p7365_p4, %p7336_p8  ;;  %p7373_p12 = scmp.lt.u32.totalorder %s7364_s23, %s7827_s27 }
  0xe8   : > { %p7372_p9 = por %p7371_p7, %p7370_p5 }
  0xe9   : > { %p7368_p3 = pneg %p7367_p10 }
  0xea   : > { %p7374_p1 = por %p7373_p12, %p7372_p9 }
  0xec   : > { %p7375_p13 = pnand %p7374_p1, %p7368_p3 }
  0xee   : > { %7378 = shalt.err (!%p7375_p13)
}
  0xef   : > { %s7379_s6 = scalar_lea.vmem %s531_s10, 128  ;;  %s7493_s14 = smov [#allocation5]  }
  0xf0   : > { %p7380_p0 = scmp.ne.s32.totalorder %s531_s10, %s7379_s6  ;;  %s7384_s7 = sshll.u32 %s7493_s14, 4  ;;  %s7385_s7 = int_to_ptr.vmem [resolvable:$false] %s7384_s7 }
  0xf1   : > { %s7386_s28 = scalar_lea.vmem %s7385_s7, 256  ;;  %p7387_p10 = scmp.lt.s32.totalorder %s531_s10, %s7385_s7 }
  0xf2   : > { %p7382_p2 = pnand %p7380_p0, %p7336_p8  ;;  %p7388_p6 = scmp.lt.s32.totalorder %s7386_s28, %s7379_s6 }
  0xf4   : > { %p7383_p4 = pneg %p7382_p2  ;;  %p7389_p5 = por %p7388_p6, %p7387_p10 }
  0xf6   : > { %p7390_p7 = pnand %p7389_p5, %p7383_p4 }
  0xf8   : > { %7393 = shalt.err (!%p7390_p7)
}
  0xf9   : > { %6932 = dma.hbm_to_vmem [thread:$0]  (!%p7820_p11), %s7827_s27, 128, %s531_s10, %s520_s22  }
  0xfa   : > { %p9126_p3 = scmp.ne.s32.totalorder %s9112_s25, 0 }
  0xfb   : > { %s7880_s15 = sand.u32 (!%p9126_p3), 1, %s7472_s19   ;;  %p9127_p6 = scmp.ne.s32.totalorder (!%p9126_p3), %s9122_s16, 0 }
  0xfc   : > { %539 = sbr.rel (%p9126_p3) target bundleno = 7908 (0x1ee4), region = 80  ;;  %s7883_s9 = sshll.u32 (!%p9126_p3), %s7880_s15, 3 }
  0xfd   : > { %s542_s23 = scalar_lea.sflag (!%p9126_p3), [#allocation3], %s7880_s15  ;;  %s545_s3 = scalar_lea.vmem (!%p9126_p3), [#allocation2], %s7883_s9 }
 0x103   : > { %7439 = dma.done.wait (%p9127_p6), %s542_s23, 128  }
 0x104   : > { %7441 = vsyncadd (%p9127_p6), %s542_s23, 4294967168  ;;  %s550_s25 = sand.u32 1, %s7609_s24   ;;  %s554_s27 = scalar_lea.vmem [#allocation5], %s7883_s9 }
 0x105   : > { %s551_s4 = scalar_lea.sflag [#allocation6], %s550_s25 }
 0x106   : > { %7443 = dma.done.wait (%p9127_p6), %s551_s4, 128  }
 0x107   : > { %7445 = vsyncadd (%p9127_p6), %s551_s4, 4294967168  ;;  %p9128_p11 = scmp.eq.s32.totalorder %s7609_s24, 0 }
 0x109   : > { %7447 = dma.done.wait (%p9128_p11), [#allocation6], 32   ;;  %p9129_p8 = pmov %p9128_p11 }
 0x10b   : > { %7449 = vsyncadd (%p9129_p8), [#allocation6], 4294967264  ;;  %p9130_p9 = pmov %p9129_p8 }
 0x10c   : > { %p9131_p12 = pmov %p9129_p8 }
 0x10d   : > { %7451 = dma.done.wait (%p9130_p9), [#allocation9], 288  }
 0x10e   : > { %7453 = vsyncadd (%p9131_p12), [#allocation9], 4294967008  ;;  %p9132_p1 = pmov %p9129_p8 }
 0x110   : > { %7455 = dma.done.wait (%p9132_p1), [#allocation12], 272   ;;  %p9133_p13 = pmov %p9132_p1 }
 0x111   : > { %p9134_p0 = pmov %p9132_p1 }
 0x112   : > { %7457 = vsyncadd (%p9133_p13), [#allocation12], 4294967024 }
 0x113   : > { %7459 = dma.done.wait (%p9134_p0), [#allocation15], 16   ;;  %p9135_p2 = pmov %p9134_p0 }
 0x114   : > { %vm634_vm0 = vcmask 261120   ;;  %v631_v0 = vld [vmem:[%s545_s3] sm:$0xff]  ;;  %v632_v1 = vld [vmem:[%s554_s27] sm:$0xff]  ;;  %v7494_v15 = vmov 0.0   ;;  %vm7495_vm1 = vmmov 0   ;;  %v662_v21 = vlaneseq  ;;  %s9136_s11 = sld [smem:[#allocation29_spill]] }
 0x115   : > { %7461 = vsyncadd (%p9135_p2), [#allocation15], 4294967280  ;;  %v635_v2 = vsel %vm634_vm0, %v631_v0, 0.0  ;;  %v638_v3 = vsel %vm634_vm0, %v632_v1, 0.0  ;;  %v7036_v14 = vld [vmem:[%s9070_s2] sm:$0xff]   ;;  %6557 = vmatprep.subr.bf16.mxu0 %v7494_v15  ;;  %6561 = vmatprep.mubr.msk.bf16.mxu0 %vm7495_vm1, %v7494_v15  ;;  %v7037_v16 = vld [vmem:[%s9070_s2 + $0x8] sm:$0xff]  }
 0x116   : > { %636 = vadd.xlane.f32.xlu0 %v635_v2  ;;  %6558 = vmatpush3.bf16.msra.mxu0 %v7036_v14  ;;  %v7931_v24 = vshrl.u32 %v662_v21, 7  ;;  %v6301_v39 = vld [vmem:[#allocation7] ss:$0 sm:$0xff]  ;;  %s7496_s6 = smov 112   ;;  %s7497_s14 = smov 120   ;;  %vm1650_vm2 = vcmask 64512  }
 0x117   : > { %6565 = vmatprep.subr.bf16.mxu1 %v7494_v15  ;;  %6559 = vmatprep.subr.bf16.mxu0 %v7494_v15  ;;  %s7498_s7 = smov 104   ;;  %s7499_s28 = smov 96   ;;  %v7500_v52 = vmov 1983009808   ;;  %v7501_v55 = vmov 1934713408  }
 0x118   : > { %6567 = vmatprep.mubr.msk.bf16.mxu1 %vm7495_vm1, %v7494_v15  ;;  %v7934_v25 = vsub.s32 0, %v7931_v24  ;;  %v7941_v30 = vsub.s32 1, %v7931_v24  ;;  %v765_v53 = vunpack.c.l.s4 %v7500_v52  ;;  %v797_v56 = vunpack.c.l.s4 %v7501_v55  ;;  %s9098_s23 = smov 64   ;;  %s9137_s4 = sld [smem:[#allocation25_spill]] }
 0x119   : > { %vm2126_vm3 = vcmask 1043456   ;;  %s9097_s10 = smov 16   ;;  %s9096_s22 = smov 8   ;;  %vm2790_vm4 = vcmask 130048   ;;  %vm2793_vm5 = vcmask 195584   ;;  %vm3006_vm6 = vcmask 523264  }
 0x11a   : > { %639 = vadd.xlane.f32.xlu0 %v638_v3  ;;  %6560 = vmatpush3.bf16.msra.mxu0 %v7037_v16  ;;  %v633_v26 = vld [vmem:[%s9136_s11] sm:$0x3f]  ;;  %v766_v54 = vunpack.c.0.s8 %v765_v53  ;;  %v798_v62 = vunpack.c.0.s8 %v797_v56  ;;  %s9095_s29 = smov 24   ;;  %s9138_s27 = sld [smem:[#allocation26_spill]] }
 0x11b   : > { %6571 = vmatprep.subr.bf16.mxu0 %v7494_v15  ;;  %v665_v29 = vrot.slane %v633_v26, %v7934_v25  ;;  %v671_v34 = vrot.slane %v633_v26, %v7941_v30  ;;  %s9141_s25 = smov 16   ;;  %s9142_s16 = smov 8  }
 0x11c   : > { %v7996_v59 = vsub.s32 %v766_v54, %v7931_v24  ;;  %v8007_v3 = vsub.s32 %v798_v62, %v7931_v24  ;;  %s9143_s5 = smov 24   ;;  %s9144_s3 = sld [smem:[#allocation34_spill]] }
 0x11d   : > { %p9147_p10 = scmp.ne.s32.totalorder %s9123_s13, 0 }
 0x1a3   : > { %v637_v4 = vpop.xlane.xlu0 %636 }
 0x1a4   : > { %v642_v5 = vmul.f32 0.03125, %v637_v4 }
 0x1a6   : > { %v644_v6 = vsub.f32 %v631_v0, %v642_v5 }
 0x1a7   : > { %v640_v7 = vpop.xlane.xlu0 %639 }
 0x1a8   : > { %v643_v8 = vmul.f32 0.03125, %v640_v7  ;;  %v646_v9 = vmul.f32 %v644_v6, %v644_v6 }
 0x1aa   : > { %v645_v10 = vsub.f32 %v632_v1, %v643_v8  ;;  %v648_v11 = vsel %vm634_vm0, %v646_v9, 0.0 }
 0x1ab   : > { %649 = vadd.xlane.f32.xlu1 %v648_v11 }
 0x1ac   : > { %v647_v12 = vmul.f32 %v645_v10, %v645_v10 }
 0x1ae   : > { %v651_v13 = vsel %vm634_vm0, %v647_v12, 0.0 }
 0x1af   : > { %652 = vadd.xlane.f32.xlu1 %v651_v13 }
 0x238   : > { %v650_v17 = vpop.xlane.xlu1 %649 }
 0x239   : > { %v654_v18 = vmul.f32 0.03125, %v650_v17 }
 0x23b   : > { %v656_v19 = vadd.f32 1e-05, %v654_v18 }
 0x23c   : > { %v653_v20 = vpop.xlane.xlu1 %652 }
 0x23d   : > { %7064 = vrsqrt.f32 %v656_v19  ;;  %v655_v22 = vmul.f32 0.03125, %v653_v20 }
 0x23f   : > { %v657_v23 = vadd.f32 1e-05, %v655_v22 }
 0x241   : > { %7066 = vrsqrt.f32 %v657_v23 }
 0x247   : > { %v7065_v27 = vpop.eup %7064 }
 0x248   : > { %v660_v28 = vmul.f32 %v7065_v27, %v644_v6 }
 0x24a   : > { %v666_v33 = vmul.f32 %v665_v29, %v660_v28 }
 0x24b   : > { %v7067_v31 = vpop.eup %7066 }
 0x24c   : > { %v661_v32 = vmul.f32 %v7067_v31, %v645_v10  ;;  %v672_v36 = vadd.f32 %v671_v34, %v666_v33 }
 0x24e   : > { %v667_v35 = vmul.f32 %v665_v29, %v661_v32 }
 0x250   : > { %v673_v37 = vadd.f32 %v671_v34, %v667_v35 }
 0x252   : > { %v674_v38 = vpack.c.bf16 %v673_v37, %v672_v36 }
 0x254   : > { %6562 = vmatmul.mubr.msk.bf16.vlgmr.msra.gmra.mrb[0].mxu0 %vm634_vm0, %v674_v38 }
 0x255   : > { %6573 = vmatprep.mubr.msk.bf16.mxu0 %vm7495_vm1, %v7494_v15 }
 0x327   : > { %v735_v40 = vpop.f32.mrb[0].mxu0 }
 0x328   : > { %v7947_v41 = vadd.f32 %v6301_v39, %v735_v40  ;;  %v6563_v42 = vpop.f32.mrb[1].mxu0 }
 0x329   : > { %v738_v43 = vpop.f32.mrb[2].mxu0 }
 0x32a   : > { %750 = vrot.lane.b32.xlu1 %v7947_v41, %s7496_s6  ;;  %744 = vrot.lane.b32.xlu0 %v7947_v41, %s7497_s14  ;;  %v6564_v44 = vpop.f32.mrb[3].mxu0  ;;  %v7953_v45 = vadd.f32 %v6301_v39, %v738_v43 }
 0x32e   : > { %756 = vrot.lane.b32.xlu1 %v7947_v41, %s7498_s7  ;;  %752 = vrot.lane.b32.xlu0 %v7953_v45, %s7496_s6 }
 0x332   : > { %1042 = vrot.lane.b32.xlu0 %v7947_v41, %s7499_s28  ;;  %746 = vrot.lane.b32.xlu1 %v7953_v45, %s7497_s14 }
 0x336   : > { %758 = vrot.lane.b32.xlu1 %v7953_v45, %s7498_s7 }
 0x39c   : > { %v7965_v46 = vpop.permute.xlu1 %750  ;;  %v7967_v47 = vpop.permute.xlu0 %744 }
 0x39d   : > { %1050 = vrot.lane.b32.xlu0 %v7965_v46, %s7499_s28  ;;  %1046 = vrot.lane.b32.xlu1 %v7967_v47, %s7499_s28  ;;  %v762_v60 = vcombine.low %v7947_v41, %v7965_v46  ;;  %v763_v61 = vcombine.high %v7947_v41, %v7965_v46 }
 0x39f   : > { %v770_v1 = vrot.slane %v762_v60, %v7996_v59  ;;  %v777_v2 = vrot.slane %v763_v61, %v7996_v59 }
 0x3a0   : > { %v7973_v48 = vpop.permute.xlu1 %756  ;;  %v7979_v49 = vpop.permute.xlu0 %752 }
 0x3a1   : > { %1044 = vrot.lane.b32.xlu0 %v7953_v45, %s7499_s28  ;;  %1054 = vrot.lane.b32.xlu1 %v7973_v48, %s7499_s28  ;;  %v778_v57 = vcombine.low %v7967_v47, %v7973_v48  ;;  %v779_v58 = vcombine.high %v7967_v47, %v7973_v48  ;;  %v830_v16 = vcombine.low %v7953_v45, %v7979_v49 }
 0x3a2   : > { %v831_v17 = vcombine.high %v7953_v45, %v7979_v49 }
 0x3a3   : > { %v786_v63 = vrot.slane %v778_v57, %v7996_v59  ;;  %v793_v0 = vrot.slane %v779_v58, %v7996_v59  ;;  %v838_v33 = vrot.slane %v830_v16, %v7996_v59 }
 0x3a4   : > { %v7981_v50 = vpop.permute.xlu1 %746  ;;  %v1043_v4 = vpop.permute.xlu0 %1042  ;;  %v8023_v34 = vrot.slane %v831_v17, %v7996_v59 }
 0x3a5   : > { %1052 = vrot.lane.b32.xlu0 %v7979_v49, %s7499_s28  ;;  %1048 = vrot.lane.b32.xlu1 %v7981_v50, %s7499_s28  ;;  %v794_v5 = vcombine.low %v770_v1, %v786_v63  ;;  %v795_v6 = vcombine.high %v770_v1, %v786_v63  ;;  %v810_v7 = vcombine.low %v777_v2, %v793_v0 }
 0x3a6   : > { %v811_v8 = vcombine.high %v777_v2, %v793_v0 }
 0x3a7   : > { %v802_v11 = vrot.slane %v794_v5, %v8007_v3  ;;  %v809_v12 = vrot.slane %v795_v6, %v8007_v3  ;;  %v818_v13 = vrot.slane %v810_v7, %v8007_v3 }
 0x3a8   : > { %v7987_v51 = vpop.permute.xlu1 %758  ;;  %v825_v14 = vrot.slane %v811_v8, %v8007_v3 }
 0x3a9   : > { %1056 = vrot.lane.b32.xlu1 %v7987_v51, %s7499_s28  ;;  %v846_v18 = vcombine.low %v7981_v50, %v7987_v51  ;;  %v847_v19 = vcombine.high %v7981_v50, %v7987_v51  ;;  %v898_v26 = vcombine.low %v802_v11, %v809_v12  ;;  %v6305_v27 = vcombine.high %v802_v11, %v809_v12 }
 0x3aa   : > { %v914_v28 = vcombine.low %v818_v13, %v825_v14  ;;  %v6306_v29 = vcombine.high %v818_v13, %v825_v14 }
 0x3ab   : > { %v854_v35 = vrot.slane %v846_v18, %v7996_v59  ;;  %v8027_v36 = vrot.slane %v847_v19, %v7996_v59  ;;  %v8034_v44 = vrot.slane %v898_v26, %v7996_v59  ;;  %v8037_v52 = vrot.slane %v6305_v27, %v7996_v59 }
 0x3ac   : > { %v8040_v53 = vrot.slane %v914_v28, %v7996_v59  ;;  %v8043_v54 = vrot.slane %v6306_v29, %v7996_v59 }
 0x3ad   : > { %v862_v60 = vcombine.low %v838_v33, %v854_v35  ;;  %v863_v61 = vcombine.high %v838_v33, %v854_v35  ;;  %v878_v5 = vcombine.low %v8023_v34, %v8027_v36  ;;  %v879_v6 = vcombine.high %v8023_v34, %v8027_v36 }
 0x3ae   : > { %v930_v8 = vcombine.low %v8034_v44, %v8037_v52 }
 0x3af   : > { %v877_v26 = vrot.slane %v863_v61, %v8007_v3 }
 0x40f   : > { %v1051_v9 = vpop.permute.xlu0 %1050  ;;  %v1047_v10 = vpop.permute.xlu1 %1046 }
 0x410   : > { %v1066_v20 = vcombine.low %v1043_v4, %v1051_v9  ;;  %v1067_v21 = vcombine.high %v1043_v4, %v1051_v9  ;;  %v946_v9 = vcombine.low %v8040_v53, %v8043_v54 }
 0x412   : > { %v1074_v37 = vrot.slane %v1066_v20, %v7996_v59  ;;  %v1081_v38 = vrot.slane %v1067_v21, %v7996_v59 }
 0x413   : > { %v1045_v22 = vpop.permute.xlu0 %1044  ;;  %v1055_v23 = vpop.permute.xlu1 %1054 }
 0x414   : > { %v1082_v31 = vcombine.low %v1047_v10, %v1055_v23  ;;  %v1083_v32 = vcombine.high %v1047_v10, %v1055_v23  ;;  %v870_v23 = vrot.slane %v862_v60, %v8007_v3 }
 0x416   : > { %v1090_v39 = vrot.slane %v1082_v31, %v7996_v59  ;;  %v1097_v40 = vrot.slane %v1083_v32, %v7996_v59 }
 0x417   : > { %v1053_v42 = vpop.permute.xlu0 %1052  ;;  %v1049_v43 = vpop.permute.xlu1 %1048 }
 0x418   : > { %v1098_v55 = vcombine.low %v1074_v37, %v1090_v39  ;;  %v1099_v56 = vcombine.high %v1074_v37, %v1090_v39  ;;  %v1114_v57 = vcombine.low %v1081_v38, %v1097_v40  ;;  %v1115_v58 = vcombine.high %v1081_v38, %v1097_v40 }
 0x419   : > { %v1134_v62 = vcombine.low %v1045_v22, %v1053_v42  ;;  %v1135_v63 = vcombine.high %v1045_v22, %v1053_v42 }
 0x41a   : > { %v1106_v0 = vrot.slane %v1098_v55, %v8007_v3  ;;  %v1113_v1 = vrot.slane %v1099_v56, %v8007_v3  ;;  %v1122_v2 = vrot.slane %v1114_v57, %v8007_v3  ;;  %v1129_v4 = vrot.slane %v1115_v58, %v8007_v3 }
 0x41b   : > { %v1057_v7 = vpop.permute.xlu1 %1056  ;;  %v1142_v14 = vrot.slane %v1134_v62, %v7996_v59  ;;  %v1149_v16 = vrot.slane %v1135_v63, %v7996_v59  ;;  %v886_v63 = vrot.slane %v878_v5, %v8007_v3  ;;  %v931_v5 = vcombine.high %v8034_v44, %v8037_v52 }
 0x41c   : > { %v1150_v10 = vcombine.low %v1049_v43, %v1057_v7  ;;  %v1151_v11 = vcombine.high %v1049_v43, %v1057_v7  ;;  %v1202_v12 = vcombine.low %v1106_v0, %v1113_v1  ;;  %v6309_v13 = vcombine.high %v1106_v0, %v1113_v1 }
 0x41d   : > { %v1218_v17 = vcombine.low %v1122_v2, %v1129_v4  ;;  %v6310_v18 = vcombine.high %v1122_v2, %v1129_v4  ;;  %v893_v0 = vrot.slane %v879_v6, %v8007_v3  ;;  %v947_v6 = vcombine.high %v8040_v53, %v8043_v54 }
 0x41e   : > { %v1158_v19 = vrot.slane %v1150_v10, %v7996_v59  ;;  %v1165_v20 = vrot.slane %v1151_v11, %v7996_v59  ;;  %v1209_v21 = vrot.slane %v1202_v12, %v7996_v59  ;;  %v1217_v22 = vrot.slane %v6309_v13, %v7996_v59 }
 0x41f   : > { %v1225_v27 = vrot.slane %v1218_v17, %v7996_v59  ;;  %v1233_v28 = vrot.slane %v6310_v18, %v7996_v59 }
 0x420   : > { %v1166_v29 = vcombine.low %v1142_v14, %v1158_v19  ;;  %v1167_v31 = vcombine.high %v1142_v14, %v1158_v19  ;;  %v1182_v32 = vcombine.low %v1149_v16, %v1165_v20  ;;  %v1183_v33 = vcombine.high %v1149_v16, %v1165_v20 }
 0x421   : > { %v1234_v34 = vcombine.low %v1209_v21, %v1217_v22  ;;  %v1250_v35 = vcombine.low %v1225_v27, %v1233_v28  ;;  %v1235_v36 = vcombine.high %v1209_v21, %v1217_v22  ;;  %v1251_v37 = vcombine.high %v1225_v27, %v1233_v28 }
 0x422   : > { %v1174_v38 = vrot.slane %v1166_v29, %v8007_v3  ;;  %v1181_v39 = vrot.slane %v1167_v31, %v8007_v3  ;;  %v1190_v40 = vrot.slane %v1182_v32, %v8007_v3  ;;  %v1197_v42 = vrot.slane %v1183_v33, %v8007_v3 }
 0x423   : > { %v1242_v43 = vrot.slane %v1234_v34, %v8007_v3  ;;  %v1258_v55 = vrot.slane %v1250_v35, %v8007_v3  ;;  %v1249_v56 = vrot.slane %v1235_v36, %v8007_v3  ;;  %v1265_v57 = vrot.slane %v1251_v37, %v8007_v3 }
 0x424   : > { %v1270_v58 = vcombine.low %v1174_v38, %v1181_v39  ;;  %v6311_v60 = vcombine.high %v1174_v38, %v1181_v39  ;;  %v1286_v61 = vcombine.low %v1190_v40, %v1197_v42  ;;  %v6312_v62 = vcombine.high %v1190_v40, %v1197_v42 }
 0x425   : > { %v1266_v1 = vcombine.low %v1242_v43, %v1258_v55  ;;  %v1267_v2 = vcombine.high %v1242_v43, %v1258_v55  ;;  %v938_v14 = vrot.slane %v930_v8, %v8007_v3  ;;  %v954_v16 = vrot.slane %v946_v9, %v8007_v3 }
 0x426   : > { %v1277_v4 = vrot.slane %v1270_v58, %v7996_v59  ;;  %v1285_v7 = vrot.slane %v6311_v60, %v7996_v59  ;;  %v1293_v10 = vrot.slane %v1286_v61, %v7996_v59  ;;  %v1301_v11 = vrot.slane %v6312_v62, %v7996_v59 }
 0x427   : > { %v1338_v12 = vpack.c.bf16 %v1266_v1, %v1266_v1  ;;  %v1339_v13 = vpack.c.bf16 %v1267_v2, %v1267_v2  ;;  %v1268_v17 = vcombine.low %v1249_v56, %v1265_v57  ;;  %v1269_v18 = vcombine.high %v1249_v56, %v1265_v57 }
 0x428   : > { %v1302_v21 = vcombine.low %v1277_v4, %v1285_v7  ;;  %v1318_v22 = vcombine.low %v1293_v10, %v1301_v11  ;;  %v966_v27 = vcombine.low %v870_v23, %v877_v26  ;;  %v6307_v28 = vcombine.high %v870_v23, %v877_v26 }
 0x429   : > { %v1655_v19 = vsel %vm1650_vm2, %v1338_v12, 0  ;;  %v1701_v20 = vsel %vm1650_vm2, %v1339_v13, 0  ;;  %v982_v29 = vcombine.low %v886_v63, %v893_v0  ;;  %v6308_v8 = vcombine.high %v886_v63, %v893_v0 }
 0x42a   : > { %6566 = vmatpush3.bf16.xpose.msra.mxu1 %v1655_v19  ;;  %6572 = vmatpush3.bf16.xpose.msra.mxu0 %v1701_v20  ;;  %v962_v9 = vcombine.low %v938_v14, %v954_v16  ;;  %v963_v31 = vcombine.high %v938_v14, %v954_v16  ;;  %v1340_v44 = vpack.c.bf16 %v1268_v17, %v1268_v17 }
 0x42b   : > { %6577 = vmatprep.subr.bf16.mxu1 %v7494_v15  ;;  %6583 = vmatprep.subr.bf16.mxu0 %v7494_v15  ;;  %v1341_v52 = vpack.c.bf16 %v1269_v18, %v1269_v18  ;;  %v1310_v53 = vrot.slane %v1302_v21, %v8007_v3  ;;  %v1326_v54 = vrot.slane %v1318_v22, %v8007_v3 }
 0x42c   : > { %v945_v32 = vrot.slane %v931_v5, %v8007_v3  ;;  %v961_v23 = vrot.slane %v947_v6, %v8007_v3  ;;  %v973_v26 = vrot.slane %v966_v27, %v7996_v59  ;;  %v981_v33 = vrot.slane %v6307_v28, %v7996_v59 }
 0x42d   : > { %v1034_v34 = vpack.c.bf16 %v962_v9, %v962_v9  ;;  %v1035_v35 = vpack.c.bf16 %v963_v31, %v963_v31  ;;  %v989_v36 = vrot.slane %v982_v29, %v7996_v59  ;;  %v997_v37 = vrot.slane %v6308_v8, %v7996_v59 }
 0x42e   : > { %v1303_v38 = vcombine.high %v1277_v4, %v1285_v7  ;;  %v1319_v39 = vcombine.high %v1293_v10, %v1301_v11  ;;  %v1747_v40 = vsel %vm1650_vm2, %v1340_v44, 0  ;;  %v1793_v42 = vsel %vm1650_vm2, %v1341_v52, 0 }
 0x42f   : > { %v1334_v43 = vcombine.low %v1310_v53, %v1326_v54  ;;  %v1335_v55 = vcombine.high %v1310_v53, %v1326_v54  ;;  %v964_v56 = vcombine.low %v945_v32, %v961_v23  ;;  %v965_v57 = vcombine.high %v945_v32, %v961_v23 }
 0x430   : > { %v998_v58 = vcombine.low %v973_v26, %v981_v33  ;;  %v1014_v60 = vcombine.low %v989_v36, %v997_v37  ;;  %v1317_v63 = vrot.slane %v1303_v38, %v8007_v3  ;;  %v1333_v0 = vrot.slane %v1319_v39, %v8007_v3 }
 0x431   : > { %6568 = vmatmul.mubr.msk.bf16.vlgmr.msra.gmra.mrb[0].mxu1 %vm1650_vm2, %v1034_v34  ;;  %6574 = vmatmul.mubr.msk.bf16.vlgmr.msra.gmra.mrb[4].mxu0 %vm1650_vm2, %v1035_v35  ;;  %v1342_v61 = vpack.c.bf16 %v1334_v43, %v1334_v43  ;;  %v1343_v62 = vpack.c.bf16 %v1335_v55, %v1335_v55  ;;  %v1036_v1 = vpack.c.bf16 %v964_v56, %v964_v56 }
 0x432   : > { %6578 = vmatpush3.bf16.xpose.msra.mxu1 %v1747_v40  ;;  %6584 = vmatpush3.bf16.xpose.msra.mxu0 %v1793_v42  ;;  %v1037_v2 = vpack.c.bf16 %v965_v57, %v965_v57  ;;  %v1006_v4 = vrot.slane %v998_v58, %v8007_v3  ;;  %v1022_v7 = vrot.slane %v1014_v60, %v8007_v3 }
 0x433   : > { %6579 = vmatprep.mubr.msk.bf16.mxu1 %vm7495_vm1, %v7494_v15  ;;  %6585 = vmatprep.mubr.msk.bf16.mxu0 %vm7495_vm1, %v7494_v15  ;;  %v1839_v10 = vsel %vm1650_vm2, %v1342_v61, 0  ;;  %v1885_v11 = vsel %vm1650_vm2, %v1343_v62, 0  ;;  %v1336_v12 = vcombine.low %v1317_v63, %v1333_v0  ;;  %v1337_v13 = vcombine.high %v1317_v63, %v1333_v0 }
 0x434   : > { %6589 = vmatprep.subr.bf16.mxu1 %v7494_v15  ;;  %6595 = vmatprep.subr.bf16.mxu0 %v7494_v15  ;;  %v999_v14 = vcombine.high %v973_v26, %v981_v33  ;;  %v1030_v16 = vcombine.low %v1006_v4, %v1022_v7  ;;  %v1031_v5 = vcombine.high %v1006_v4, %v1022_v7 }
 0x435   : > { %v1015_v6 = vcombine.high %v989_v36, %v997_v37  ;;  %v1344_v17 = vpack.c.bf16 %v1336_v12, %v1336_v12  ;;  %v1345_v18 = vpack.c.bf16 %v1337_v13, %v1337_v13 }
 0x436   : > { %v1038_v19 = vpack.c.bf16 %v1030_v16, %v1030_v16  ;;  %v1039_v20 = vpack.c.bf16 %v1031_v5, %v1031_v5  ;;  %v1013_v21 = vrot.slane %v999_v14, %v8007_v3 }
 0x437   : > { %v1029_v22 = vrot.slane %v1015_v6, %v8007_v3  ;;  %v1931_v27 = vsel %vm1650_vm2, %v1344_v17, 0  ;;  %v1977_v28 = vsel %vm1650_vm2, %v1345_v18, 0 }
 0x439   : > { %6580 = vmatmul.mubr.msk.bf16.vlgmr.msra.gmra.mrb[4].mxu1 %vm1650_vm2, %v1036_v1  ;;  %6586 = vmatmul.mubr.msk.bf16.vlgmr.msra.gmra.mrb[8].mxu0 %vm1650_vm2, %v1037_v2  ;;  %v1032_v29 = vcombine.low %v1013_v21, %v1029_v22  ;;  %v1033_v8 = vcombine.high %v1013_v21, %v1029_v22 }
 0x43a   : > { %6590 = vmatpush3.bf16.xpose.msra.mxu1 %v1839_v10  ;;  %6596 = vmatpush3.bf16.xpose.msra.mxu0 %v1885_v11 }
 0x43b   : > { %6591 = vmatprep.mubr.msk.bf16.mxu1 %vm7495_vm1, %v7494_v15  ;;  %6597 = vmatprep.mubr.msk.bf16.mxu0 %vm7495_vm1, %v7494_v15  ;;  %v1040_v9 = vpack.c.bf16 %v1032_v29, %v1032_v29  ;;  %v1041_v31 = vpack.c.bf16 %v1033_v8, %v1033_v8 }
 0x43c   : > { %6601 = vmatprep.subr.bf16.mxu1 %v7494_v15  ;;  %6607 = vmatprep.subr.bf16.mxu0 %v7494_v15 }
 0x441   : > { %6592 = vmatmul.mubr.msk.bf16.vlgmr.msra.gmra.mrb[8].mxu1 %vm1650_vm2, %v1038_v19  ;;  %6598 = vmatmul.mubr.msk.bf16.vlgmr.msra.gmra.mrb[12].mxu0 %vm1650_vm2, %v1039_v20 }
 0x442   : > { %6602 = vmatpush3.bf16.xpose.msra.mxu1 %v1931_v27  ;;  %6608 = vmatpush3.bf16.xpose.msra.mxu0 %v1977_v28 }
 0x443   : > { %6603 = vmatprep.mubr.msk.bf16.mxu1 %vm7495_vm1, %v7494_v15  ;;  %6609 = vmatprep.mubr.msk.bf16.mxu0 %vm7495_vm1, %v7494_v15 }
 0x444   : > { %6613 = vmatprep.subr.bf16.mxu1 %v7494_v15  ;;  %6619 = vmatprep.subr.bf16.mxu0 %v7494_v15 }
 0x449   : > { %6604 = vmatmul.mubr.msk.bf16.vlgmr.msra.gmra.mrb[12].mxu1 %vm1650_vm2, %v1040_v9  ;;  %6610 = vmatmul.mubr.msk.bf16.vlgmr.msra.gmra.mrb[16].mxu0 %vm1650_vm2, %v1041_v31 }
 0x44a   : > { %6615 = vmatprep.mubr.msk.bf16.mxu1 %vm7495_vm1, %v7494_v15  ;;  %6621 = vmatprep.mubr.msk.bf16.mxu0 %vm7495_vm1, %v7494_v15 }
 0x504   : > { %v1691_v44 = vpop.f32.mrb[0].mxu1  ;;  %v1737_v52 = vpop.f32.mrb[4].mxu0 }
 0x505   : > { %v8141_v53 = vmul.f32 0.35355338, %v1691_v44  ;;  %v8143_v54 = vmul.f32 0.35355338, %v1737_v52  ;;  %v6569_v32 = vpop.f32.mrb[1].mxu1  ;;  %v6575_v23 = vpop.f32.mrb[5].mxu0 }
 0x506   : > { %v1694_v26 = vpop.f32.mrb[2].mxu1  ;;  %v1740_v33 = vpop.f32.mrb[6].mxu0 }
 0x507   : > { %v6570_v34 = vpop.f32.mrb[3].mxu1  ;;  %v6576_v35 = vpop.f32.mrb[7].mxu0  ;;  %v2027_v36 = vsel %vm1650_vm2, %v8141_v53, -inf  ;;  %v2030_v37 = vsel %vm1650_vm2, %v8143_v54, -inf }
 0x508   : > { %2028 = vmax.xlane.f32.xlu0 %v2027_v36  ;;  %2031 = vmax.xlane.f32.xlu1 %v2030_v37 }
 0x50c   : > { %v1783_v38 = vpop.f32.mrb[4].mxu1  ;;  %v1829_v39 = vpop.f32.mrb[8].mxu0 }
 0x50d   : > { %v2021_v40 = vmul.f32 0.35355338, %v1783_v38  ;;  %v6581_v42 = vpop.f32.mrb[5].mxu1  ;;  %v6587_v43 = vpop.f32.mrb[9].mxu0  ;;  %v2022_v57 = vmul.f32 0.35355338, %v1829_v39 }
 0x50e   : > { %v1786_v55 = vpop.f32.mrb[6].mxu1  ;;  %v1832_v56 = vpop.f32.mrb[10].mxu0 }
 0x50f   : > { %v6582_v58 = vpop.f32.mrb[7].mxu1  ;;  %v6588_v60 = vpop.f32.mrb[11].mxu0  ;;  %v2033_v61 = vsel %vm1650_vm2, %v2021_v40, -inf  ;;  %v2036_v62 = vsel %vm1650_vm2, %v2022_v57, -inf }
 0x510   : > { %2034 = vmax.xlane.f32.xlu0 %v2033_v61 }
 0x514   : > { %v1875_v63 = vpop.f32.mrb[8].mxu1  ;;  %2037 = vmax.xlane.f32.xlu0 %v2036_v62  ;;  %v1921_v0 = vpop.f32.mrb[12].mxu0 }
 0x515   : > { %v2023_v1 = vmul.f32 0.35355338, %v1875_v63  ;;  %v2024_v2 = vmul.f32 0.35355338, %v1921_v0  ;;  %v6593_v4 = vpop.f32.mrb[9].mxu1  ;;  %v6599_v7 = vpop.f32.mrb[13].mxu0 }
 0x516   : > { %v1878_v10 = vpop.f32.mrb[10].mxu1  ;;  %v1924_v11 = vpop.f32.mrb[14].mxu0 }
 0x517   : > { %v6594_v12 = vpop.f32.mrb[11].mxu1  ;;  %v6600_v13 = vpop.f32.mrb[15].mxu0  ;;  %v2039_v14 = vsel %vm1650_vm2, %v2023_v1, -inf  ;;  %v2042_v16 = vsel %vm1650_vm2, %v2024_v2, -inf }
 0x518   : > { %2040 = vmax.xlane.f32.xlu0 %v2039_v14  ;;  %2043 = vmax.xlane.f32.xlu1 %v2042_v16 }
 0x51c   : > { %v1967_v5 = vpop.f32.mrb[12].mxu1  ;;  %v2013_v6 = vpop.f32.mrb[16].mxu0 }
 0x51d   : > { %v8153_v17 = vmul.f32 0.35355338, %v1967_v5  ;;  %v6605_v18 = vpop.f32.mrb[13].mxu1  ;;  %v6611_v19 = vpop.f32.mrb[17].mxu0  ;;  %v2026_v29 = vmul.f32 0.35355338, %v2013_v6 }
 0x51e   : > { %v1970_v20 = vpop.f32.mrb[14].mxu1  ;;  %v2016_v21 = vpop.f32.mrb[18].mxu0 }
 0x51f   : > { %v6606_v22 = vpop.f32.mrb[15].mxu1  ;;  %v6612_v27 = vpop.f32.mrb[19].mxu0  ;;  %v2045_v28 = vsel %vm1650_vm2, %v8153_v17, -inf  ;;  %v2048_v8 = vsel %vm1650_vm2, %v2026_v29, -inf }
 0x520   : > { %2046 = vmax.xlane.f32.xlu0 %v2045_v28 }
 0x529   : > { %1350 = vrot.lane.b32.xlu1 %v7967_v47, %s9098_s23 }
 0x52d   : > { %1354 = vrot.lane.b32.xlu1 %v7965_v46, %s9098_s23 }
 0x536   : > { %1346 = vrot.lane.b32.xlu0 %v7947_v41, %s9098_s23 }
 0x551   : > { %2049 = vmax.xlane.f32.xlu1 %v2048_v8 }
 0x562   : > { %1358 = vrot.lane.b32.xlu1 %v7973_v48, %s9098_s23 }
 0x595   : > { %v2029_v9 = vpop.xlane.xlu0 %2028  ;;  %v2032_v31 = vpop.xlane.xlu1 %2031 }
 0x596   : > { %v2051_v44 = vsub.f32 %v8141_v53, %v2029_v9  ;;  %v2052_v52 = vsub.f32 %v8143_v54, %v2032_v31 }
 0x598   : > { %v2059_v47 = vmul.f32 1.442695, %v2051_v44  ;;  %v2061_v32 = vmul.f32 1.442695, %v2052_v52 }
 0x59a   : > { %7068 = vpow2.f32 %v2059_v47 }
 0x59b   : > { %7070 = vpow2.f32 %v2061_v32 }
 0x59d   : > { %v2035_v46 = vpop.xlane.xlu0 %2034 }
 0x59e   : > { %v2053_v23 = vsub.f32 %v2021_v40, %v2035_v46 }
 0x5a0   : > { %v2063_v41 = vmul.f32 1.442695, %v2053_v23 }
 0x5a1   : > { %v2038_v26 = vpop.xlane.xlu0 %2037 }
 0x5a2   : > { %7072 = vpow2.f32 %v2063_v41  ;;  %v2054_v33 = vsub.f32 %v2022_v57, %v2038_v26 }
 0x5a4   : > { %v8168_v34 = vpop.eup %7068  ;;  %v2065_v35 = vmul.f32 1.442695, %v2054_v33 }
 0x5a5   : > { %v8170_v48 = vpop.eup %7070  ;;  %v2041_v36 = vpop.xlane.xlu0 %2040  ;;  %v2075_v53 = vsel %vm1650_vm2, %v8168_v34, 0.0 }
 0x5a6   : > { %v2044_v37 = vpop.xlane.xlu1 %2043  ;;  %7074 = vpow2.f32 %v2065_v35  ;;  %v2055_v54 = vsub.f32 %v2023_v1, %v2041_v36  ;;  %2076 = vadd.xlane.f32.xlu0 %v2075_v53  ;;  %v2078_v39 = vsel %vm1650_vm2, %v8170_v48, 0.0 }
 0x5a7   : > { %v2056_v38 = vsub.f32 %v2024_v2, %v2044_v37  ;;  %2079 = vadd.xlane.f32.xlu1 %v2078_v39 }
 0x5a8   : > { %v2067_v40 = vmul.f32 1.442695, %v2055_v54 }
 0x5a9   : > { %v2069_v42 = vmul.f32 1.442695, %v2056_v38 }
 0x5aa   : > { %7076 = vpow2.f32 %v2067_v40  ;;  %v1351_v63 = vpop.permute.xlu1 %1350 }
 0x5ab   : > { %7078 = vpow2.f32 %v2069_v42 }
 0x5ac   : > { %v8176_v43 = vpop.eup %7072 }
 0x5ad   : > { %v2081_v55 = vsel %vm1650_vm2, %v8176_v43, 0.0  ;;  %v2047_v0 = vpop.xlane.xlu0 %2046 }
 0x5ae   : > { %2082 = vadd.xlane.f32.xlu0 %v2081_v55  ;;  %v2057_v1 = vsub.f32 %v8153_v17, %v2047_v0  ;;  %v1355_v2 = vpop.permute.xlu1 %1354 }
 0x5b0   : > { %v8180_v56 = vpop.eup %7074  ;;  %v2071_v4 = vmul.f32 1.442695, %v2057_v1 }
 0x5b1   : > { %v2084_v57 = vsel %vm1650_vm2, %v8180_v56, 0.0  ;;  %v1347_v7 = vpop.permute.xlu0 %1346 }
 0x5b2   : > { %2085 = vadd.xlane.f32.xlu1 %v2084_v57  ;;  %7080 = vpow2.f32 %v2071_v4  ;;  %v1371_v12 = vcombine.high %v1347_v7, %v1355_v2 }
 0x5b4   : > { %v8184_v58 = vpop.eup %7076 }
 0x5b5   : > { %v2087_v60 = vsel %vm1650_vm2, %v8184_v58, 0.0  ;;  %v8188_v61 = vpop.eup %7078 }
 0x5b6   : > { %2088 = vadd.xlane.f32.xlu0 %v2087_v60  ;;  %v2090_v62 = vsel %vm1650_vm2, %v8188_v61, 0.0 }
 0x5ba   : > { %2091 = vadd.xlane.f32.xlu0 %v2090_v62 }
 0x5c3   : > { %1352 = vrot.lane.b32.xlu1 %v7981_v50, %s9098_s23  ;;  %v1370_v50 = vcombine.low %v1347_v7, %v1355_v2 }
 0x5c5   : > { %v1378_v16 = vrot.slane %v1370_v50, %v7996_v59 }
 0x5c7   : > { %1356 = vrot.lane.b32.xlu1 %v7979_v49, %s9098_s23 }
 0x5cb   : > { %1360 = vrot.lane.b32.xlu1 %v7987_v51, %s9098_s23 }
 0x5d0   : > { %1348 = vrot.lane.b32.xlu0 %v7953_v45, %s9098_s23  ;;  %v1385_v45 = vrot.slane %v1371_v12, %v7996_v59 }
 0x5de   : > { %v2050_v10 = vpop.xlane.xlu1 %2049 }
 0x5df   : > { %v2058_v11 = vsub.f32 %v2026_v29, %v2050_v10  ;;  %v8209_v29 = vpop.eup %7080 }
 0x5e0   : > { %v2093_v41 = vsel %vm1650_vm2, %v8209_v29, 0.0 }
 0x5e1   : > { %v2073_v13 = vmul.f32 1.442695, %v2058_v11 }
 0x5e2   : > { %v1359_v49 = vpop.permute.xlu1 %1358 }
 0x5e3   : > { %7082 = vpow2.f32 %v2073_v13  ;;  %v1386_v14 = vcombine.low %v1351_v63, %v1359_v49  ;;  %v1387_v51 = vcombine.high %v1351_v63, %v1359_v49 }
 0x5e5   : > { %v1394_v5 = vrot.slane %v1386_v14, %v7996_v59  ;;  %v1401_v6 = vrot.slane %v1387_v51, %v7996_v59 }
 0x5e7   : > { %v1402_v17 = vcombine.low %v1378_v16, %v1394_v5  ;;  %v1403_v18 = vcombine.high %v1378_v16, %v1394_v5  ;;  %v1418_v19 = vcombine.low %v1385_v45, %v1401_v6  ;;  %v1419_v20 = vcombine.high %v1385_v45, %v1401_v6 }
 0x5e9   : > { %v1410_v21 = vrot.slane %v1402_v17, %v8007_v3  ;;  %v1417_v22 = vrot.slane %v1403_v18, %v8007_v3  ;;  %v1426_v27 = vrot.slane %v1418_v19, %v8007_v3  ;;  %v1433_v28 = vrot.slane %v1419_v20, %v8007_v3 }
 0x5eb   : > { %v1506_v8 = vcombine.low %v1410_v21, %v1417_v22  ;;  %v6313_v9 = vcombine.high %v1410_v21, %v1417_v22  ;;  %v1522_v31 = vcombine.low %v1426_v27, %v1433_v28  ;;  %v6314_v44 = vcombine.high %v1426_v27, %v1433_v28 }
 0x5ed   : > { %v8211_v52 = vpop.eup %7082  ;;  %v1513_v47 = vrot.slane %v1506_v8, %v7996_v59  ;;  %v1521_v32 = vrot.slane %v6313_v9, %v7996_v59  ;;  %v1529_v46 = vrot.slane %v1522_v31, %v7996_v59  ;;  %v1537_v23 = vrot.slane %v6314_v44, %v7996_v59 }
 0x5ee   : > { %v2096_v26 = vsel %vm1650_vm2, %v8211_v52, 0.0 }
 0x5ef   : > { %2094 = vadd.xlane.f32.xlu0 %v2093_v41  ;;  %2097 = vadd.xlane.f32.xlu1 %v2096_v26  ;;  %v1538_v33 = vcombine.low %v1513_v47, %v1521_v32  ;;  %v1554_v35 = vcombine.low %v1529_v46, %v1537_v23  ;;  %v1539_v36 = vcombine.high %v1513_v47, %v1521_v32 }
 0x5f0   : > { %v1555_v37 = vcombine.high %v1529_v46, %v1537_v23 }
 0x5f1   : > { %v1546_v53 = vrot.slane %v1538_v33, %v8007_v3  ;;  %v1562_v54 = vrot.slane %v1554_v35, %v8007_v3  ;;  %v1553_v38 = vrot.slane %v1539_v36, %v8007_v3 }
 0x5f2   : > { %v1569_v39 = vrot.slane %v1555_v37, %v8007_v3 }
 0x5f3   : > { %v1570_v40 = vcombine.low %v1546_v53, %v1562_v54  ;;  %v1571_v42 = vcombine.high %v1546_v53, %v1562_v54 }
 0x5f4   : > { %v1572_v55 = vcombine.low %v1553_v38, %v1569_v39  ;;  %v1573_v57 = vcombine.high %v1553_v38, %v1569_v39 }
 0x5f5   : > { %v1642_v60 = vpack.c.bf16 %v1570_v40, %v1570_v40  ;;  %v1643_v62 = vpack.c.bf16 %v1571_v42, %v1571_v42 }
 0x5f6   : > { %v1644_v12 = vpack.c.bf16 %v1572_v55, %v1572_v55  ;;  %v1645_v49 = vpack.c.bf16 %v1573_v57, %v1573_v57 }
 0x5f7   : > { %v2128_v63 = vsel %vm2126_vm3, %v1642_v60, 0  ;;  %v2174_v0 = vsel %vm2126_vm3, %v1643_v62, 0 }
 0x5f8   : > { %6614 = vmatpush3.bf16.msra.mxu1 %v2128_v63  ;;  %6620 = vmatpush3.bf16.msra.mxu0 %v2174_v0  ;;  %v2220_v45 = vsel %vm2126_vm3, %v1644_v12, 0  ;;  %v2266_v6 = vsel %vm2126_vm3, %v1645_v49, 0 }
 0x5f9   : > { %6625 = vmatprep.subr.bf16.mxu1 %v7494_v15  ;;  %6631 = vmatprep.subr.bf16.mxu0 %v7494_v15 }
 0x633   : > { %v2077_v1 = vpop.xlane.xlu0 %2076 }
 0x634   : > { %7084 = vrcp.f32 %v2077_v1  ;;  %v2080_v2 = vpop.xlane.xlu1 %2079 }
 0x635   : > { %7086 = vrcp.f32 %v2080_v2 }
 0x63b   : > { %v2083_v4 = vpop.xlane.xlu0 %2082 }
 0x63c   : > { %7088 = vrcp.f32 %v2083_v4 }
 0x63e   : > { %v7085_v7 = vpop.eup %7084 }
 0x63f   : > { %v7087_v10 = vpop.eup %7086  ;;  %v2107_v11 = vmul.f32 %v7085_v7, %v8168_v34  ;;  %v2086_v50 = vpop.xlane.xlu1 %2085 }
 0x640   : > { %v2108_v13 = vmul.f32 %v7087_v10, %v8170_v48  ;;  %7090 = vrcp.f32 %v2086_v50 }
 0x641   : > { %v2115_v14 = vpack.c.bf16 %v2107_v11, %v2107_v11 }
 0x642   : > { %v2116_v51 = vpack.c.bf16 %v2108_v13, %v2108_v13 }
 0x643   : > { %v2089_v16 = vpop.xlane.xlu0 %2088  ;;  %6616 = vmatmul.mubr.msk.bf16.vlgmr.msra.gmra.mrb[16].mxu1 %vm1650_vm2, %v2115_v14  ;;  %v1353_v5 = vpop.permute.xlu1 %1352 }
 0x644   : > { %6622 = vmatmul.mubr.msk.bf16.vlgmr.msra.gmra.mrb[20].mxu0 %vm1650_vm2, %v2116_v51  ;;  %6626 = vmatpush3.bf16.msra.mxu1 %v2220_v45  ;;  %7092 = vrcp.f32 %v2089_v16 }
 0x645   : > { %6632 = vmatpush3.bf16.msra.mxu0 %v2266_v6  ;;  %6627 = vmatprep.mubr.msk.bf16.mxu1 %vm7495_vm1, %v7494_v15 }
 0x646   : > { %v7089_v34 = vpop.eup %7088  ;;  %6633 = vmatprep.mubr.msk.bf16.mxu0 %vm7495_vm1, %v7494_v15  ;;  %6637 = vmatprep.subr.bf16.mxu1 %v7494_v15 }
 0x647   : > { %v2109_v48 = vmul.f32 %v7089_v34, %v8176_v43  ;;  %v2092_v17 = vpop.xlane.xlu0 %2091  ;;  %v1357_v18 = vpop.permute.xlu1 %1356  ;;  %6643 = vmatprep.subr.bf16.mxu0 %v7494_v15 }
 0x648   : > { %7094 = vrcp.f32 %v2092_v17 }
 0x649   : > { %v2117_v19 = vpack.c.bf16 %v2109_v48, %v2109_v48 }
 0x64a   : > { %v7091_v20 = vpop.eup %7090 }
 0x64b   : > { %v2110_v21 = vmul.f32 %v7091_v20, %v8180_v56  ;;  %v1349_v22 = vpop.permute.xlu0 %1348  ;;  %6628 = vmatmul.mubr.msk.bf16.vlgmr.msra.gmra.mrb[20].mxu1 %vm1650_vm2, %v2117_v19  ;;  %v1361_v27 = vpop.permute.xlu1 %1360 }
 0x64c   : > { %v1438_v28 = vcombine.low %v1349_v22, %v1357_v18  ;;  %v1439_v8 = vcombine.high %v1349_v22, %v1357_v18  ;;  %v1454_v9 = vcombine.low %v1353_v5, %v1361_v27  ;;  %v1455_v31 = vcombine.high %v1353_v5, %v1361_v27  ;;  %6639 = vmatprep.mubr.msk.bf16.mxu1 %vm7495_vm1, %v7494_v15 }
 0x64d   : > { %v2118_v43 = vpack.c.bf16 %v2110_v21, %v2110_v21 }
 0x64e   : > { %v1446_v44 = vrot.slane %v1438_v28, %v7996_v59  ;;  %v1453_v47 = vrot.slane %v1439_v8, %v7996_v59  ;;  %v1462_v32 = vrot.slane %v1454_v9, %v7996_v59  ;;  %v1469_v56 = vrot.slane %v1455_v31, %v7996_v59  ;;  %v7093_v1 = vpop.eup %7092 }
 0x64f   : > { %6634 = vmatmul.mubr.msk.bf16.vlgmr.msra.gmra.mrb[24].mxu0 %vm1650_vm2, %v2118_v43  ;;  %v2111_v14 = vmul.f32 %v7093_v1, %v8184_v58 }
 0x650   : > { %v1470_v46 = vcombine.low %v1446_v44, %v1462_v32  ;;  %v1471_v23 = vcombine.high %v1446_v44, %v1462_v32  ;;  %v1486_v41 = vcombine.low %v1453_v47, %v1469_v56  ;;  %v1487_v26 = vcombine.high %v1453_v47, %v1469_v56  ;;  %6645 = vmatprep.mubr.msk.bf16.mxu0 %vm7495_vm1, %v7494_v15 }
 0x651   : > { %v2119_v17 = vpack.c.bf16 %v2111_v14, %v2111_v14 }
 0x652   : > { %v1478_v33 = vrot.slane %v1470_v46, %v8007_v3  ;;  %v1485_v35 = vrot.slane %v1471_v23, %v8007_v3  ;;  %v1494_v36 = vrot.slane %v1486_v41, %v8007_v3  ;;  %v1501_v37 = vrot.slane %v1487_v26, %v8007_v3  ;;  %v7095_v11 = vpop.eup %7094 }
 0x653   : > { %v2112_v51 = vmul.f32 %v7095_v11, %v8188_v61 }
 0x654   : > { %v1574_v53 = vcombine.low %v1478_v33, %v1485_v35  ;;  %v6315_v54 = vcombine.high %v1478_v33, %v1485_v35  ;;  %v1590_v38 = vcombine.low %v1494_v36, %v1501_v37  ;;  %v6316_v39 = vcombine.high %v1494_v36, %v1501_v37 }
 0x655   : > { %v2120_v18 = vpack.c.bf16 %v2112_v51, %v2112_v51 }
 0x656   : > { %v1581_v40 = vrot.slane %v1574_v53, %v7996_v59  ;;  %v1589_v42 = vrot.slane %v6315_v54, %v7996_v59  ;;  %v1597_v55 = vrot.slane %v1590_v38, %v7996_v59  ;;  %v1605_v57 = vrot.slane %v6316_v39, %v7996_v59 }
 0x658   : > { %v1606_v60 = vcombine.low %v1581_v40, %v1589_v42  ;;  %v1622_v62 = vcombine.low %v1597_v55, %v1605_v57  ;;  %v1607_v63 = vcombine.high %v1581_v40, %v1589_v42  ;;  %v1623_v0 = vcombine.high %v1597_v55, %v1605_v57 }
 0x65a   : > { %v1614_v2 = vrot.slane %v1606_v60, %v8007_v3  ;;  %v1630_v4 = vrot.slane %v1622_v62, %v8007_v3  ;;  %v1621_v7 = vrot.slane %v1607_v63, %v8007_v3  ;;  %v1637_v10 = vrot.slane %v1623_v0, %v8007_v3 }
 0x65c   : > { %v1638_v50 = vcombine.low %v1614_v2, %v1630_v4  ;;  %v1639_v12 = vcombine.high %v1614_v2, %v1630_v4  ;;  %v1640_v13 = vcombine.low %v1621_v7, %v1637_v10  ;;  %v1641_v49 = vcombine.high %v1621_v7, %v1637_v10 }
 0x65e   : > { %v1646_v16 = vpack.c.bf16 %v1638_v50, %v1638_v50  ;;  %v1647_v45 = vpack.c.bf16 %v1639_v12, %v1639_v12  ;;  %v1648_v34 = vpack.c.bf16 %v1640_v13, %v1640_v13  ;;  %v1649_v48 = vpack.c.bf16 %v1641_v49, %v1641_v49 }
 0x660   : > { %v2312_v5 = vsel %vm2126_vm3, %v1646_v16, 0  ;;  %v2358_v6 = vsel %vm2126_vm3, %v1647_v45, 0  ;;  %v2404_v58 = vsel %vm2126_vm3, %v1648_v34, 0  ;;  %v2450_v61 = vsel %vm2126_vm3, %v1649_v48, 0 }
 0x661   : > { %6638 = vmatpush3.bf16.msra.mxu1 %v2312_v5  ;;  %6644 = vmatpush3.bf16.msra.mxu0 %v2358_v6 }
 0x662   : > { %6649 = vmatprep.subr.bf16.mxu1 %v7494_v15  ;;  %6655 = vmatprep.subr.bf16.mxu0 %v7494_v15 }
 0x664   : > { %6640 = vmatmul.mubr.msk.bf16.vlgmr.msra.gmra.mrb[24].mxu1 %vm1650_vm2, %v2119_v17  ;;  %6646 = vmatmul.mubr.msk.bf16.vlgmr.msra.gmra.mrb[28].mxu0 %vm1650_vm2, %v2120_v18 }
 0x665   : > { %6650 = vmatpush3.bf16.msra.mxu1 %v2404_v58  ;;  %6656 = vmatpush3.bf16.msra.mxu0 %v2450_v61 }
 0x666   : > { %6651 = vmatprep.mubr.msk.bf16.mxu1 %vm7495_vm1, %v7494_v15  ;;  %6657 = vmatprep.mubr.msk.bf16.mxu0 %vm7495_vm1, %v7494_v15 }
 0x667   : > { %6661 = vmatprep.subr.bf16.mxu1 %v7494_v15  ;;  %6669 = vmatprep.subr.bf16.mxu0 %v7494_v15 }
 0x67c   : > { %v2095_v19 = vpop.xlane.xlu0 %2094  ;;  %v2098_v20 = vpop.xlane.xlu1 %2097 }
 0x67d   : > { %7096 = vrcp.f32 %v2095_v19 }
 0x67e   : > { %7098 = vrcp.f32 %v2098_v20 }
 0x687   : > { %v7097_v21 = vpop.eup %7096 }
 0x688   : > { %v7099_v22 = vpop.eup %7098  ;;  %v2113_v27 = vmul.f32 %v7097_v21, %v8209_v29 }
 0x689   : > { %v2114_v28 = vmul.f32 %v7099_v22, %v8211_v52 }
 0x68a   : > { %v2121_v8 = vpack.c.bf16 %v2113_v27, %v2113_v27 }
 0x68b   : > { %v2122_v9 = vpack.c.bf16 %v2114_v28, %v2114_v28 }
 0x68c   : > { %6652 = vmatmul.mubr.msk.bf16.vlgmr.msra.gmra.mrb[28].mxu1 %vm1650_vm2, %v2121_v8 }
 0x68d   : > { %6658 = vmatmul.mubr.msk.bf16.vlgmr.msra.gmra.mrb[32].mxu0 %vm1650_vm2, %v2122_v9  ;;  %6665 = vmatprep.mubr.msk.bf16.mxu1 %vm7495_vm1, %v7494_v15 }
 0x68e   : > { %6673 = vmatprep.mubr.msk.bf16.mxu0 %vm7495_vm1, %v7494_v15 }
 0x716   : > { %v2164_v31 = vpop.f32.mrb[16].mxu1 }
 0x717   : > { %v2210_v43 = vpop.f32.mrb[20].mxu0  ;;  %v6617_v44 = vpop.f32.mrb[17].mxu1 }
 0x718   : > { %v6623_v47 = vpop.f32.mrb[21].mxu0  ;;  %v2167_v32 = vpop.f32.mrb[18].mxu1 }
 0x719   : > { %v2213_v29 = vpop.f32.mrb[22].mxu0  ;;  %v6618_v56 = vpop.f32.mrb[19].mxu1 }
 0x71a   : > { %v6624_v52 = vpop.f32.mrb[23].mxu0 }
 0x71e   : > { %v2256_v46 = vpop.f32.mrb[20].mxu1 }
 0x71f   : > { %v2492_v23 = vcombine.low %v2164_v31, %v2256_v46  ;;  %v2493_v41 = vcombine.high %v2164_v31, %v2256_v46  ;;  %v6629_v26 = vpop.f32.mrb[21].mxu1 }
 0x720   : > { %v2259_v33 = vpop.f32.mrb[22].mxu1 }
 0x721   : > { %v6630_v35 = vpop.f32.mrb[23].mxu1  ;;  %v2500_v39 = vrot.slane %v2492_v23, %v7996_v59  ;;  %v2507_v40 = vrot.slane %v2493_v41, %v7996_v59 }
 0x722   : > { %v2302_v36 = vpop.f32.mrb[24].mxu0 }
 0x723   : > { %v2508_v37 = vcombine.low %v2210_v43, %v2302_v36  ;;  %v2509_v53 = vcombine.high %v2210_v43, %v2302_v36  ;;  %v6635_v54 = vpop.f32.mrb[25].mxu0 }
 0x724   : > { %v2305_v38 = vpop.f32.mrb[26].mxu0 }
 0x725   : > { %v2516_v42 = vrot.slane %v2508_v37, %v7996_v59  ;;  %v2523_v55 = vrot.slane %v2509_v53, %v7996_v59  ;;  %v6636_v57 = vpop.f32.mrb[27].mxu0 }
 0x727   : > { %v2524_v60 = vcombine.low %v2500_v39, %v2516_v42  ;;  %v2525_v62 = vcombine.high %v2500_v39, %v2516_v42  ;;  %v2540_v63 = vcombine.low %v2507_v40, %v2523_v55  ;;  %v2541_v0 = vcombine.high %v2507_v40, %v2523_v55 }
 0x729   : > { %v2532_v1 = vrot.slane %v2524_v60, %v8007_v3  ;;  %v2539_v2 = vrot.slane %v2525_v62, %v8007_v3  ;;  %v2548_v4 = vrot.slane %v2540_v63, %v8007_v3  ;;  %v2555_v7 = vrot.slane %v2541_v0, %v8007_v3 }
 0x72b   : > { %v2628_v10 = vcombine.low %v2532_v1, %v2539_v2  ;;  %v6333_v11 = vcombine.high %v2532_v1, %v2539_v2  ;;  %v2644_v50 = vcombine.low %v2548_v4, %v2555_v7  ;;  %v6334_v12 = vcombine.high %v2548_v4, %v2555_v7  ;;  %v7038_v4 = vld [vmem:[%s9137_s4] sm:$0xff]  }
 0x72c   : > { %6662 = vmatpush3.bf16.msra.mxu1 %v7038_v4  ;;  %v7040_v4 = vld [vmem:[%s9138_s27] sm:$0xff]  }
 0x72d   : > { %v2635_v13 = vrot.slane %v2628_v10, %v7996_v59  ;;  %v2643_v49 = vrot.slane %v6333_v11, %v7996_v59  ;;  %v2651_v14 = vrot.slane %v2644_v50, %v7996_v59  ;;  %v2659_v51 = vrot.slane %v6334_v12, %v7996_v59  ;;  %6663 = vmatprep.subr.bf16.mxu1 %v7494_v15 }
 0x72e   : > { %6670 = vmatpush3.bf16.msra.mxu0 %v7040_v4 }
 0x72f   : > { %v2661_v16 = vcombine.high %v2635_v13, %v2643_v49  ;;  %v2677_v45 = vcombine.high %v2651_v14, %v2659_v51  ;;  %v2660_v5 = vcombine.low %v2635_v13, %v2643_v49  ;;  %v2676_v6 = vcombine.low %v2651_v14, %v2659_v51  ;;  %v7039_v51 = vld [vmem:[%s9137_s4 + $0x8] sm:$0xff]   ;;  %6671 = vmatprep.subr.bf16.mxu0 %v7494_v15 }
 0x730   : > { %6664 = vmatpush3.bf16.msra.mxu1 %v7039_v51 }
 0x731   : > { %v8302_v34 = vrot.slane %v2661_v16, %v8007_v3  ;;  %v8305_v48 = vrot.slane %v2677_v45, %v8007_v3  ;;  %v8308_v17 = vrot.slane %v2660_v5, %v8007_v3  ;;  %v8311_v18 = vrot.slane %v2676_v6, %v8007_v3  ;;  %6677 = vmatprep.subr.bf16.mxu1 %v7494_v15 }
 0x733   : > { %v2694_v58 = vcombine.low %v8302_v34, %v8305_v48  ;;  %v2692_v61 = vcombine.low %v8308_v17, %v8311_v18  ;;  %v2693_v19 = vcombine.high %v8308_v17, %v8311_v18  ;;  %v2695_v20 = vcombine.high %v8302_v34, %v8305_v48  ;;  %v8366_v18 = vld [vmem:[%s9136_s11] sm:$0x3f] }
 0x734   : > { %v8361_v17 = vsub.s32 4, %v7931_v24 }
 0x737   : > { %v2348_v21 = vpop.f32.mrb[24].mxu1  ;;  %v2394_v22 = vpop.f32.mrb[28].mxu0 }
 0x738   : > { %v6641_v27 = vpop.f32.mrb[25].mxu1  ;;  %v6647_v28 = vpop.f32.mrb[29].mxu0 }
 0x739   : > { %v2351_v8 = vpop.f32.mrb[26].mxu1  ;;  %v2397_v9 = vpop.f32.mrb[30].mxu0 }
 0x73a   : > { %v6642_v31 = vpop.f32.mrb[27].mxu1  ;;  %v6648_v43 = vpop.f32.mrb[31].mxu0 }
 0x75f   : > { %v2440_v44 = vpop.f32.mrb[28].mxu1 }
 0x760   : > { %v2560_v47 = vcombine.low %v2348_v21, %v2440_v44  ;;  %v2561_v32 = vcombine.high %v2348_v21, %v2440_v44  ;;  %v2486_v29 = vpop.f32.mrb[32].mxu0  ;;  %v6653_v56 = vpop.f32.mrb[29].mxu1 }
 0x761   : > { %v2576_v52 = vcombine.low %v2394_v22, %v2486_v29  ;;  %v2577_v46 = vcombine.high %v2394_v22, %v2486_v29  ;;  %v6659_v23 = vpop.f32.mrb[33].mxu0  ;;  %v2443_v41 = vpop.f32.mrb[30].mxu1 }
 0x762   : > { %v2568_v26 = vrot.slane %v2560_v47, %v7996_v59  ;;  %v2575_v33 = vrot.slane %v2561_v32, %v7996_v59  ;;  %v2489_v35 = vpop.f32.mrb[34].mxu0  ;;  %v6654_v36 = vpop.f32.mrb[31].mxu1 }
 0x763   : > { %v2584_v37 = vrot.slane %v2576_v52, %v7996_v59  ;;  %v2591_v53 = vrot.slane %v2577_v46, %v7996_v59  ;;  %v6660_v54 = vpop.f32.mrb[35].mxu0 }
 0x765   : > { %v2592_v38 = vcombine.low %v2568_v26, %v2584_v37  ;;  %v2593_v39 = vcombine.high %v2568_v26, %v2584_v37  ;;  %v2608_v40 = vcombine.low %v2575_v33, %v2591_v53  ;;  %v2609_v42 = vcombine.high %v2575_v33, %v2591_v53 }
 0x767   : > { %v2600_v55 = vrot.slane %v2592_v38, %v8007_v3  ;;  %v2607_v57 = vrot.slane %v2593_v39, %v8007_v3  ;;  %v2616_v60 = vrot.slane %v2608_v40, %v8007_v3  ;;  %v2623_v62 = vrot.slane %v2609_v42, %v8007_v3 }
 0x769   : > { %v2696_v63 = vcombine.low %v2600_v55, %v2607_v57  ;;  %v6335_v0 = vcombine.high %v2600_v55, %v2607_v57  ;;  %v2712_v1 = vcombine.low %v2616_v60, %v2623_v62  ;;  %v6336_v2 = vcombine.high %v2616_v60, %v2623_v62 }
 0x76b   : > { %v2703_v7 = vrot.slane %v2696_v63, %v7996_v59  ;;  %v2711_v10 = vrot.slane %v6335_v0, %v7996_v59  ;;  %v2719_v11 = vrot.slane %v2712_v1, %v7996_v59  ;;  %v2727_v50 = vrot.slane %v6336_v2, %v7996_v59 }
 0x76d   : > { %v2729_v12 = vcombine.high %v2703_v7, %v2711_v10  ;;  %v2745_v13 = vcombine.high %v2719_v11, %v2727_v50  ;;  %v2728_v49 = vcombine.low %v2703_v7, %v2711_v10  ;;  %v2744_v14 = vcombine.low %v2719_v11, %v2727_v50  ;;  %v7041_v7 = vld [vmem:[%s9138_s27 + $0x8] sm:$0xff]  }
 0x76e   : > { %6672 = vmatpush3.bf16.msra.mxu0 %v7041_v7 }
 0x76f   : > { %v2743_v16 = vrot.slane %v2729_v12, %v8007_v3  ;;  %v2759_v45 = vrot.slane %v2745_v13, %v8007_v3  ;;  %v2736_v5 = vrot.slane %v2728_v49, %v8007_v3  ;;  %v2752_v6 = vrot.slane %v2744_v14, %v8007_v3  ;;  %6689 = vmatprep.subr.bf16.mxu0 %v7494_v15 }
 0x771   : > { %v2762_v34 = vcombine.low %v2743_v16, %v2759_v45  ;;  %v2761_v48 = vcombine.high %v2736_v5, %v2752_v6  ;;  %v2760_v21 = vcombine.low %v2736_v5, %v2752_v6  ;;  %v2763_v22 = vcombine.high %v2743_v16, %v2759_v45 }
 0x772   : > { %v8391_v16 = vsub.s32 2, %v7931_v24 }
 0x773   : > { %v7011_v27 = vpack.i.bf16 %v2762_v34, %v2694_v58  ;;  %v7006_v28 = vpack.i.bf16 %v2761_v48, %v2693_v19  ;;  %v7016_v8 = vpack.i.bf16 %v2763_v22, %v2695_v20  ;;  %v8396_v34 = vsub.s32 3, %v7931_v24 }
 0x774   : > { %v2890_v5 = vrot.slane %v8366_v18, %v8391_v16 }
 0x775   : > { %7012 = vrot.lane.b32.xlu1 %v7011_v27, %s9097_s10  ;;  %7007 = vrot.lane.b32.xlu0 %v7006_v28, %s9096_s22  ;;  %s9139_s22 = sld [smem:[#allocation28_spill]]  ;;  %v2896_v27 = vrot.slane %v8366_v18, %v8396_v34  ;;  %s9146_s10 = sld [smem:[#allocation35_spill]] }
 0x779   : > { %7017 = vrot.lane.b32.xlu0 %v7016_v8, %s9095_s29 }
 0x77b   : > { %v7042_v10 = vld [vmem:[%s9139_s22] sm:$0xff]   ;;  %v7043_v11 = vld [vmem:[%s9139_s22 + $0x8] sm:$0xff]  }
 0x7e7   : > { %v7013_v9 = vpop.permute.xlu1 %7012  ;;  %v7008_v31 = vpop.permute.xlu0 %7007 }
 0x7e8   : > { %v7010_v43 = vunpack.i.h.bf16 %v7008_v31  ;;  %v7009_v44 = vunpack.i.l.bf16 %v7008_v31  ;;  %v7015_v47 = vunpack.i.h.bf16 %v7013_v9  ;;  %v7014_v32 = vunpack.i.l.bf16 %v7013_v9 }
 0x7ea   : > { %v2788_v58 = vsel %vm1650_vm2, %v2692_v61, %v7009_v44  ;;  %v2789_v19 = vsel %vm1650_vm2, %v2760_v21, %v7010_v43  ;;  %v2804_v61 = vrot.slane %v8366_v18, %v8361_v17  ;;  %v7044_v43 = vld [vmem:[%s9139_s22 + $0x10] sm:$0xff]   ;;  %v7045_v44 = vld [vmem:[%s9139_s22 + $0x18] sm:$0xff]  }
 0x7eb   : > { %v7018_v20 = vpop.permute.xlu0 %7017  ;;  %v2791_v52 = vsel %vm2790_vm4, %v2788_v58, %v7014_v32  ;;  %v2792_v46 = vsel %vm2790_vm4, %v2789_v19, %v7015_v47  ;;  %v6340_v47 = vld [vmem:[#allocation8] ss:$0 sm:$0xff] }
 0x7ec   : > { %v7020_v29 = vunpack.i.h.bf16 %v7018_v20  ;;  %v7019_v56 = vunpack.i.l.bf16 %v7018_v20 }
 0x7ee   : > { %v2794_v23 = vsel %vm2793_vm5, %v2791_v52, %v7019_v56  ;;  %v2795_v41 = vsel %vm2793_vm5, %v2792_v46, %v7020_v29 }
 0x7ef   : > { %v2796_v26 = vpack.c.bf16 %v2795_v41, %v2794_v23  ;;  %v8415_v41 = vsub.s32 5, %v7931_v24 }
 0x7f1   : > { %6666 = vmatmul.mubr.msk.bf16.vlgmr.msra.gmra.mrb[32].mxu1 %vm634_vm0, %v2796_v26  ;;  %v2981_v26 = vrot.slane %v8366_v18, %v8415_v41 }
 0x7f2   : > { %6685 = vmatprep.mubr.msk.bf16.mxu1 %vm7495_vm1, %v7494_v15  ;;  %6678 = vmatpush3.bf16.msra.mxu1 %v7042_v10 }
 0x7f3   : > { %6679 = vmatprep.subr.bf16.mxu1 %v7494_v15 }
 0x7f6   : > { %6680 = vmatpush3.bf16.msra.mxu1 %v7043_v11 }
 0x7f7   : > { %6681 = vmatprep.subr.bf16.mxu1 %v7494_v15 }
 0x7fa   : > { %6682 = vmatpush3.bf16.msra.mxu1 %v7044_v43 }
 0x7fb   : > { %6683 = vmatprep.subr.bf16.mxu1 %v7494_v15 }
 0x7fe   : > { %6684 = vmatpush3.bf16.msra.mxu1 %v7045_v44 }
 0x7ff   : > { %6703 = vmatprep.subr.bf16.mxu1 %v7494_v15 }
 0x8c4   : > { %v2854_v33 = vpop.f32.mrb[32].mxu1 }
 0x8c5   : > { %v2855_v35 = vadd.f32 %v2854_v33, %v2804_v61  ;;  %v6667_v36 = vpop.f32.mrb[33].mxu1 }
 0x8c6   : > { %v2857_v37 = vpop.f32.mrb[34].mxu1 }
 0x8c7   : > { %v2858_v53 = vadd.f32 %v2857_v37, %v2804_v61  ;;  %v6668_v54 = vpop.f32.mrb[35].mxu1  ;;  %v2861_v38 = vsel %vm634_vm0, %v2855_v35, 0.0 }
 0x8c8   : > { %2862 = vadd.xlane.f32.xlu1 %v2861_v38 }
 0x8c9   : > { %v2864_v39 = vsel %vm634_vm0, %v2858_v53, 0.0 }
 0x8ca   : > { %2865 = vadd.xlane.f32.xlu0 %v2864_v39 }
 0x955   : > { %v2863_v40 = vpop.xlane.xlu1 %2862 }
 0x956   : > { %v2867_v42 = vmul.f32 0.03125, %v2863_v40 }
 0x957   : > { %v2866_v55 = vpop.xlane.xlu0 %2865 }
 0x958   : > { %v2869_v57 = vsub.f32 %v2855_v35, %v2867_v42  ;;  %v2868_v60 = vmul.f32 0.03125, %v2866_v55 }
 0x95a   : > { %v2870_v62 = vsub.f32 %v2858_v53, %v2868_v60  ;;  %v2871_v63 = vmul.f32 %v2869_v57, %v2869_v57 }
 0x95c   : > { %v2873_v0 = vsel %vm634_vm0, %v2871_v63, 0.0  ;;  %v2872_v1 = vmul.f32 %v2870_v62, %v2870_v62 }
 0x95d   : > { %2874 = vadd.xlane.f32.xlu0 %v2873_v0 }
 0x95e   : > { %v2876_v2 = vsel %vm634_vm0, %v2872_v1, 0.0  ;;  %v7046_v1 = vld [vmem:[%s9070_s2 + $0x10] sm:$0xff]  }
 0x961   : > { %2877 = vadd.xlane.f32.xlu0 %v2876_v2  ;;  %v7047_v2 = vld [vmem:[%s9070_s2 + $0x18] sm:$0xff]  }
 0x9ea   : > { %v2875_v50 = vpop.xlane.xlu0 %2874 }
 0x9eb   : > { %v2879_v12 = vmul.f32 0.03125, %v2875_v50 }
 0x9ed   : > { %v2881_v13 = vadd.f32 1e-05, %v2879_v12 }
 0x9ee   : > { %v2878_v49 = vpop.xlane.xlu0 %2877 }
 0x9ef   : > { %7100 = vrsqrt.f32 %v2881_v13  ;;  %v2880_v14 = vmul.f32 0.03125, %v2878_v49  ;;  %v6349_v13 = vld [vmem:[%s9136_s11 + $0x8] sm:$0x3f] }
 0x9f0   : > { %v3082_v49 = vrot.slane %v6349_v13, %v7934_v25 }
 0x9f1   : > { %v2882_v51 = vadd.f32 1e-05, %v2880_v14 }
 0x9f3   : > { %7102 = vrsqrt.f32 %v2882_v51 }
 0x9f9   : > { %v7101_v45 = vpop.eup %7100 }
 0x9fa   : > { %v2885_v6 = vmul.f32 %v7101_v45, %v2869_v57 }
 0x9fc   : > { %v2891_v21 = vmul.f32 %v2890_v5, %v2885_v6 }
 0x9fd   : > { %v7103_v48 = vpop.eup %7102 }
 0x9fe   : > { %v2886_v22 = vmul.f32 %v7103_v48, %v2870_v62  ;;  %v2897_v8 = vadd.f32 %v2896_v27, %v2891_v21  ;;  %v3088_v48 = vrot.slane %v6349_v13, %v7941_v30 }
 0xa00   : > { %v2892_v28 = vmul.f32 %v2890_v5, %v2886_v22 }
 0xa02   : > { %v2898_v9 = vadd.f32 %v2896_v27, %v2892_v28 }
 0xa04   : > { %v2899_v31 = vpack.c.bf16 %v2898_v9, %v2897_v8  ;;  %v6354_v8 = vld [vmem:[#allocation7 + $0x1] ss:$0 sm:$0xff] }
 0xa06   : > { %6674 = vmatmul.mubr.msk.bf16.vlgmr.msra.gmra.mrb[36].mxu0 %vm634_vm0, %v2899_v31 }
 0xa07   : > { %6693 = vmatprep.mubr.msk.bf16.mxu0 %vm7495_vm1, %v7494_v15  ;;  %6690 = vmatpush3.bf16.msra.mxu0 %v7046_v1 }
 0xa08   : > { %6691 = vmatprep.subr.bf16.mxu0 %v7494_v15 }
 0xa0b   : > { %6692 = vmatpush3.bf16.msra.mxu0 %v7047_v2 }
 0xa0c   : > { %6697 = vmatprep.subr.bf16.mxu0 %v7494_v15 }
 0xad9   : > { %v2960_v32 = vpop.f32.mrb[36].mxu0 }
 0xada   : > { %v2961_v58 = vadd.f32 %v6340_v47, %v2960_v32  ;;  %v6675_v19 = vpop.f32.mrb[37].mxu0 }
 0xadb   : > { %v2963_v20 = vpop.f32.mrb[38].mxu0 }
 0xadc   : > { %v2964_v29 = vadd.f32 %v6340_v47, %v2963_v20  ;;  %v6676_v56 = vpop.f32.mrb[39].mxu0  ;;  %v2967_v52 = vmax.f32 %v2961_v58, 0.0 }
 0xade   : > { %v2968_v46 = vmax.f32 %v2964_v29, 0.0 }
 0xae0   : > { %v2969_v23 = vpack.c.bf16 %v2968_v46, %v2967_v52 }
 0xae2   : > { %6686 = vmatmul.mubr.msk.bf16.vlgmr.msra.gmra.mrb[36].mxu1 %vm3006_vm6, %v2969_v23 }
 0xae3   : > { %6705 = vmatprep.mubr.msk.bf16.mxu1 %vm7495_vm1, %v7494_v15 }
 0xbb5   : > { %v3044_v61 = vpop.f32.mrb[36].mxu1 }
 0xbb6   : > { %v3045_v33 = vadd.f32 %v3044_v61, %v2981_v26  ;;  %v6687_v35 = vpop.f32.mrb[37].mxu1 }
 0xbb7   : > { %v3047_v36 = vpop.f32.mrb[38].mxu1 }
 0xbb8   : > { %v3048_v37 = vadd.f32 %v3047_v36, %v2981_v26  ;;  %v6688_v53 = vpop.f32.mrb[39].mxu1  ;;  %v3053_v54 = vsel %vm634_vm0, %v3045_v33, 0.0 }
 0xbb9   : > { %3054 = vadd.xlane.f32.xlu1 %v3053_v54 }
 0xbba   : > { %v3056_v38 = vsel %vm634_vm0, %v3048_v37, 0.0 }
 0xbbb   : > { %3057 = vadd.xlane.f32.xlu0 %v3056_v38 }
 0xc46   : > { %v3055_v39 = vpop.xlane.xlu1 %3054 }
 0xc47   : > { %v3059_v40 = vmul.f32 0.03125, %v3055_v39 }
 0xc48   : > { %v3058_v42 = vpop.xlane.xlu0 %3057 }
 0xc49   : > { %v3061_v55 = vsub.f32 %v3045_v33, %v3059_v40  ;;  %v3060_v57 = vmul.f32 0.03125, %v3058_v42 }
 0xc4b   : > { %v3062_v60 = vsub.f32 %v3048_v37, %v3060_v57  ;;  %v3063_v62 = vmul.f32 %v3061_v55, %v3061_v55 }
 0xc4d   : > { %v3065_v18 = vsel %vm634_vm0, %v3063_v62, 0.0  ;;  %v3064_v63 = vmul.f32 %v3062_v60, %v3062_v60 }
 0xc4e   : > { %3066 = vadd.xlane.f32.xlu1 %v3065_v18 }
 0xc4f   : > { %v3068_v0 = vsel %vm634_vm0, %v3064_v63, 0.0 }
 0xc50   : > { %3069 = vadd.xlane.f32.xlu0 %v3068_v0 }
 0xcdb   : > { %v3067_v4 = vpop.xlane.xlu1 %3066 }
 0xcdc   : > { %v3071_v7 = vmul.f32 0.03125, %v3067_v4 }
 0xcdd   : > { %v3070_v10 = vpop.xlane.xlu0 %3069 }
 0xcde   : > { %v3073_v11 = vadd.f32 1e-05, %v3071_v7  ;;  %v3072_v50 = vmul.f32 0.03125, %v3070_v10 }
 0xce0   : > { %7104 = vrsqrt.f32 %v3073_v11  ;;  %v3074_v12 = vadd.f32 1e-05, %v3072_v50 }
 0xce2   : > { %7106 = vrsqrt.f32 %v3074_v12 }
 0xcea   : > { %v7105_v14 = vpop.eup %7104 }
 0xceb   : > { %v3077_v51 = vmul.f32 %v7105_v14, %v3061_v55 }
 0xcec   : > { %v7107_v45 = vpop.eup %7106 }
 0xced   : > { %v3083_v5 = vmul.f32 %v3082_v49, %v3077_v51  ;;  %v3078_v6 = vmul.f32 %v7107_v45, %v3062_v60 }
 0xcef   : > { %v3084_v21 = vmul.f32 %v3082_v49, %v3078_v6  ;;  %v3089_v22 = vadd.f32 %v3088_v48, %v3083_v5 }
 0xcf1   : > { %v3090_v27 = vadd.f32 %v3088_v48, %v3084_v21 }
 0xcf3   : > { %v3091_v28 = vpack.c.bf16 %v3090_v27, %v3089_v22 }
 0xcf5   : > { %6694 = vmatmul.mubr.msk.bf16.vlgmr.msra.gmra.mrb[40].mxu0 %vm634_vm0, %v3091_v28 }
 0xcf6   : > { %6699 = vmatprep.mubr.msk.bf16.mxu0 %vm7495_vm1, %v7494_v15 }
 0xdc8   : > { %v3154_v9 = vpop.f32.mrb[40].mxu0 }
 0xdc9   : > { %v3155_v31 = vadd.f32 %v6354_v8, %v3154_v9  ;;  %v6695_v43 = vpop.f32.mrb[41].mxu0 }
 0xdca   : > { %v3157_v44 = vpop.f32.mrb[42].mxu0 }
 0xdcb   : > { %3169 = vrot.lane.b32.xlu0 %v3155_v31, %s7496_s6  ;;  %3163 = vrot.lane.b32.xlu1 %v3155_v31, %s7497_s14  ;;  %v6696_v47 = vpop.f32.mrb[43].mxu0  ;;  %v8441_v32 = vadd.f32 %v6354_v8, %v3157_v44 }
 0xdcf   : > { %3175 = vrot.lane.b32.xlu1 %v3155_v31, %s7498_s7  ;;  %3177 = vrot.lane.b32.xlu0 %v8441_v32, %s7498_s7  ;;  %s7507_s7 = smov [#allocation16]  }
 0xdd0   : > { %s7398_s29 = sshll.u32 %s7507_s7, 4  ;;  %s7399_s29 = int_to_ptr.vmem [resolvable:$false] %s7398_s29 }
 0xdd3   : > { %3165 = vrot.lane.b32.xlu1 %v8441_v32, %s7497_s14 }
 0xdd7   : > { %3171 = vrot.lane.b32.xlu1 %v8441_v32, %s7496_s6  ;;  %s9140_s6 = smov 64  }
 0xddb   : > { %3461 = vrot.lane.b32.xlu1 %v3155_v31, %s7499_s28 }
 0xe3d   : > { %v8451_v58 = vpop.permute.xlu0 %3169  ;;  %v8453_v19 = vpop.permute.xlu1 %3163 }
 0xe3e   : > { %3465 = vrot.lane.b32.xlu0 %v8453_v19, %s7499_s28  ;;  %3469 = vrot.lane.b32.xlu1 %v8451_v58, %s7499_s28  ;;  %v3181_v26 = vcombine.low %v3155_v31, %v8451_v58  ;;  %v3182_v61 = vcombine.high %v3155_v31, %v8451_v58 }
 0xe40   : > { %v3189_v36 = vrot.slane %v3181_v26, %v7996_v59  ;;  %v3196_v37 = vrot.slane %v3182_v61, %v7996_v59 }
 0xe41   : > { %v8459_v20 = vpop.permute.xlu1 %3175  ;;  %v8469_v56 = vpop.permute.xlu0 %3177 }
 0xe42   : > { %3473 = vrot.lane.b32.xlu0 %v8459_v20, %s7499_s28  ;;  %3463 = vrot.lane.b32.xlu1 %v8441_v32, %s7499_s28  ;;  %v3197_v46 = vcombine.low %v8453_v19, %v8459_v20  ;;  %v3198_v23 = vcombine.high %v8453_v19, %v8459_v20 }
 0xe44   : > { %v3205_v33 = vrot.slane %v3197_v46, %v7996_v59  ;;  %v3212_v35 = vrot.slane %v3198_v23, %v7996_v59 }
 0xe45   : > { %v8465_v29 = vpop.permute.xlu1 %3165 }
 0xe46   : > { %3467 = vrot.lane.b32.xlu0 %v8465_v29, %s7499_s28  ;;  %v3213_v53 = vcombine.low %v3189_v36, %v3205_v33  ;;  %v3214_v54 = vcombine.high %v3189_v36, %v3205_v33  ;;  %v3229_v38 = vcombine.low %v3196_v37, %v3212_v35  ;;  %v3230_v39 = vcombine.high %v3196_v37, %v3212_v35 }
 0xe47   : > { %v3265_v7 = vcombine.low %v8465_v29, %v8469_v56  ;;  %v3266_v10 = vcombine.high %v8465_v29, %v8469_v56 }
 0xe48   : > { %v3221_v40 = vrot.slane %v3213_v53, %v8007_v3  ;;  %v3228_v42 = vrot.slane %v3214_v54, %v8007_v3  ;;  %v3237_v55 = vrot.slane %v3229_v38, %v8007_v3  ;;  %v3244_v57 = vrot.slane %v3230_v39, %v8007_v3 }
 0xe49   : > { %v8471_v52 = vpop.permute.xlu1 %3171  ;;  %v3273_v21 = vrot.slane %v3265_v7, %v7996_v59  ;;  %v8515_v22 = vrot.slane %v3266_v10, %v7996_v59 }
 0xe4a   : > { %3475 = vrot.lane.b32.xlu0 %v8469_v56, %s7499_s28  ;;  %3471 = vrot.lane.b32.xlu1 %v8471_v52, %s7499_s28  ;;  %v3317_v62 = vcombine.low %v3221_v40, %v3228_v42  ;;  %v6358_v18 = vcombine.high %v3221_v40, %v3228_v42  ;;  %v3333_v63 = vcombine.low %v3237_v55, %v3244_v57 }
 0xe4b   : > { %v6359_v0 = vcombine.high %v3237_v55, %v3244_v57  ;;  %v3249_v1 = vcombine.low %v8441_v32, %v8471_v52  ;;  %v3250_v11 = vcombine.high %v8441_v32, %v8471_v52 }
 0xe4c   : > { %v8501_v50 = vrot.slane %v3317_v62, %v7996_v59  ;;  %v8504_v49 = vrot.slane %v6358_v18, %v7996_v59  ;;  %v8507_v14 = vrot.slane %v3333_v63, %v7996_v59 }
 0xe4d   : > { %v3462_v60 = vpop.permute.xlu1 %3461  ;;  %v8510_v51 = vrot.slane %v6359_v0, %v7996_v59  ;;  %v3257_v45 = vrot.slane %v3249_v1, %v7996_v59  ;;  %v8518_v27 = vrot.slane %v3250_v11, %v7996_v59 }
 0xe4e   : > { %3765 = vrot.lane.b32.xlu1 %v3155_v31, %s9140_s6  ;;  %v3349_v46 = vcombine.low %v8501_v50, %v8504_v49  ;;  %v3350_v54 = vcombine.high %v8501_v50, %v8504_v49 }
 0xe4f   : > { %v3281_v43 = vcombine.low %v3257_v45, %v3273_v21  ;;  %v3282_v44 = vcombine.high %v3257_v45, %v3273_v21  ;;  %v3365_v23 = vcombine.low %v8507_v14, %v8510_v51  ;;  %v3297_v37 = vcombine.low %v8518_v27, %v8515_v22 }
 0xe50   : > { %v3298_v53 = vcombine.high %v8518_v27, %v8515_v22  ;;  %v3366_v38 = vcombine.high %v8507_v14, %v8510_v51  ;;  %v3357_v18 = vrot.slane %v3349_v46, %v8007_v3 }
 0xe51   : > { %v8541_v57 = vrot.slane %v3281_v43, %v8007_v3  ;;  %v3373_v63 = vrot.slane %v3365_v23, %v8007_v3 }
 0xeb0   : > { %v3466_v2 = vpop.permute.xlu0 %3465  ;;  %v3470_v4 = vpop.permute.xlu1 %3469 }
 0xeb1   : > { %v3485_v12 = vcombine.low %v3462_v60, %v3470_v4  ;;  %v3486_v13 = vcombine.high %v3462_v60, %v3470_v4  ;;  %v8544_v60 = vrot.slane %v3282_v44, %v8007_v3 }
 0xeb3   : > { %v3493_v28 = vrot.slane %v3485_v12, %v7996_v59  ;;  %v3500_v8 = vrot.slane %v3486_v13, %v7996_v59 }
 0xeb4   : > { %v3474_v5 = vpop.permute.xlu0 %3473  ;;  %v3464_v36 = vpop.permute.xlu1 %3463 }
 0xeb5   : > { %v3501_v6 = vcombine.low %v3466_v2, %v3474_v5  ;;  %v3502_v48 = vcombine.high %v3466_v2, %v3474_v5 }
 0xeb7   : > { %v3509_v9 = vrot.slane %v3501_v6, %v7996_v59  ;;  %v3516_v31 = vrot.slane %v3502_v48, %v7996_v59 }
 0xeb8   : > { %v3468_v47 = vpop.permute.xlu0 %3467 }
 0xeb9   : > { %v3517_v26 = vcombine.low %v3493_v28, %v3509_v9  ;;  %v3518_v61 = vcombine.high %v3493_v28, %v3509_v9  ;;  %v3533_v33 = vcombine.low %v3500_v8, %v3516_v31  ;;  %v3534_v35 = vcombine.high %v3500_v8, %v3516_v31 }
 0xebb   : > { %v3525_v39 = vrot.slane %v3517_v26, %v8007_v3  ;;  %v3532_v40 = vrot.slane %v3518_v61, %v8007_v3  ;;  %v3541_v42 = vrot.slane %v3533_v33, %v8007_v3  ;;  %v3548_v55 = vrot.slane %v3534_v35, %v8007_v3 }
 0xebc   : > { %v3476_v62 = vpop.permute.xlu0 %3475  ;;  %v3472_v7 = vpop.permute.xlu1 %3471 }
 0xebd   : > { %v3621_v0 = vcombine.low %v3525_v39, %v3532_v40  ;;  %v6362_v1 = vcombine.high %v3525_v39, %v3532_v40  ;;  %v3637_v2 = vcombine.low %v3541_v42, %v3548_v55  ;;  %v6363_v4 = vcombine.high %v3541_v42, %v3548_v55 }
 0xebe   : > { %v3569_v10 = vcombine.low %v3468_v47, %v3476_v62  ;;  %v3570_v11 = vcombine.high %v3468_v47, %v3476_v62  ;;  %v3553_v12 = vcombine.low %v3464_v36, %v3472_v7  ;;  %v3554_v13 = vcombine.high %v3464_v36, %v3472_v7 }
 0xebf   : > { %v3628_v45 = vrot.slane %v3621_v0, %v7996_v59  ;;  %v3636_v5 = vrot.slane %v6362_v1, %v7996_v59  ;;  %v3644_v6 = vrot.slane %v3637_v2, %v7996_v59  ;;  %v3652_v48 = vrot.slane %v6363_v4, %v7996_v59 }
 0xec0   : > { %v3577_v21 = vrot.slane %v3569_v10, %v7996_v59  ;;  %v3584_v22 = vrot.slane %v3570_v11, %v7996_v59  ;;  %v3561_v27 = vrot.slane %v3553_v12, %v7996_v59  ;;  %v3568_v28 = vrot.slane %v3554_v13, %v7996_v59 }
 0xec1   : > { %v3653_v8 = vcombine.low %v3628_v45, %v3636_v5  ;;  %v3669_v9 = vcombine.low %v3644_v6, %v3652_v48  ;;  %v3654_v31 = vcombine.high %v3628_v45, %v3636_v5  ;;  %v3670_v43 = vcombine.high %v3644_v6, %v3652_v48 }
 0xec2   : > { %v3585_v44 = vcombine.low %v3561_v27, %v3577_v21  ;;  %v3586_v47 = vcombine.high %v3561_v27, %v3577_v21  ;;  %v3601_v46 = vcombine.low %v3568_v28, %v3584_v22  ;;  %v3602_v23 = vcombine.high %v3568_v28, %v3584_v22 }
 0xec3   : > { %v3661_v26 = vrot.slane %v3653_v8, %v8007_v3  ;;  %v3677_v61 = vrot.slane %v3669_v9, %v8007_v3  ;;  %v3668_v33 = vrot.slane %v3654_v31, %v8007_v3  ;;  %v3684_v35 = vrot.slane %v3670_v43, %v8007_v3 }
 0xec4   : > { %v3593_v36 = vrot.slane %v3585_v44, %v8007_v3  ;;  %v3600_v39 = vrot.slane %v3586_v47, %v8007_v3  ;;  %v3609_v40 = vrot.slane %v3601_v46, %v8007_v3  ;;  %v3616_v42 = vrot.slane %v3602_v23, %v8007_v3 }
 0xec5   : > { %v3305_v55 = vrot.slane %v3297_v37, %v8007_v3  ;;  %v3312_v62 = vrot.slane %v3298_v53, %v8007_v3  ;;  %v3685_v0 = vcombine.low %v3661_v26, %v3677_v61  ;;  %v3686_v1 = vcombine.high %v3661_v26, %v3677_v61 }
 0xec6   : > { %v3689_v2 = vcombine.low %v3593_v36, %v3600_v39  ;;  %v6364_v4 = vcombine.high %v3593_v36, %v3600_v39  ;;  %v3705_v7 = vcombine.low %v3609_v40, %v3616_v42  ;;  %v6365_v10 = vcombine.high %v3609_v40, %v3616_v42 }
 0xec7   : > { %v3757_v11 = vpack.c.bf16 %v3685_v0, %v3685_v0  ;;  %v3758_v12 = vpack.c.bf16 %v3686_v1, %v3686_v1  ;;  %v3381_v13 = vcombine.low %v3357_v18, %v3373_v63  ;;  %v3687_v45 = vcombine.low %v3668_v33, %v3684_v35 }
 0xec8   : > { %v3696_v5 = vrot.slane %v3689_v2, %v7996_v59  ;;  %v3704_v6 = vrot.slane %v6364_v4, %v7996_v59  ;;  %v3712_v48 = vrot.slane %v3705_v7, %v7996_v59  ;;  %v3720_v37 = vrot.slane %v6365_v10, %v7996_v59 }
 0xec9   : > { %v4073_v53 = vsel %vm1650_vm2, %v3757_v11, 0  ;;  %v4119_v21 = vsel %vm1650_vm2, %v3758_v12, 0  ;;  %v3382_v22 = vcombine.high %v3357_v18, %v3373_v63  ;;  %v3688_v27 = vcombine.high %v3668_v33, %v3684_v35 }
 0xeca   : > { %v3385_v28 = vcombine.low %v8541_v57, %v8544_v60  ;;  %6698 = vmatpush3.bf16.xpose.msra.mxu0 %v4073_v53  ;;  %6704 = vmatpush3.bf16.xpose.msra.mxu1 %v4119_v21  ;;  %v3721_v8 = vcombine.low %v3696_v5, %v3704_v6  ;;  %v3737_v9 = vcombine.low %v3712_v48, %v3720_v37 }
 0xecb   : > { %v6360_v31 = vcombine.high %v8541_v57, %v8544_v60  ;;  %v3401_v43 = vcombine.low %v3305_v55, %v3312_v62  ;;  %v6361_v44 = vcombine.high %v3305_v55, %v3312_v62  ;;  %6709 = vmatprep.subr.bf16.mxu0 %v7494_v15  ;;  %6715 = vmatprep.subr.bf16.mxu1 %v7494_v15 }
 0xecc   : > { %v3759_v47 = vpack.c.bf16 %v3687_v45, %v3687_v45  ;;  %v3760_v46 = vpack.c.bf16 %v3688_v27, %v3688_v27  ;;  %v3729_v18 = vrot.slane %v3721_v8, %v8007_v3  ;;  %v3745_v63 = vrot.slane %v3737_v9, %v8007_v3 }
 0xecd   : > { %v3453_v23 = vpack.c.bf16 %v3381_v13, %v3381_v13  ;;  %v3454_v26 = vpack.c.bf16 %v3382_v22, %v3382_v22  ;;  %v3364_v61 = vrot.slane %v3350_v54, %v8007_v3  ;;  %v3380_v57 = vrot.slane %v3366_v38, %v8007_v3 }
 0xece   : > { %v3392_v60 = vrot.slane %v3385_v28, %v7996_v59  ;;  %v3400_v33 = vrot.slane %v6360_v31, %v7996_v59  ;;  %v3408_v35 = vrot.slane %v3401_v43, %v7996_v59  ;;  %v3416_v36 = vrot.slane %v6361_v44, %v7996_v59 }
 0xecf   : > { %v4165_v39 = vsel %vm1650_vm2, %v3759_v47, 0  ;;  %v3722_v40 = vcombine.high %v3696_v5, %v3704_v6  ;;  %v4211_v50 = vsel %vm1650_vm2, %v3760_v46, 0  ;;  %v3753_v49 = vcombine.low %v3729_v18, %v3745_v63 }
 0xed0   : > { %v3754_v14 = vcombine.high %v3729_v18, %v3745_v63  ;;  %v3738_v51 = vcombine.high %v3712_v48, %v3720_v37  ;;  %v3383_v54 = vcombine.low %v3364_v61, %v3380_v57  ;;  %v3384_v38 = vcombine.high %v3364_v61, %v3380_v57 }
 0xed1   : > { %6700 = vmatmul.mubr.msk.bf16.vlgmr.msra.gmra.mrb[44].mxu0 %vm1650_vm2, %v3453_v23  ;;  %6706 = vmatmul.mubr.msk.bf16.vlgmr.msra.gmra.mrb[40].mxu1 %vm1650_vm2, %v3454_v26  ;;  %v3417_v42 = vcombine.low %v3392_v60, %v3400_v33  ;;  %v3433_v55 = vcombine.low %v3408_v35, %v3416_v36  ;;  %v3761_v62 = vpack.c.bf16 %v3753_v49, %v3753_v49 }
 0xed2   : > { %6710 = vmatpush3.bf16.xpose.msra.mxu0 %v4165_v39  ;;  %6716 = vmatpush3.bf16.xpose.msra.mxu1 %v4211_v50  ;;  %v3762_v0 = vpack.c.bf16 %v3754_v14, %v3754_v14  ;;  %v3736_v1 = vrot.slane %v3722_v40, %v8007_v3  ;;  %v3752_v2 = vrot.slane %v3738_v51, %v8007_v3 }
 0xed3   : > { %6711 = vmatprep.mubr.msk.bf16.mxu0 %vm7495_vm1, %v7494_v15  ;;  %6717 = vmatprep.mubr.msk.bf16.mxu1 %vm7495_vm1, %v7494_v15  ;;  %v3455_v4 = vpack.c.bf16 %v3383_v54, %v3383_v54  ;;  %v3456_v7 = vpack.c.bf16 %v3384_v38, %v3384_v38  ;;  %v3425_v10 = vrot.slane %v3417_v42, %v8007_v3  ;;  %v4257_v12 = vsel %vm1650_vm2, %v3761_v62, 0 }
 0xed4   : > { %6721 = vmatprep.subr.bf16.mxu0 %v7494_v15  ;;  %6727 = vmatprep.subr.bf16.mxu1 %v7494_v15  ;;  %v3441_v11 = vrot.slane %v3433_v55, %v8007_v3  ;;  %v4303_v13 = vsel %vm1650_vm2, %v3762_v0, 0  ;;  %v3755_v45 = vcombine.low %v3736_v1, %v3752_v2  ;;  %v3756_v5 = vcombine.high %v3736_v1, %v3752_v2 }
 0xed5   : > { %v3418_v6 = vcombine.high %v3392_v60, %v3400_v33  ;;  %v3434_v53 = vcombine.high %v3408_v35, %v3416_v36 }
 0xed6   : > { %v3449_v48 = vcombine.low %v3425_v10, %v3441_v11  ;;  %v3450_v37 = vcombine.high %v3425_v10, %v3441_v11  ;;  %v3763_v21 = vpack.c.bf16 %v3755_v45, %v3755_v45  ;;  %v3764_v22 = vpack.c.bf16 %v3756_v5, %v3756_v5 }
 0xed7   : > { %v3432_v8 = vrot.slane %v3418_v6, %v8007_v3  ;;  %v3448_v9 = vrot.slane %v3434_v53, %v8007_v3 }
 0xed8   : > { %v3457_v27 = vpack.c.bf16 %v3449_v48, %v3449_v48  ;;  %v3458_v28 = vpack.c.bf16 %v3450_v37, %v3450_v37  ;;  %v4349_v31 = vsel %vm1650_vm2, %v3763_v21, 0  ;;  %v4395_v43 = vsel %vm1650_vm2, %v3764_v22, 0 }
 0xed9   : > { %6712 = vmatmul.mubr.msk.bf16.vlgmr.msra.gmra.mrb[48].mxu0 %vm1650_vm2, %v3455_v4  ;;  %6718 = vmatmul.mubr.msk.bf16.vlgmr.msra.gmra.mrb[44].mxu1 %vm1650_vm2, %v3456_v7  ;;  %v3451_v44 = vcombine.low %v3432_v8, %v3448_v9  ;;  %v3452_v47 = vcombine.high %v3432_v8, %v3448_v9 }
 0xeda   : > { %6722 = vmatpush3.bf16.xpose.msra.mxu0 %v4257_v12  ;;  %6728 = vmatpush3.bf16.xpose.msra.mxu1 %v4303_v13 }
 0xedb   : > { %6723 = vmatprep.mubr.msk.bf16.mxu0 %vm7495_vm1, %v7494_v15  ;;  %6729 = vmatprep.mubr.msk.bf16.mxu1 %vm7495_vm1, %v7494_v15  ;;  %v3459_v46 = vpack.c.bf16 %v3451_v44, %v3451_v44  ;;  %v3460_v18 = vpack.c.bf16 %v3452_v47, %v3452_v47 }
 0xedc   : > { %6733 = vmatprep.subr.bf16.mxu0 %v7494_v15  ;;  %6739 = vmatprep.subr.bf16.mxu1 %v7494_v15 }
 0xee1   : > { %6724 = vmatmul.mubr.msk.bf16.vlgmr.msra.gmra.mrb[52].mxu0 %vm1650_vm2, %v3457_v27  ;;  %6730 = vmatmul.mubr.msk.bf16.vlgmr.msra.gmra.mrb[48].mxu1 %vm1650_vm2, %v3458_v28 }
 0xee2   : > { %6734 = vmatpush3.bf16.xpose.msra.mxu0 %v4349_v31  ;;  %6740 = vmatpush3.bf16.xpose.msra.mxu1 %v4395_v43 }
 0xee3   : > { %6735 = vmatprep.mubr.msk.bf16.mxu0 %vm7495_vm1, %v7494_v15  ;;  %6741 = vmatprep.mubr.msk.bf16.mxu1 %vm7495_vm1, %v7494_v15 }
 0xee4   : > { %6745 = vmatprep.subr.bf16.mxu0 %v7494_v15  ;;  %6751 = vmatprep.subr.bf16.mxu1 %v7494_v15 }
 0xee9   : > { %6736 = vmatmul.mubr.msk.bf16.vlgmr.msra.gmra.mrb[56].mxu0 %vm1650_vm2, %v3459_v46  ;;  %6742 = vmatmul.mubr.msk.bf16.vlgmr.msra.gmra.mrb[52].mxu1 %vm1650_vm2, %v3460_v18 }
 0xeea   : > { %6747 = vmatprep.mubr.msk.bf16.mxu0 %vm7495_vm1, %v7494_v15  ;;  %6753 = vmatprep.mubr.msk.bf16.mxu1 %vm7495_vm1, %v7494_v15 }
 0xfa4   : > { %v4109_v63 = vpop.f32.mrb[44].mxu0  ;;  %v4155_v23 = vpop.f32.mrb[40].mxu1 }
 0xfa5   : > { %v8634_v26 = vmul.f32 0.35355338, %v4109_v63  ;;  %v4438_v61 = vmul.f32 0.35355338, %v4155_v23  ;;  %v6701_v57 = vpop.f32.mrb[45].mxu0  ;;  %v6707_v60 = vpop.f32.mrb[41].mxu1 }
 0xfa6   : > { %v4112_v33 = vpop.f32.mrb[46].mxu0  ;;  %v4158_v35 = vpop.f32.mrb[42].mxu1 }
 0xfa7   : > { %v6702_v36 = vpop.f32.mrb[47].mxu0  ;;  %v6708_v39 = vpop.f32.mrb[43].mxu1  ;;  %v4448_v40 = vsel %vm1650_vm2, %v4438_v61, -inf  ;;  %v4445_v50 = vsel %vm1650_vm2, %v8634_v26, -inf }
 0xfa8   : > { %4449 = vmax.xlane.f32.xlu0 %v4448_v40  ;;  %4446 = vmax.xlane.f32.xlu1 %v4445_v50  ;;  %v3766_v23 = vpop.permute.xlu1 %3765 }
 0xfac   : > { %v4201_v49 = vpop.f32.mrb[48].mxu0  ;;  %v4247_v14 = vpop.f32.mrb[44].mxu1 }
 0xfad   : > { %v4439_v51 = vmul.f32 0.35355338, %v4201_v49  ;;  %v6713_v54 = vpop.f32.mrb[49].mxu0  ;;  %v6719_v38 = vpop.f32.mrb[45].mxu1  ;;  %v4440_v62 = vmul.f32 0.35355338, %v4247_v14 }
 0xfae   : > { %v4204_v42 = vpop.f32.mrb[50].mxu0  ;;  %v4250_v55 = vpop.f32.mrb[46].mxu1 }
 0xfaf   : > { %v6714_v0 = vpop.f32.mrb[51].mxu0  ;;  %v6720_v1 = vpop.f32.mrb[47].mxu1  ;;  %v4451_v2 = vsel %vm1650_vm2, %v4439_v51, -inf  ;;  %v4454_v4 = vsel %vm1650_vm2, %v4440_v62, -inf }
 0xfb0   : > { %4452 = vmax.xlane.f32.xlu0 %v4451_v2 }
 0xfb4   : > { %v4339_v7 = vpop.f32.mrb[48].mxu1  ;;  %4455 = vmax.xlane.f32.xlu0 %v4454_v4  ;;  %v4293_v10 = vpop.f32.mrb[52].mxu0 }
 0xfb5   : > { %v4442_v11 = vmul.f32 0.35355338, %v4339_v7  ;;  %v4441_v12 = vmul.f32 0.35355338, %v4293_v10  ;;  %v6725_v13 = vpop.f32.mrb[53].mxu0  ;;  %v6731_v45 = vpop.f32.mrb[49].mxu1 }
 0xfb6   : > { %v4296_v5 = vpop.f32.mrb[54].mxu0  ;;  %v4342_v6 = vpop.f32.mrb[50].mxu1 }
 0xfb7   : > { %v6726_v48 = vpop.f32.mrb[55].mxu0  ;;  %v6732_v37 = vpop.f32.mrb[51].mxu1  ;;  %v4460_v53 = vsel %vm1650_vm2, %v4442_v11, -inf  ;;  %v4457_v21 = vsel %vm1650_vm2, %v4441_v12, -inf }
 0xfb8   : > { %4461 = vmax.xlane.f32.xlu0 %v4460_v53  ;;  %4458 = vmax.xlane.f32.xlu1 %v4457_v21 }
 0xfbc   : > { %v4385_v22 = vpop.f32.mrb[56].mxu0  ;;  %v4431_v27 = vpop.f32.mrb[52].mxu1 }
 0xfbd   : > { %v8643_v28 = vmul.f32 0.35355338, %v4385_v22  ;;  %v8645_v8 = vmul.f32 0.35355338, %v4431_v27  ;;  %v6737_v9 = vpop.f32.mrb[57].mxu0  ;;  %v6743_v31 = vpop.f32.mrb[53].mxu1 }
 0xfbe   : > { %v4388_v43 = vpop.f32.mrb[58].mxu0  ;;  %v4434_v44 = vpop.f32.mrb[54].mxu1 }
 0xfbf   : > { %v6738_v47 = vpop.f32.mrb[59].mxu0  ;;  %v6744_v46 = vpop.f32.mrb[55].mxu1  ;;  %v4466_v18 = vsel %vm1650_vm2, %v8645_v8, -inf  ;;  %v4463_v63 = vsel %vm1650_vm2, %v8643_v28, -inf }
 0xfc0   : > { %4467 = vmax.xlane.f32.xlu0 %v4466_v18  ;;  %4464 = vmax.xlane.f32.xlu1 %v4463_v63 }
 0xfd1   : > { %3773 = vrot.lane.b32.xlu1 %v8451_v58, %s9140_s6 }
 0xfd5   : > { %3777 = vrot.lane.b32.xlu1 %v8459_v20, %s9140_s6 }
 0xfd6   : > { %3769 = vrot.lane.b32.xlu0 %v8453_v19, %s9140_s6 }
 0xfd9   : > { %3767 = vrot.lane.b32.xlu1 %v8441_v32, %s9140_s6 }
0x1035   : > { %v4450_v57 = vpop.xlane.xlu0 %4449  ;;  %v4447_v60 = vpop.xlane.xlu1 %4446 }
0x1036   : > { %v4470_v33 = vsub.f32 %v4438_v61, %v4450_v57  ;;  %v4469_v35 = vsub.f32 %v8634_v26, %v4447_v60 }
0x1038   : > { %v4479_v36 = vmul.f32 1.442695, %v4470_v33  ;;  %v4477_v39 = vmul.f32 1.442695, %v4469_v35 }
0x103a   : > { %7108 = vpow2.f32 %v4479_v36 }
0x103b   : > { %7110 = vpow2.f32 %v4477_v39 }
0x103d   : > { %v4453_v58 = vpop.xlane.xlu0 %4452 }
0x103e   : > { %v4471_v40 = vsub.f32 %v4439_v51, %v4453_v58 }
0x1040   : > { %v4481_v50 = vmul.f32 1.442695, %v4471_v40 }
0x1041   : > { %v4456_v20 = vpop.xlane.xlu0 %4455 }
0x1042   : > { %7112 = vpow2.f32 %v4481_v50  ;;  %v4472_v49 = vsub.f32 %v4440_v62, %v4456_v20 }
0x1044   : > { %v8660_v19 = vpop.eup %7108  ;;  %v4483_v14 = vmul.f32 1.442695, %v4472_v49 }
0x1045   : > { %v8662_v32 = vpop.eup %7110  ;;  %v4462_v54 = vpop.xlane.xlu0 %4461  ;;  %v4496_v26 = vsel %vm1650_vm2, %v8660_v19, 0.0 }
0x1046   : > { %v4459_v38 = vpop.xlane.xlu1 %4458  ;;  %7114 = vpow2.f32 %v4483_v14  ;;  %v4474_v61 = vsub.f32 %v4442_v11, %v4462_v54  ;;  %4497 = vadd.xlane.f32.xlu0 %v4496_v26  ;;  %v4493_v51 = vsel %vm1650_vm2, %v8662_v32, 0.0 }
0x1047   : > { %v4473_v42 = vsub.f32 %v4441_v12, %v4459_v38  ;;  %4494 = vadd.xlane.f32.xlu1 %v4493_v51 }
0x1048   : > { %v4487_v55 = vmul.f32 1.442695, %v4474_v61 }
0x1049   : > { %v4485_v62 = vmul.f32 1.442695, %v4473_v42 }
0x104b   : > { %7116 = vpow2.f32 %v4485_v62 }
0x104c   : > { %v8668_v0 = vpop.eup %7112  ;;  %7118 = vpow2.f32 %v4487_v55 }
0x104d   : > { %v8670_v1 = vpop.xlane.xlu1 %4464  ;;  %v4499_v2 = vsel %vm1650_vm2, %v8668_v0, 0.0  ;;  %v8674_v4 = vpop.xlane.xlu0 %4467 }
0x104e   : > { %4500 = vadd.xlane.f32.xlu1 %v4499_v2 }
0x1050   : > { %v8676_v7 = vpop.eup %7114 }
0x1051   : > { %v3774_v10 = vpop.permute.xlu1 %3773  ;;  %v4502_v11 = vsel %vm1650_vm2, %v8676_v7, 0.0  ;;  %v3770_v5 = vpop.permute.xlu0 %3769 }
0x1052   : > { %4503 = vadd.xlane.f32.xlu0 %v4502_v11  ;;  %v3789_v12 = vcombine.low %v3766_v23, %v3774_v10  ;;  %v3790_v13 = vcombine.high %v3766_v23, %v3774_v10 }
0x1054   : > { %v3797_v22 = vrot.slane %v3789_v12, %v7996_v59  ;;  %v3804_v27 = vrot.slane %v3790_v13, %v7996_v59 }
0x1055   : > { %v8680_v45 = vpop.eup %7116  ;;  %v3778_v6 = vpop.permute.xlu1 %3777 }
0x1056   : > { %v8682_v48 = vpop.eup %7118  ;;  %v3805_v37 = vcombine.low %v3770_v5, %v3778_v6  ;;  %v3806_v53 = vcombine.high %v3770_v5, %v3778_v6  ;;  %v4505_v21 = vsel %vm1650_vm2, %v8680_v45, 0.0  ;;  %v4476_v6 = vsub.f32 %v8645_v8, %v8674_v4 }
0x1057   : > { %4506 = vadd.xlane.f32.xlu0 %v4505_v21  ;;  %v4508_v43 = vsel %vm1650_vm2, %v8682_v48, 0.0 }
0x1058   : > { %v3813_v9 = vrot.slane %v3805_v37, %v7996_v59  ;;  %v3820_v31 = vrot.slane %v3806_v53, %v7996_v59  ;;  %v4491_v37 = vmul.f32 1.442695, %v4476_v6 }
0x105a   : > { %v3821_v44 = vcombine.low %v3797_v22, %v3813_v9  ;;  %v3822_v47 = vcombine.high %v3797_v22, %v3813_v9  ;;  %v3837_v46 = vcombine.low %v3804_v27, %v3820_v31  ;;  %v3838_v18 = vcombine.high %v3804_v27, %v3820_v31 }
0x105b   : > { %4509 = vadd.xlane.f32.xlu0 %v4508_v43 }
0x105c   : > { %v3829_v63 = vrot.slane %v3821_v44, %v8007_v3  ;;  %v3836_v23 = vrot.slane %v3822_v47, %v8007_v3  ;;  %v3845_v57 = vrot.slane %v3837_v46, %v8007_v3  ;;  %v3852_v60 = vrot.slane %v3838_v18, %v8007_v3 }
0x105e   : > { %v3925_v33 = vcombine.low %v3829_v63, %v3836_v23  ;;  %v6366_v35 = vcombine.high %v3829_v63, %v3836_v23  ;;  %v3941_v36 = vcombine.low %v3845_v57, %v3852_v60  ;;  %v6367_v39 = vcombine.high %v3845_v57, %v3852_v60 }
0x105f   : > { %3775 = vrot.lane.b32.xlu1 %v8471_v52, %s9140_s6 }
0x1060   : > { %v3932_v58 = vrot.slane %v3925_v33, %v7996_v59  ;;  %v3940_v40 = vrot.slane %v6366_v35, %v7996_v59  ;;  %v3948_v50 = vrot.slane %v3941_v36, %v7996_v59  ;;  %v3956_v20 = vrot.slane %v6367_v39, %v7996_v59 }
0x1062   : > { %v3957_v49 = vcombine.low %v3932_v58, %v3940_v40  ;;  %v3973_v14 = vcombine.low %v3948_v50, %v3956_v20  ;;  %v3958_v54 = vcombine.high %v3932_v58, %v3940_v40  ;;  %v3974_v38 = vcombine.high %v3948_v50, %v3956_v20 }
0x1063   : > { %3779 = vrot.lane.b32.xlu1 %v8469_v56, %s9140_s6  ;;  %v4475_v56 = vsub.f32 %v8643_v28, %v8670_v1 }
0x1064   : > { %v3965_v26 = vrot.slane %v3957_v49, %v8007_v3  ;;  %v3981_v61 = vrot.slane %v3973_v14, %v8007_v3  ;;  %v3972_v52 = vrot.slane %v3958_v54, %v8007_v3  ;;  %v3988_v42 = vrot.slane %v3974_v38, %v8007_v3 }
0x1065   : > { %v4489_v5 = vmul.f32 1.442695, %v4475_v56 }
0x1066   : > { %v3989_v51 = vcombine.low %v3965_v26, %v3981_v61  ;;  %v3990_v55 = vcombine.high %v3965_v26, %v3981_v61  ;;  %v3991_v62 = vcombine.low %v3972_v52, %v3988_v42  ;;  %v3992_v2 = vcombine.high %v3972_v52, %v3988_v42 }
0x1067   : > { %7120 = vpow2.f32 %v4489_v5 }
0x1068   : > { %v4061_v10 = vpack.c.bf16 %v3989_v51, %v3989_v51  ;;  %v4062_v11 = vpack.c.bf16 %v3990_v55, %v3990_v55  ;;  %7122 = vpow2.f32 %v4491_v37  ;;  %v4064_v44 = vpack.c.bf16 %v3992_v2, %v3992_v2 }
0x1069   : > { %v4063_v46 = vpack.c.bf16 %v3991_v62, %v3991_v62 }
0x106a   : > { %v4545_v12 = vsel %vm2126_vm3, %v4061_v10, 0  ;;  %v4591_v13 = vsel %vm2126_vm3, %v4062_v11, 0  ;;  %v4683_v23 = vsel %vm2126_vm3, %v4064_v44, 0 }
0x106b   : > { %6746 = vmatpush3.bf16.msra.mxu0 %v4545_v12  ;;  %6752 = vmatpush3.bf16.msra.mxu1 %v4591_v13  ;;  %v4637_v60 = vsel %vm2126_vm3, %v4063_v46, 0 }
0x106c   : > { %6757 = vmatprep.subr.bf16.mxu0 %v7494_v15  ;;  %6763 = vmatprep.subr.bf16.mxu1 %v7494_v15 }
0x1071   : > { %3771 = vrot.lane.b32.xlu0 %v8465_v29, %s9140_s6  ;;  %v8718_v53 = vpop.eup %7120  ;;  %v3768_v29 = vpop.permute.xlu1 %3767 }
0x1072   : > { %v4511_v21 = vsel %vm1650_vm2, %v8718_v53, 0.0  ;;  %v8722_v22 = vpop.eup %7122 }
0x1073   : > { %v4514_v28 = vsel %vm1650_vm2, %v8722_v22, 0.0 }
0x1087   : > { %4512 = vadd.xlane.f32.xlu1 %v4511_v21 }
0x1090   : > { %4515 = vadd.xlane.f32.xlu0 %v4514_v28 }
0x10d3   : > { %v4498_v1 = vpop.xlane.xlu0 %4497 }
0x10d4   : > { %7124 = vrcp.f32 %v4498_v1  ;;  %v4495_v27 = vpop.xlane.xlu1 %4494 }
0x10d5   : > { %7126 = vrcp.f32 %v4495_v27 }
0x10db   : > { %v4501_v8 = vpop.xlane.xlu1 %4500 }
0x10dc   : > { %7128 = vrcp.f32 %v4501_v8 }
0x10de   : > { %v7125_v4 = vpop.eup %7124 }
0x10df   : > { %v7127_v9 = vpop.eup %7126  ;;  %v4526_v31 = vmul.f32 %v7125_v4, %v8660_v19  ;;  %v4504_v43 = vpop.xlane.xlu0 %4503 }
0x10e0   : > { %v4525_v47 = vmul.f32 %v7127_v9, %v8662_v32  ;;  %7130 = vrcp.f32 %v4504_v43  ;;  %v3776_v32 = vpop.permute.xlu1 %3775 }
0x10e1   : > { %v4534_v18 = vpack.c.bf16 %v4526_v31, %v4526_v31  ;;  %v3857_v40 = vcombine.low %v3768_v29, %v3776_v32  ;;  %v3858_v50 = vcombine.high %v3768_v29, %v3776_v32 }
0x10e2   : > { %v4533_v63 = vpack.c.bf16 %v4525_v47, %v4525_v47 }
0x10e3   : > { %6754 = vmatmul.mubr.msk.bf16.vlgmr.msra.gmra.mrb[56].mxu1 %vm1650_vm2, %v4534_v18  ;;  %v3872_v26 = vrot.slane %v3858_v50, %v7996_v59 }
0x10e4   : > { %v4507_v57 = vpop.xlane.xlu0 %4506  ;;  %6748 = vmatmul.mubr.msk.bf16.vlgmr.msra.gmra.mrb[60].mxu0 %vm1650_vm2, %v4533_v63  ;;  %6764 = vmatpush3.bf16.msra.mxu1 %v4683_v23  ;;  %v3780_v20 = vpop.permute.xlu1 %3779 }
0x10e5   : > { %6758 = vmatpush3.bf16.msra.mxu0 %v4637_v60  ;;  %6759 = vmatprep.mubr.msk.bf16.mxu0 %vm7495_vm1, %v7494_v15  ;;  %7132 = vrcp.f32 %v4507_v57 }
0x10e6   : > { %v7129_v19 = vpop.eup %7128  ;;  %6765 = vmatprep.mubr.msk.bf16.mxu1 %vm7495_vm1, %v7494_v15  ;;  %6769 = vmatprep.subr.bf16.mxu0 %v7494_v15 }
0x10e7   : > { %v4527_v33 = vmul.f32 %v7129_v19, %v8668_v0  ;;  %6775 = vmatprep.subr.bf16.mxu1 %v7494_v15  ;;  %v3865_v0 = vrot.slane %v3857_v40, %v7996_v59 }
0x10e8   : > { %v4510_v35 = vpop.xlane.xlu0 %4509 }
0x10e9   : > { %v4535_v36 = vpack.c.bf16 %v4527_v33, %v4527_v33  ;;  %7134 = vrcp.f32 %v4510_v35 }
0x10ea   : > { %v7131_v39 = vpop.eup %7130 }
0x10eb   : > { %v4528_v58 = vmul.f32 %v7131_v39, %v8676_v7 }
0x10ec   : > { %v3772_v49 = vpop.permute.xlu0 %3771  ;;  %6760 = vmatmul.mubr.msk.bf16.vlgmr.msra.gmra.mrb[64].mxu0 %vm1650_vm2, %v4535_v36 }
0x10ed   : > { %v3873_v14 = vcombine.low %v3772_v49, %v3780_v20  ;;  %v3874_v54 = vcombine.high %v3772_v49, %v3780_v20  ;;  %v4536_v38 = vpack.c.bf16 %v4528_v58, %v4528_v58  ;;  %6771 = vmatprep.mubr.msk.bf16.mxu0 %vm7495_vm1, %v7494_v15 }
0x10ef   : > { %v3881_v61 = vrot.slane %v3873_v14, %v7996_v59  ;;  %v3888_v7 = vrot.slane %v3874_v54, %v7996_v59  ;;  %6766 = vmatmul.mubr.msk.bf16.vlgmr.msra.gmra.mrb[60].mxu1 %vm1650_vm2, %v4536_v38  ;;  %v7133_v4 = vpop.eup %7132 }
0x10f0   : > { %6777 = vmatprep.mubr.msk.bf16.mxu1 %vm7495_vm1, %v7494_v15  ;;  %v4529_v57 = vmul.f32 %v7133_v4, %v8680_v45 }
0x10f1   : > { %v3889_v52 = vcombine.low %v3865_v0, %v3881_v61  ;;  %v3890_v42 = vcombine.high %v3865_v0, %v3881_v61  ;;  %v3905_v51 = vcombine.low %v3872_v26, %v3888_v7  ;;  %v3906_v55 = vcombine.high %v3872_v26, %v3888_v7 }
0x10f2   : > { %v4537_v58 = vpack.c.bf16 %v4529_v57, %v4529_v57 }
0x10f3   : > { %v3897_v62 = vrot.slane %v3889_v52, %v8007_v3  ;;  %v3904_v2 = vrot.slane %v3890_v42, %v8007_v3  ;;  %v3913_v10 = vrot.slane %v3905_v51, %v8007_v3  ;;  %v3920_v11 = vrot.slane %v3906_v55, %v8007_v3  ;;  %v7135_v47 = vpop.eup %7134 }
0x10f4   : > { %v4530_v60 = vmul.f32 %v7135_v47, %v8682_v48 }
0x10f5   : > { %v3993_v12 = vcombine.low %v3897_v62, %v3904_v2  ;;  %v6368_v13 = vcombine.high %v3897_v62, %v3904_v2  ;;  %v4009_v56 = vcombine.low %v3913_v10, %v3920_v11  ;;  %v6369_v5 = vcombine.high %v3913_v10, %v3920_v11 }
0x10f6   : > { %v4538_v40 = vpack.c.bf16 %v4530_v60, %v4530_v60 }
0x10f7   : > { %v4000_v6 = vrot.slane %v3993_v12, %v7996_v59  ;;  %v4008_v37 = vrot.slane %v6368_v13, %v7996_v59  ;;  %v4016_v21 = vrot.slane %v4009_v56, %v7996_v59  ;;  %v4024_v28 = vrot.slane %v6369_v5, %v7996_v59 }
0x10f9   : > { %v4025_v29 = vcombine.low %v4000_v6, %v4008_v37  ;;  %v4041_v1 = vcombine.low %v4016_v21, %v4024_v28  ;;  %v4026_v27 = vcombine.high %v4000_v6, %v4008_v37  ;;  %v4042_v8 = vcombine.high %v4016_v21, %v4024_v28 }
0x10fb   : > { %v4033_v9 = vrot.slane %v4025_v29, %v8007_v3  ;;  %v4049_v31 = vrot.slane %v4041_v1, %v8007_v3  ;;  %v4040_v43 = vrot.slane %v4026_v27, %v8007_v3  ;;  %v4056_v44 = vrot.slane %v4042_v8, %v8007_v3 }
0x10fd   : > { %v4057_v46 = vcombine.low %v4033_v9, %v4049_v31  ;;  %v4058_v18 = vcombine.high %v4033_v9, %v4049_v31  ;;  %v4059_v63 = vcombine.low %v4040_v43, %v4056_v44  ;;  %v4060_v23 = vcombine.high %v4040_v43, %v4056_v44 }
0x10ff   : > { %v4065_v19 = vpack.c.bf16 %v4057_v46, %v4057_v46  ;;  %v4066_v32 = vpack.c.bf16 %v4058_v18, %v4058_v18  ;;  %v4067_v36 = vpack.c.bf16 %v4059_v63, %v4059_v63  ;;  %v4068_v39 = vpack.c.bf16 %v4060_v23, %v4060_v23 }
0x1101   : > { %v4729_v33 = vsel %vm2126_vm3, %v4065_v19, 0  ;;  %v4775_v35 = vsel %vm2126_vm3, %v4066_v32, 0  ;;  %v4821_v45 = vsel %vm2126_vm3, %v4067_v36, 0  ;;  %v4867_v48 = vsel %vm2126_vm3, %v4068_v39, 0 }
0x1102   : > { %6770 = vmatpush3.bf16.msra.mxu0 %v4729_v33  ;;  %6776 = vmatpush3.bf16.msra.mxu1 %v4775_v35 }
0x1103   : > { %6781 = vmatprep.subr.bf16.mxu0 %v7494_v15  ;;  %6787 = vmatprep.subr.bf16.mxu1 %v7494_v15 }
0x1105   : > { %6772 = vmatmul.mubr.msk.bf16.vlgmr.msra.gmra.mrb[68].mxu0 %vm1650_vm2, %v4537_v58  ;;  %6778 = vmatmul.mubr.msk.bf16.vlgmr.msra.gmra.mrb[64].mxu1 %vm1650_vm2, %v4538_v40 }
0x1106   : > { %6782 = vmatpush3.bf16.msra.mxu0 %v4821_v45  ;;  %6788 = vmatpush3.bf16.msra.mxu1 %v4867_v48 }
0x1107   : > { %6783 = vmatprep.mubr.msk.bf16.mxu0 %vm7495_vm1, %v7494_v15  ;;  %6789 = vmatprep.mubr.msk.bf16.mxu1 %vm7495_vm1, %v7494_v15 }
0x1108   : > { %6793 = vmatprep.subr.bf16.mxu0 %v7494_v15  ;;  %6801 = vmatprep.subr.bf16.mxu1 %v7494_v15 }
0x1114   : > { %v4513_v50 = vpop.xlane.xlu1 %4512 }
0x1115   : > { %7136 = vrcp.f32 %v4513_v50 }
0x111d   : > { %v4516_v20 = vpop.xlane.xlu0 %4515 }
0x111e   : > { %7138 = vrcp.f32 %v4516_v20 }
0x111f   : > { %v7137_v49 = vpop.eup %7136 }
0x1120   : > { %v4531_v14 = vmul.f32 %v7137_v49, %v8718_v53 }
0x1122   : > { %v4539_v54 = vpack.c.bf16 %v4531_v14, %v4531_v14 }
0x1124   : > { %6784 = vmatmul.mubr.msk.bf16.vlgmr.msra.gmra.mrb[72].mxu0 %vm1650_vm2, %v4539_v54 }
0x1125   : > { %6797 = vmatprep.mubr.msk.bf16.mxu0 %vm7495_vm1, %v7494_v15 }
0x1128   : > { %v7139_v38 = vpop.eup %7138 }
0x1129   : > { %v4532_v0 = vmul.f32 %v7139_v38, %v8722_v22 }
0x112b   : > { %v4540_v26 = vpack.c.bf16 %v4532_v0, %v4532_v0 }
0x112d   : > { %6790 = vmatmul.mubr.msk.bf16.vlgmr.msra.gmra.mrb[68].mxu1 %vm1650_vm2, %v4540_v26 }
0x112e   : > { %6805 = vmatprep.mubr.msk.bf16.mxu1 %vm7495_vm1, %v7494_v15 }
0x11b6   : > { %v4627_v61 = vpop.f32.mrb[56].mxu1 }
0x11b7   : > { %v4581_v7 = vpop.f32.mrb[60].mxu0  ;;  %v6755_v52 = vpop.f32.mrb[57].mxu1 }
0x11b8   : > { %v6749_v42 = vpop.f32.mrb[61].mxu0  ;;  %v4630_v53 = vpop.f32.mrb[58].mxu1 }
0x11b9   : > { %v4584_v51 = vpop.f32.mrb[62].mxu0  ;;  %v6756_v55 = vpop.f32.mrb[59].mxu1 }
0x11ba   : > { %v6750_v62 = vpop.f32.mrb[63].mxu0 }
0x11bf   : > { %v4673_v2 = vpop.f32.mrb[64].mxu0 }
0x11c0   : > { %v4909_v10 = vcombine.low %v4581_v7, %v4673_v2  ;;  %v4910_v11 = vcombine.high %v4581_v7, %v4673_v2  ;;  %v6761_v12 = vpop.f32.mrb[65].mxu0 }
0x11c1   : > { %v4676_v13 = vpop.f32.mrb[66].mxu0 }
0x11c2   : > { %v6762_v22 = vpop.f32.mrb[67].mxu0  ;;  %v4719_v56 = vpop.f32.mrb[60].mxu1  ;;  %v4917_v28 = vrot.slane %v4909_v10, %v7996_v59  ;;  %v4924_v29 = vrot.slane %v4910_v11, %v7996_v59 }
0x11c3   : > { %v4925_v5 = vcombine.low %v4627_v61, %v4719_v56  ;;  %v4926_v6 = vcombine.high %v4627_v61, %v4719_v56  ;;  %v6767_v37 = vpop.f32.mrb[61].mxu1 }
0x11c4   : > { %v4722_v21 = vpop.f32.mrb[62].mxu1 }
0x11c5   : > { %v4933_v1 = vrot.slane %v4925_v5, %v7996_v59  ;;  %v4940_v27 = vrot.slane %v4926_v6, %v7996_v59  ;;  %v6768_v8 = vpop.f32.mrb[63].mxu1 }
0x11c7   : > { %v4941_v4 = vcombine.low %v4917_v28, %v4933_v1  ;;  %v4942_v9 = vcombine.high %v4917_v28, %v4933_v1  ;;  %v4957_v31 = vcombine.low %v4924_v29, %v4940_v27  ;;  %v4958_v43 = vcombine.high %v4924_v29, %v4940_v27 }
0x11c9   : > { %v4949_v44 = vrot.slane %v4941_v4, %v8007_v3  ;;  %v4956_v47 = vrot.slane %v4942_v9, %v8007_v3  ;;  %v4965_v46 = vrot.slane %v4957_v31, %v8007_v3  ;;  %v4972_v18 = vrot.slane %v4958_v43, %v8007_v3 }
0x11cb   : > { %v5045_v63 = vcombine.low %v4949_v44, %v4956_v47  ;;  %v6386_v23 = vcombine.high %v4949_v44, %v4956_v47  ;;  %v5061_v57 = vcombine.low %v4965_v46, %v4972_v18  ;;  %v6387_v60 = vcombine.high %v4965_v46, %v4972_v18 }
0x11cd   : > { %v5052_v19 = vrot.slane %v5045_v63, %v7996_v59  ;;  %v5060_v32 = vrot.slane %v6386_v23, %v7996_v59  ;;  %v5068_v33 = vrot.slane %v5061_v57, %v7996_v59  ;;  %v5076_v35 = vrot.slane %v6387_v60, %v7996_v59  ;;  %v7048_v57 = vld [vmem:[%s9137_s4 + $0x10] sm:$0xff]  }
0x11ce   : > { %6794 = vmatpush3.bf16.msra.mxu0 %v7048_v57 }
0x11cf   : > { %v5078_v36 = vcombine.high %v5052_v19, %v5060_v32  ;;  %v5094_v39 = vcombine.high %v5068_v33, %v5076_v35  ;;  %v5077_v58 = vcombine.low %v5052_v19, %v5060_v32  ;;  %v5093_v40 = vcombine.low %v5068_v33, %v5076_v35  ;;  %6795 = vmatprep.subr.bf16.mxu0 %v7494_v15 }
0x11d1   : > { %v8799_v45 = vrot.slane %v5078_v36, %v8007_v3  ;;  %v8802_v48 = vrot.slane %v5094_v39, %v8007_v3  ;;  %v8805_v50 = vrot.slane %v5077_v58, %v8007_v3  ;;  %v8808_v20 = vrot.slane %v5093_v40, %v8007_v3  ;;  %v7049_v40 = vld [vmem:[%s9137_s4 + $0x18] sm:$0xff]  }
0x11d2   : > { %6796 = vmatpush3.bf16.msra.mxu0 %v7049_v40 }
0x11d3   : > { %v5111_v49 = vcombine.low %v8799_v45, %v8802_v48  ;;  %v5109_v14 = vcombine.low %v8805_v50, %v8808_v20  ;;  %v5110_v54 = vcombine.high %v8805_v50, %v8808_v20  ;;  %v5112_v38 = vcombine.high %v8799_v45, %v8802_v48  ;;  %6809 = vmatprep.subr.bf16.mxu0 %v7494_v15  ;;  %v8860_v50 = vld [vmem:[%s9136_s11 + $0x8] sm:$0x3f] }
0x11d4   : > { %v5220_v20 = vrot.slane %v8860_v50, %v8361_v17 }
0x11d8   : > { %v4765_v0 = vpop.f32.mrb[68].mxu0  ;;  %v4811_v26 = vpop.f32.mrb[64].mxu1 }
0x11d9   : > { %v6773_v61 = vpop.f32.mrb[69].mxu0  ;;  %v6779_v7 = vpop.f32.mrb[65].mxu1 }
0x11da   : > { %v4768_v52 = vpop.f32.mrb[70].mxu0  ;;  %v4814_v42 = vpop.f32.mrb[66].mxu1 }
0x11db   : > { %v6774_v53 = vpop.f32.mrb[71].mxu0  ;;  %v6780_v51 = vpop.f32.mrb[67].mxu1 }
0x11f7   : > { %v4857_v55 = vpop.f32.mrb[72].mxu0 }
0x11f8   : > { %v4977_v62 = vcombine.low %v4765_v0, %v4857_v55  ;;  %v4978_v2 = vcombine.high %v4765_v0, %v4857_v55  ;;  %v6785_v10 = vpop.f32.mrb[73].mxu0 }
0x11f9   : > { %v4860_v11 = vpop.f32.mrb[74].mxu0 }
0x11fa   : > { %v6786_v12 = vpop.f32.mrb[75].mxu0  ;;  %v4985_v37 = vrot.slane %v4977_v62, %v7996_v59  ;;  %v4992_v21 = vrot.slane %v4978_v2, %v7996_v59 }
0x1200   : > { %v4903_v13 = vpop.f32.mrb[68].mxu1 }
0x1201   : > { %v4993_v22 = vcombine.low %v4811_v26, %v4903_v13  ;;  %v4994_v56 = vcombine.high %v4811_v26, %v4903_v13  ;;  %v6791_v5 = vpop.f32.mrb[69].mxu1 }
0x1202   : > { %v4906_v6 = vpop.f32.mrb[70].mxu1 }
0x1203   : > { %v5001_v28 = vrot.slane %v4993_v22, %v7996_v59  ;;  %v5008_v29 = vrot.slane %v4994_v56, %v7996_v59  ;;  %v6792_v1 = vpop.f32.mrb[71].mxu1 }
0x1205   : > { %v5009_v27 = vcombine.low %v4985_v37, %v5001_v28  ;;  %v5010_v8 = vcombine.high %v4985_v37, %v5001_v28  ;;  %v5025_v4 = vcombine.low %v4992_v21, %v5008_v29  ;;  %v5026_v9 = vcombine.high %v4992_v21, %v5008_v29 }
0x1207   : > { %v5017_v31 = vrot.slane %v5009_v27, %v8007_v3  ;;  %v5024_v43 = vrot.slane %v5010_v8, %v8007_v3  ;;  %v5033_v44 = vrot.slane %v5025_v4, %v8007_v3  ;;  %v5040_v47 = vrot.slane %v5026_v9, %v8007_v3 }
0x1209   : > { %v5113_v46 = vcombine.low %v5017_v31, %v5024_v43  ;;  %v6388_v18 = vcombine.high %v5017_v31, %v5024_v43  ;;  %v5129_v63 = vcombine.low %v5033_v44, %v5040_v47  ;;  %v6389_v23 = vcombine.high %v5033_v44, %v5040_v47 }
0x120b   : > { %v5120_v60 = vrot.slane %v5113_v46, %v7996_v59  ;;  %v5128_v19 = vrot.slane %v6388_v18, %v7996_v59  ;;  %v5136_v32 = vrot.slane %v5129_v63, %v7996_v59  ;;  %v5144_v33 = vrot.slane %v6389_v23, %v7996_v59 }
0x120d   : > { %v5146_v35 = vcombine.high %v5120_v60, %v5128_v19  ;;  %v5162_v36 = vcombine.high %v5136_v32, %v5144_v33  ;;  %v5145_v39 = vcombine.low %v5120_v60, %v5128_v19  ;;  %v5161_v58 = vcombine.low %v5136_v32, %v5144_v33  ;;  %v7050_v60 = vld [vmem:[%s9138_s27 + $0x10] sm:$0xff]   ;;  %v7051_v19 = vld [vmem:[%s9138_s27 + $0x18] sm:$0xff]   ;;  %v7052_v32 = vld [vmem:[%s9139_s22 + $0x20] sm:$0xff]  }
0x120e   : > { %6802 = vmatpush3.bf16.msra.mxu1 %v7050_v60  ;;  %v7053_v33 = vld [vmem:[%s9139_s22 + $0x28] sm:$0xff]  }
0x120f   : > { %v5160_v45 = vrot.slane %v5146_v35, %v8007_v3  ;;  %v5176_v48 = vrot.slane %v5162_v36, %v8007_v3  ;;  %v5153_v0 = vrot.slane %v5145_v39, %v8007_v3  ;;  %v5169_v26 = vrot.slane %v5161_v58, %v8007_v3  ;;  %6803 = vmatprep.subr.bf16.mxu1 %v7494_v15 }
0x1211   : > { %v5179_v59 = vcombine.low %v5160_v45, %v5176_v48  ;;  %v5178_v61 = vcombine.high %v5153_v0, %v5169_v26  ;;  %v5177_v7 = vcombine.low %v5153_v0, %v5169_v26  ;;  %v5180_v52 = vcombine.high %v5160_v45, %v5176_v48 }
0x1212   : > { %6804 = vmatpush3.bf16.msra.mxu1 %v7051_v19  ;;  %v5306_v0 = vrot.slane %v8860_v50, %v8391_v16 }
0x1213   : > { %v7026_v42 = vpack.i.bf16 %v5179_v59, %v5111_v49  ;;  %v7021_v53 = vpack.i.bf16 %v5178_v61, %v5110_v54  ;;  %v7031_v51 = vpack.i.bf16 %v5180_v52, %v5112_v38  ;;  %6821 = vmatprep.subr.bf16.mxu1 %v7494_v15  ;;  %v5312_v52 = vrot.slane %v8860_v50, %v8396_v34 }
0x1215   : > { %7027 = vrot.lane.b32.xlu1 %v7026_v42, %s9141_s25  ;;  %7022 = vrot.lane.b32.xlu0 %v7021_v53, %s9142_s16  ;;  %s7506_s25 = smov 32   ;;  %s9145_s16 = sld [smem:[#allocation33_spill]] }
0x1219   : > { %7032 = vrot.lane.b32.xlu1 %v7031_v51, %s9143_s5 }
0x1287   : > { %v7028_v55 = vpop.permute.xlu1 %7027  ;;  %v7023_v62 = vpop.permute.xlu0 %7022 }
0x1288   : > { %v7025_v2 = vunpack.i.h.bf16 %v7023_v62  ;;  %v7024_v3 = vunpack.i.l.bf16 %v7023_v62  ;;  %v7030_v10 = vunpack.i.h.bf16 %v7028_v55  ;;  %v7029_v11 = vunpack.i.l.bf16 %v7028_v55  ;;  %v7054_v62 = vld [vmem:[%s9139_s22 + $0x30] sm:$0xff]  }
0x128a   : > { %v5205_v12 = vsel %vm1650_vm2, %v5109_v14, %v7024_v3  ;;  %v5206_v49 = vsel %vm1650_vm2, %v5177_v7, %v7025_v2  ;;  %v7055_v2 = vld [vmem:[%s9139_s22 + $0x38] sm:$0xff]   ;;  %v6401_v3 = vld [vmem:[#allocation8 + $0x1] ss:$0 sm:$0xff] }
0x128b   : > { %v7033_v54 = vpop.permute.xlu1 %7032  ;;  %v5207_v22 = vsel %vm2790_vm4, %v5205_v12, %v7029_v11  ;;  %v5208_v56 = vsel %vm2790_vm4, %v5206_v49, %v7030_v10 }
0x128c   : > { %v7035_v38 = vunpack.i.h.bf16 %v7033_v54  ;;  %v7034_v13 = vunpack.i.l.bf16 %v7033_v54 }
0x128e   : > { %v5209_v5 = vsel %vm2793_vm5, %v5207_v22, %v7034_v13  ;;  %v5210_v6 = vsel %vm2793_vm5, %v5208_v56, %v7035_v38 }
0x128f   : > { %v5211_v37 = vpack.c.bf16 %v5210_v6, %v5209_v5  ;;  %v5400_v5 = vrot.slane %v8860_v50, %v8415_v41 }
0x1291   : > { %6798 = vmatmul.mubr.msk.bf16.vlgmr.msra.gmra.mrb[76].mxu0 %vm634_vm0, %v5211_v37 }
0x1292   : > { %6817 = vmatprep.mubr.msk.bf16.mxu0 %vm7495_vm1, %v7494_v15  ;;  %6810 = vmatpush3.bf16.msra.mxu0 %v7052_v32 }
0x1293   : > { %6811 = vmatprep.subr.bf16.mxu0 %v7494_v15 }
0x1296   : > { %6812 = vmatpush3.bf16.msra.mxu0 %v7053_v33 }
0x1297   : > { %6813 = vmatprep.subr.bf16.mxu0 %v7494_v15 }
0x129a   : > { %6814 = vmatpush3.bf16.msra.mxu0 %v7054_v62 }
0x129b   : > { %6815 = vmatprep.subr.bf16.mxu0 %v7494_v15 }
0x129e   : > { %6816 = vmatpush3.bf16.msra.mxu0 %v7055_v2 }
0x129f   : > { %6837 = vmatprep.subr.bf16.mxu0 %v7494_v15 }
0x1364   : > { %v5270_v14 = vpop.f32.mrb[76].mxu0 }
0x1365   : > { %v5271_v21 = vadd.f32 %v5270_v14, %v5220_v20  ;;  %v6799_v28 = vpop.f32.mrb[77].mxu0 }
0x1366   : > { %v5273_v29 = vpop.f32.mrb[78].mxu0 }
0x1367   : > { %v5274_v1 = vadd.f32 %v5273_v29, %v5220_v20  ;;  %v6800_v27 = vpop.f32.mrb[79].mxu0  ;;  %v5277_v8 = vsel %vm634_vm0, %v5271_v21, 0.0 }
0x1368   : > { %5278 = vadd.xlane.f32.xlu0 %v5277_v8 }
0x1369   : > { %v5280_v4 = vsel %vm634_vm0, %v5274_v1, 0.0 }
0x136a   : > { %5281 = vadd.xlane.f32.xlu1 %v5280_v4 }
0x13f5   : > { %v5279_v9 = vpop.xlane.xlu0 %5278 }
0x13f6   : > { %v5283_v31 = vmul.f32 0.03125, %v5279_v9 }
0x13f7   : > { %v5282_v43 = vpop.xlane.xlu1 %5281 }
0x13f8   : > { %v5285_v44 = vsub.f32 %v5271_v21, %v5283_v31  ;;  %v5284_v47 = vmul.f32 0.03125, %v5282_v43 }
0x13fa   : > { %v5286_v46 = vsub.f32 %v5274_v1, %v5284_v47  ;;  %v5287_v18 = vmul.f32 %v5285_v44, %v5285_v44 }
0x13fc   : > { %v5289_v63 = vsel %vm634_vm0, %v5287_v18, 0.0  ;;  %v5288_v23 = vmul.f32 %v5286_v46, %v5286_v46  ;;  %v7056_v18 = vld [vmem:[#allocation10] sm:$0xff]  }
0x13fd   : > { %5290 = vadd.xlane.f32.xlu0 %v5289_v63  ;;  %v7057_v63 = vld [vmem:[#allocation10 + $0x8] sm:$0xff]  }
0x13fe   : > { %v5292_v57 = vsel %vm634_vm0, %v5288_v23, 0.0 }
0x1401   : > { %5293 = vadd.xlane.f32.xlu0 %v5292_v57 }
0x148a   : > { %v5291_v35 = vpop.xlane.xlu0 %5290 }
0x148b   : > { %v5295_v36 = vmul.f32 0.03125, %v5291_v35  ;;  %v8913_v35 = vld [vmem:[%s9144_s3] sm:$0xff] }
0x148d   : > { %v5297_v39 = vadd.f32 1e-05, %v5295_v36  ;;  %v5487_v36 = vrot.slane %v8913_v35, %v7934_v25  ;;  %v7059_v25 = vld [vmem:[#allocation13 + $0x8] sm:$0xff]  }
0x148e   : > { %v5294_v58 = vpop.xlane.xlu0 %5293 }
0x148f   : > { %7140 = vrsqrt.f32 %v5297_v39  ;;  %v5296_v40 = vmul.f32 0.03125, %v5294_v58 }
0x1491   : > { %v5298_v45 = vadd.f32 1e-05, %v5296_v40  ;;  %v5492_v40 = vrot.slane %v8913_v35, %v7941_v30 }
0x1493   : > { %7142 = vrsqrt.f32 %v5298_v45 }
0x1499   : > { %v7141_v48 = vpop.eup %7140 }
0x149a   : > { %v5301_v26 = vmul.f32 %v7141_v48, %v5285_v44 }
0x149c   : > { %v5307_v61 = vmul.f32 %v5306_v0, %v5301_v26  ;;  %v5510_v26 = vrot.slane %v8913_v35, %v8391_v16  ;;  %v6418_v16 = vld [vmem:[#allocation11] ss:$0 sm:$0xff] }
0x149d   : > { %v7143_v59 = vpop.eup %7142 }
0x149e   : > { %v5302_v7 = vmul.f32 %v7143_v59, %v5286_v46  ;;  %v5313_v53 = vadd.f32 %v5312_v52, %v5307_v61  ;;  %v7058_v61 = vld [vmem:[#allocation13] sm:$0xff]  }
0x14a0   : > { %v5308_v42 = vmul.f32 %v5306_v0, %v5302_v7 }
0x14a2   : > { %v5314_v51 = vadd.f32 %v5312_v52, %v5308_v42  ;;  %v5515_v42 = vrot.slane %v8913_v35, %v8396_v34 }
0x14a4   : > { %v5315_v55 = vpack.c.bf16 %v5314_v51, %v5313_v53 }
0x14a6   : > { %6806 = vmatmul.mubr.msk.bf16.vlgmr.msra.gmra.mrb[72].mxu1 %vm634_vm0, %v5315_v55 }
0x14a7   : > { %6825 = vmatprep.mubr.msk.bf16.mxu1 %vm7495_vm1, %v7494_v15  ;;  %6822 = vmatpush3.bf16.msra.mxu1 %v7056_v18 }
0x14a8   : > { %6823 = vmatprep.subr.bf16.mxu1 %v7494_v15 }
0x14ab   : > { %6824 = vmatpush3.bf16.msra.mxu1 %v7057_v63 }
0x14ac   : > { %6829 = vmatprep.subr.bf16.mxu1 %v7494_v15 }
0x1579   : > { %v5378_v10 = vpop.f32.mrb[72].mxu1 }
0x157a   : > { %v5379_v11 = vadd.f32 %v6401_v3, %v5378_v10  ;;  %v6807_v12 = vpop.f32.mrb[73].mxu1 }
0x157b   : > { %v5381_v49 = vpop.f32.mrb[74].mxu1 }
0x157c   : > { %v5382_v54 = vadd.f32 %v6401_v3, %v5381_v49  ;;  %v6808_v38 = vpop.f32.mrb[75].mxu1  ;;  %v5385_v13 = vmax.f32 %v5379_v11, 0.0  ;;  %v6422_v3 = vld [vmem:[#allocation14] ss:$0 sm:$0xff] }
0x157e   : > { %v5386_v22 = vmax.f32 %v5382_v54, 0.0 }
0x1580   : > { %v5387_v56 = vpack.c.bf16 %v5386_v22, %v5385_v13 }
0x1582   : > { %6818 = vmatmul.mubr.msk.bf16.vlgmr.msra.gmra.mrb[80].mxu0 %vm3006_vm6, %v5387_v56 }
0x1583   : > { %6839 = vmatprep.mubr.msk.bf16.mxu0 %vm7495_vm1, %v7494_v15 }
0x1655   : > { %v5462_v6 = vpop.f32.mrb[80].mxu0 }
0x1656   : > { %v5463_v37 = vadd.f32 %v5462_v6, %v5400_v5  ;;  %v6819_v20 = vpop.f32.mrb[81].mxu0 }
0x1657   : > { %v5465_v14 = vpop.f32.mrb[82].mxu0 }
0x1658   : > { %v5466_v21 = vadd.f32 %v5465_v14, %v5400_v5  ;;  %v6820_v28 = vpop.f32.mrb[83].mxu0  ;;  %v5471_v29 = vsel %vm634_vm0, %v5463_v37, 0.0 }
0x1659   : > { %5472 = vadd.xlane.f32.xlu0 %v5471_v29 }
0x165a   : > { %v5494_v1 = vsel %vm634_vm0, %v5466_v21, 0.0 }
0x165b   : > { %5495 = vadd.xlane.f32.xlu1 %v5494_v1 }
0x16e6   : > { %v5473_v27 = vpop.xlane.xlu0 %5472 }
0x16e7   : > { %v5474_v8 = vmul.f32 0.03125, %v5473_v27 }
0x16e8   : > { %v5496_v4 = vpop.xlane.xlu1 %5495 }
0x16e9   : > { %v5475_v9 = vsub.f32 %v5463_v37, %v5474_v8  ;;  %v5497_v31 = vmul.f32 0.03125, %v5496_v4 }
0x16eb   : > { %v5498_v43 = vsub.f32 %v5466_v21, %v5497_v31  ;;  %v5476_v44 = vmul.f32 %v5475_v9, %v5475_v9 }
0x16ed   : > { %v5477_v50 = vsel %vm634_vm0, %v5476_v44, 0.0  ;;  %v5499_v47 = vmul.f32 %v5498_v43, %v5498_v43 }
0x16ee   : > { %5478 = vadd.xlane.f32.xlu0 %v5477_v50  ;;  %v5667_v50 = vrot.slane %v8913_v35, %v8361_v17 }
0x16ef   : > { %v5500_v46 = vsel %vm634_vm0, %v5499_v47, 0.0  ;;  %v5672_v47 = vrot.slane %v8913_v35, %v8415_v41 }
0x16f0   : > { %5501 = vadd.xlane.f32.xlu1 %v5500_v46  ;;  %v5720_v46 = vsub.s32 6, %v7931_v24 }
0x16f2   : > { %v5721_v18 = vrot.slane %v8913_v35, %v5720_v46 }
0x177b   : > { %v5479_v23 = vpop.xlane.xlu0 %5478 }
0x177c   : > { %v5480_v57 = vmul.f32 0.03125, %v5479_v23 }
0x177d   : > { %v5502_v60 = vpop.xlane.xlu1 %5501 }
0x177e   : > { %v5481_v19 = vadd.f32 1e-05, %v5480_v57  ;;  %v5503_v32 = vmul.f32 0.03125, %v5502_v60 }
0x1780   : > { %7144 = vrsqrt.f32 %v5481_v19  ;;  %v5504_v33 = vadd.f32 1e-05, %v5503_v32 }
0x1782   : > { %7146 = vrsqrt.f32 %v5504_v33 }
0x178a   : > { %v7145_v39 = vpop.eup %7144 }
0x178b   : > { %v5483_v58 = vmul.f32 %v7145_v39, %v5475_v9 }
0x178c   : > { %v7147_v45 = vpop.eup %7146 }
0x178d   : > { %v5506_v48 = vmul.f32 %v7147_v45, %v5498_v43  ;;  %v5488_v0 = vmul.f32 %v5487_v36, %v5483_v58  ;;  %v5725_v43 = vsub.s32 7, %v7931_v24 }
0x178f   : > { %v5493_v59 = vadd.f32 %v5492_v40, %v5488_v0  ;;  %v5511_v52 = vmul.f32 %v5510_v26, %v5506_v48  ;;  %v8953_v44 = vrot.slane %v8913_v35, %v5725_v43 }
0x1791   : > { %v5517_v7 = vpack.c.bf16 %v5493_v59, %v5493_v59  ;;  %v5516_v30 = vadd.f32 %v5515_v42, %v5511_v52 }
0x1793   : > { %6826 = vmatmul.mubr.msk.bf16.vlgmr.msra.gmra.mrb[76].mxu1 %vm634_vm0, %v5517_v7  ;;  %v5584_v53 = vpack.c.bf16 %v5516_v30, %v5516_v30 }
0x1794   : > { %6830 = vmatpush3.bf16.msra.mxu1 %v7058_v61  ;;  %6833 = vmatprep.mubr.msk.bf16.mxu1 %vm7495_vm1, %v7494_v15 }
0x1795   : > { %6831 = vmatprep.subr.bf16.mxu1 %v7494_v15 }
0x1798   : > { %6832 = vmatpush3.bf16.msra.mxu1 %v7059_v25 }
0x1799   : > { %6843 = vmatprep.subr.bf16.mxu1 %v7494_v15 }
0x179b   : > { %6834 = vmatmul.mubr.msk.bf16.vlgmr.msra.gmra.mrb[80].mxu1 %vm634_vm0, %v5584_v53 }
0x179c   : > { %6845 = vmatprep.mubr.msk.bf16.mxu1 %vm7495_vm1, %v7494_v15 }
0x1866   : > { %v5578_v34 = vpop.f32.mrb[76].mxu1 }
0x1867   : > { %v8931_v51 = vadd.f32 %v6418_v16, %v5578_v34  ;;  %v6827_v55 = vpop.f32.mrb[77].mxu1 }
0x1868   : > { %v5581_v62 = vpop.f32.mrb[78].mxu1 }
0x1869   : > { %v6828_v2 = vpop.f32.mrb[79].mxu1  ;;  %5675 = vrot.lane.b32.xlu1 %v8931_v51, %s7499_s28  ;;  %v5651_v1 = vsel %vm634_vm0, %v8931_v51, 0.0 }
0x186e   : > { %v5645_v10 = vpop.f32.mrb[80].mxu1 }
0x186f   : > { %v8935_v11 = vadd.f32 %v6422_v3, %v5645_v10  ;;  %v6835_v12 = vpop.f32.mrb[81].mxu1 }
0x1870   : > { %v5648_v49 = vpop.f32.mrb[82].mxu1 }
0x1871   : > { %5729 = vrot.lane.b32.xlu0 %v8935_v11, %s7499_s28  ;;  %v6836_v54 = vpop.f32.mrb[83].mxu1  ;;  %v5705_v27 = vsel %vm634_vm0, %v8935_v11, 0.0 }
0x18db   : > { %v5676_v38 = vpop.permute.xlu1 %5675 }
0x18dc   : > { %v5678_v13 = vsel %vm634_vm0, %v5676_v38, 0.0 }
0x18dd   : > { %5679 = vadd.xlane.f32.xlu0 %v5678_v13 }
0x18e3   : > { %v5730_v22 = vpop.permute.xlu0 %5729 }
0x18e4   : > { %v5732_v56 = vsel %vm634_vm0, %v5730_v22, 0.0 }
0x18e5   : > { %5733 = vadd.xlane.f32.xlu1 %v5732_v56 }
0x196a   : > { %v5680_v5 = vpop.xlane.xlu0 %5679 }
0x196b   : > { %v5681_v6 = vmul.f32 0.03125, %v5680_v5 }
0x196d   : > { %v5682_v37 = vsub.f32 %v8931_v51, %v5681_v6 }
0x196f   : > { %v5683_v20 = vmul.f32 %v5682_v37, %v5682_v37 }
0x1971   : > { %5685 = vrot.lane.b32.xlu1 %v5683_v20, %s7499_s28 }
0x1972   : > { %v5734_v14 = vpop.xlane.xlu1 %5733 }
0x1973   : > { %v5735_v21 = vmul.f32 0.03125, %v5734_v14 }
0x1975   : > { %v5736_v28 = vsub.f32 %v8935_v11, %v5735_v21 }
0x1977   : > { %v5737_v29 = vmul.f32 %v5736_v28, %v5736_v28 }
0x1979   : > { %5739 = vrot.lane.b32.xlu0 %v5737_v29, %s7499_s28 }
0x1995   : > { %5652 = vadd.xlane.f32.xlu1 %v5651_v1 }
0x1998   : > { %5706 = vadd.xlane.f32.xlu0 %v5705_v27 }
0x19e3   : > { %v5686_v8 = vpop.permute.xlu1 %5685 }
0x19e4   : > { %v5688_v4 = vsel %vm634_vm0, %v5686_v8, 0.0 }
0x19e5   : > { %5689 = vadd.xlane.f32.xlu1 %v5688_v4 }
0x19eb   : > { %v5740_v9 = vpop.permute.xlu0 %5739 }
0x19ec   : > { %v5742_v31 = vsel %vm634_vm0, %v5740_v9, 0.0 }
0x19ed   : > { %5743 = vadd.xlane.f32.xlu0 %v5742_v31 }
0x19f6   : > { %5755 = vrot.lane.b32.xlu1 %v8953_v44, %s7506_s25 }
0x19fa   : > { %5696 = vrot.lane.b32.xlu1 %v5667_v50, %s7506_s25 }
0x19fe   : > { %5701 = vrot.lane.b32.xlu1 %v5672_v47, %s7506_s25 }
0x1a03   : > { %5750 = vrot.lane.b32.xlu0 %v5721_v18, %s7506_s25  ;;  %s7400_s25 = scalar_lea.vmem %s7399_s29, 256 }
0x1a22   : > { %v5653_v63 = vpop.xlane.xlu1 %5652 }
0x1a23   : > { %v5654_v23 = vmul.f32 0.03125, %v5653_v63 }
0x1a25   : > { %v5655_v57 = vsub.f32 %v8931_v51, %v5654_v23  ;;  %v5707_v60 = vpop.xlane.xlu0 %5706  ;;  %v5937_v23 = vpack.c.bf16 %v8931_v51, %v8931_v51  ;;  %v5823_v51 = vpack.c.bf16 %v8935_v11, %v8935_v11 }
0x1a26   : > { %v5708_v19 = vmul.f32 0.03125, %v5707_v60 }
0x1a27   : > { %v5656_v32 = vmul.f32 %v5655_v57, %v5655_v57 }
0x1a28   : > { %v5709_v33 = vsub.f32 %v8935_v11, %v5708_v19 }
0x1a29   : > { %v5657_v17 = vsel %vm634_vm0, %v5656_v32, 0.0 }
0x1a2a   : > { %5658 = vadd.xlane.f32.xlu0 %v5657_v17  ;;  %v5710_v36 = vmul.f32 %v5709_v33, %v5709_v33 }
0x1a2c   : > { %v5711_v41 = vsel %vm634_vm0, %v5710_v36, 0.0 }
0x1a2d   : > { %5712 = vadd.xlane.f32.xlu1 %v5711_v41 }
0x1a72   : > { %v5690_v24 = vpop.xlane.xlu1 %5689 }
0x1a73   : > { %v5691_v39 = vmul.f32 0.03125, %v5690_v24 }
0x1a75   : > { %v5692_v35 = vadd.f32 1e-05, %v5691_v39 }
0x1a76   : > { %v5756_v58 = vpop.permute.xlu1 %5755 }
0x1a77   : > { %7148 = vrsqrt.f32 %v5692_v35 }
0x1a7a   : > { %v5744_v40 = vpop.xlane.xlu0 %5743  ;;  %v5697_v0 = vpop.permute.xlu1 %5696 }
0x1a7b   : > { %v5745_v45 = vmul.f32 0.03125, %v5744_v40 }
0x1a7d   : > { %v5746_v48 = vadd.f32 1e-05, %v5745_v45 }
0x1a7e   : > { %v5702_v61 = vpop.permute.xlu1 %5701  ;;  %v5751_v30 = vpop.permute.xlu0 %5750 }
0x1a7f   : > { %7150 = vrsqrt.f32 %v5746_v48 }
0x1a81   : > { %v7149_v26 = vpop.eup %7148 }
0x1a82   : > { %v5694_v59 = vmul.f32 %v7149_v26, %v5682_v37 }
0x1a84   : > { %v5699_v7 = vmul.f32 %v5697_v0, %v5694_v59 }
0x1a86   : > { %v5704_v52 = vadd.f32 %v5702_v61, %v5699_v7 }
0x1a88   : > { %v5874_v42 = vpack.c.bf16 %v5704_v52, %v5704_v52 }
0x1a89   : > { %v7151_v25 = vpop.eup %7150 }
0x1a8a   : > { %5876 = vrot.lane.b32.xlu1 %v5874_v42, %s7499_s28  ;;  %v5748_v53 = vmul.f32 %v7151_v25, %v5736_v28  ;;  %v7060_v42 = vld [vmem:[%s9145_s16] sm:$0xff]   ;;  %v7061_v25 = vld [vmem:[%s9145_s16 + $0x8] sm:$0xff]  }
0x1a8c   : > { %v5753_v16 = vmul.f32 %v5751_v30, %v5748_v53  ;;  %v7062_v30 = vld [vmem:[%s9145_s16 + $0x10] sm:$0xff]   ;;  %v7063_v53 = vld [vmem:[%s9145_s16 + $0x18] sm:$0xff]  }
0x1a8e   : > { %v5758_v34 = vadd.f32 %v5756_v58, %v5753_v16 }
0x1a90   : > { %v5760_v55 = vpack.c.bf16 %v5758_v34, %v5758_v34 }
0x1a92   : > { %5762 = vrot.lane.b32.xlu0 %v5760_v55, %s7499_s28  ;;  %s6442_s28 = sshll.u32 %s7609_s24, 7  ;;  %s6115_s24 = scalar_lea.sflag [#allocation4], %s7880_s15 }
0x1a93   : > { %s9023_s14 = scalar_lea.hbm %s9146_s10, %s6442_s28 }
0x1ab7   : > { %v5659_v62 = vpop.xlane.xlu0 %5658 }
0x1ab8   : > { %v5660_v2 = vmul.f32 0.03125, %v5659_v62 }
0x1aba   : > { %v5661_v3 = vadd.f32 1e-05, %v5660_v2  ;;  %v5713_v10 = vpop.xlane.xlu1 %5712 }
0x1abb   : > { %v5714_v12 = vmul.f32 0.03125, %v5713_v10 }
0x1abc   : > { %7152 = vrsqrt.f32 %v5661_v3 }
0x1abd   : > { %v5715_v49 = vadd.f32 1e-05, %v5714_v12 }
0x1abf   : > { %7154 = vrsqrt.f32 %v5715_v49 }
0x1ac6   : > { %v7153_v54 = vpop.eup %7152 }
0x1ac7   : > { %v5663_v38 = vmul.f32 %v7153_v54, %v5655_v57 }
0x1ac9   : > { %v5668_v13 = vmul.f32 %v5667_v50, %v5663_v38  ;;  %v7155_v22 = vpop.eup %7154 }
0x1aca   : > { %v5717_v6 = vmul.f32 %v7155_v22, %v5709_v33 }
0x1acb   : > { %v5673_v37 = vadd.f32 %v5672_v47, %v5668_v13 }
0x1acc   : > { %v5722_v21 = vmul.f32 %v5721_v18, %v5717_v6 }
0x1acd   : > { %v5759_v14 = vpack.c.bf16 %v5673_v37, %v5673_v37 }
0x1ace   : > { %v5727_v29 = vadd.f32 %v8953_v44, %v5722_v21 }
0x1ad0   : > { %v5873_v1 = vpack.c.bf16 %v5727_v29, %v5727_v29 }
0x1afc   : > { %v5877_v20 = vpop.permute.xlu1 %5876 }
0x1afd   : > { %v5882_v28 = vsel %vm634_vm0, %v5877_v20, 0 }
0x1b04   : > { %v5763_v56 = vpop.permute.xlu0 %5762 }
0x1b05   : > { %v5768_v5 = vsel %vm634_vm0, %v5763_v56, 0  ;;  %v6440_v56 = vld [vmem:[%s9144_s3 + $0x8] ss:$0 sm:$0xff] }
0x1b06   : > { %6838 = vmatpush3.bf16.xpose.msra.mxu0 %v5768_v5 }
0x1b07   : > { %6849 = vmatprep.subr.bf16.mxu0 %v7494_v15 }
0x1b0d   : > { %6840 = vmatmul.mubr.msk.bf16.vlgmr.msra.gmra.mrb[84].mxu0 %vm634_vm0, %v5759_v14 }
0x1b0e   : > { %6850 = vmatpush3.bf16.xpose.msra.mxu0 %v5882_v28  ;;  %6851 = vmatprep.mubr.msk.bf16.mxu0 %vm7495_vm1, %v7494_v15 }
0x1b0f   : > { %6861 = vmatprep.subr.bf16.mxu0 %v7494_v15 }
0x1b15   : > { %6852 = vmatmul.mubr.msk.bf16.vlgmr.msra.gmra.mrb[88].mxu0 %vm634_vm0, %v5873_v1 }
0x1b16   : > { %6865 = vmatprep.mubr.msk.bf16.mxu0 %vm7495_vm1, %v7494_v15  ;;  %6862 = vmatpush3.bf16.msra.mxu0 %v7062_v30 }
0x1b17   : > { %6863 = vmatprep.subr.bf16.mxu0 %v7494_v15 }
0x1b1a   : > { %6864 = vmatpush3.bf16.msra.mxu0 %v7063_v53 }
0x1be0   : > { %v5804_v27 = vpop.f32.mrb[84].mxu0 }
0x1be1   : > { %v5810_v8 = vmul.f32 0.17677669, %v5804_v27  ;;  %v6841_v4 = vpop.f32.mrb[85].mxu0 }
0x1be2   : > { %v5807_v9 = vpop.f32.mrb[86].mxu0 }
0x1be3   : > { %v6842_v31 = vpop.f32.mrb[87].mxu0  ;;  %v5811_v43 = vsel %vm1650_vm2, %v5810_v8, -inf }
0x1be4   : > { %5812 = vmax.xlane.f32.xlu0 %v5811_v43 }
0x1be8   : > { %v5918_v50 = vpop.f32.mrb[88].mxu0 }
0x1be9   : > { %v5924_v47 = vmul.f32 0.17677669, %v5918_v50  ;;  %v6853_v46 = vpop.f32.mrb[89].mxu0 }
0x1bea   : > { %v5921_v44 = vpop.f32.mrb[90].mxu0 }
0x1beb   : > { %v6854_v18 = vpop.f32.mrb[91].mxu0  ;;  %v5925_v63 = vsel %vm1650_vm2, %v5924_v47, -inf }
0x1bec   : > { %5926 = vmax.xlane.f32.xlu1 %v5925_v63 }
0x1bfd   : > { %5939 = vrot.lane.b32.xlu1 %v5937_v23, %s9140_s6 }
0x1c71   : > { %v5813_v57 = vpop.xlane.xlu0 %5812 }
0x1c72   : > { %v5814_v60 = vsub.f32 %v5810_v8, %v5813_v57 }
0x1c74   : > { %v5815_v19 = vmul.f32 1.442695, %v5814_v60 }
0x1c76   : > { %7156 = vpow2.f32 %v5815_v19 }
0x1c79   : > { %v5927_v32 = vpop.xlane.xlu1 %5926 }
0x1c7a   : > { %v5928_v33 = vsub.f32 %v5924_v47, %v5927_v32 }
0x1c7c   : > { %v5929_v17 = vmul.f32 1.442695, %v5928_v33 }
0x1c7d   : > { %v5940_v26 = vpop.permute.xlu1 %5939 }
0x1c7e   : > { %7158 = vpow2.f32 %v5929_v17  ;;  %v5945_v61 = vsel %vm2126_vm3, %v5940_v26, 0 }
0x1c80   : > { %v7157_v36 = vpop.eup %7156 }
0x1c81   : > { %v5817_v41 = vsel %vm1650_vm2, %v7157_v36, 0.0 }
0x1c82   : > { %5818 = vadd.xlane.f32.xlu0 %v5817_v41 }
0x1c88   : > { %v7159_v24 = vpop.eup %7158 }
0x1c89   : > { %v5931_v39 = vsel %vm1650_vm2, %v7159_v24, 0.0 }
0x1c8a   : > { %5932 = vadd.xlane.f32.xlu0 %v5931_v39 }
0x1ca0   : > { %5825 = vrot.lane.b32.xlu0 %v5823_v51, %s9140_s6  ;;  %s629_s6 = scalar_lea.vmem [#allocation16], %s7883_s9 }
0x1ca1   : > { %s6128_s5 = sshll.u32 %s629_s6, 4  ;;  %s9025_s5 = int_to_ptr.vmem [resolvable:$true] %s6128_s5 }
0x1ca2   : > { %s7394_s9 = scalar_lea.vmem %s9025_s5, 128  ;;  %p7401_p3 = scmp.lt.s32.totalorder %s9025_s5, %s7399_s29 }
0x1ca3   : > { %p7395_p4 = scmp.ne.s32.totalorder %s9025_s5, %s7394_s9  ;;  %p7402_p6 = scmp.lt.s32.totalorder %s7400_s25, %s7394_s9 }
0x1ca5   : > { %p7396_p5 = pnand %p7395_p4, %p9147_p10  ;;  %p7403_p11 = por %p7402_p6, %p7401_p3 }
0x1ca7   : > { %p7397_p7 = pneg %p7396_p5 }
0x1ca9   : > { %p7404_p8 = pnand %p7403_p11, %p7397_p7 }
0x1d0f   : > { %v5819_v35 = vpop.xlane.xlu0 %5818 }
0x1d10   : > { %7160 = vrcp.f32 %v5819_v35 }
0x1d17   : > { %v5933_v58 = vpop.xlane.xlu0 %5932 }
0x1d18   : > { %7162 = vrcp.f32 %v5933_v58 }
0x1d1a   : > { %v7161_v40 = vpop.eup %7160 }
0x1d1b   : > { %v5821_v45 = vmul.f32 %v7161_v40, %v7157_v36  ;;  %v5826_v48 = vpop.permute.xlu0 %5825 }
0x1d1c   : > { %v5831_v0 = vsel %vm2126_vm3, %v5826_v48, 0 }
0x1d1d   : > { %6844 = vmatpush3.bf16.msra.mxu1 %v5831_v0  ;;  %v5822_v59 = vpack.c.bf16 %v5821_v45, %v5821_v45 }
0x1d1e   : > { %6855 = vmatprep.subr.bf16.mxu1 %v7494_v15 }
0x1d20   : > { %6846 = vmatmul.mubr.msk.bf16.vlgmr.msra.gmra.mrb[84].mxu1 %vm1650_vm2, %v5822_v59 }
0x1d21   : > { %6856 = vmatpush3.bf16.msra.mxu1 %v5945_v61  ;;  %6857 = vmatprep.mubr.msk.bf16.mxu1 %vm7495_vm1, %v7494_v15 }
0x1d22   : > { %v7163_v11 = vpop.eup %7162  ;;  %6869 = vmatprep.subr.bf16.mxu1 %v7494_v15 }
0x1d23   : > { %v5935_v7 = vmul.f32 %v7163_v11, %v7159_v24 }
0x1d25   : > { %v5936_v52 = vpack.c.bf16 %v5935_v7, %v5935_v7 }
0x1d28   : > { %6858 = vmatmul.mubr.msk.bf16.vlgmr.msra.gmra.mrb[88].mxu1 %vm1650_vm2, %v5936_v52 }
0x1d29   : > { %6870 = vmatpush3.bf16.msra.mxu1 %v7060_v42  ;;  %6873 = vmatprep.mubr.msk.bf16.mxu1 %vm7495_vm1, %v7494_v15 }
0x1d2a   : > { %6871 = vmatprep.subr.bf16.mxu1 %v7494_v15 }
0x1d2d   : > { %6872 = vmatpush3.bf16.msra.mxu1 %v7061_v25 }
0x1df3   : > { %v5867_v16 = vpop.f32.mrb[84].mxu1 }
0x1df4   : > { %v5987_v34 = vpack.c.bf16 %v5867_v16, %v5867_v16  ;;  %v6847_v55 = vpop.f32.mrb[85].mxu1 }
0x1df5   : > { %v5870_v62 = vpop.f32.mrb[86].mxu1 }
0x1df6   : > { %v6848_v2 = vpop.f32.mrb[87].mxu1  ;;  %6874 = vmatmul.mubr.msk.bf16.vlgmr.msra.gmra.mrb[92].mxu1 %vm634_vm0, %v5987_v34 }
0x1dfb   : > { %v5981_v3 = vpop.f32.mrb[88].mxu1 }
0x1dfc   : > { %v5992_v10 = vpack.c.bf16 %v5981_v3, %v5981_v3  ;;  %v6859_v12 = vpop.f32.mrb[89].mxu1 }
0x1dfd   : > { %v5984_v49 = vpop.f32.mrb[90].mxu1 }
0x1dfe   : > { %v6860_v54 = vpop.f32.mrb[91].mxu1  ;;  %6866 = vmatmul.mubr.msk.bf16.vlgmr.msra.gmra.mrb[92].mxu0 %vm634_vm0, %v5992_v10 }
0x1ec9   : > { %v6102_v15 = vpop.f32.mrb[92].mxu1 }
0x1eca   : > { %v6875_v38 = vpop.f32.mrb[93].mxu1 }
0x1ecb   : > { %v6105_v13 = vpop.f32.mrb[94].mxu1 }
0x1ecc   : > { %v6876_v22 = vpop.f32.mrb[95].mxu1 }
0x1ed1   : > { %v6047_v5 = vpop.f32.mrb[92].mxu0 }
0x1ed2   : > { %v6103_v6 = vadd.f32 %v6102_v15, %v6047_v5  ;;  %v6867_v37 = vpop.f32.mrb[93].mxu0 }
0x1ed3   : > { %v6050_v20 = vpop.f32.mrb[94].mxu0 }
0x1ed4   : > { %v6112_v14 = vadd.f32 %v6440_v56, %v6103_v6  ;;  %v6868_v21 = vpop.f32.mrb[95].mxu0 }
0x1ed6   : > { %6113 = vst.msk [vmem:[%s629_s6] sm:$0xff] %vm634_vm0, %v6112_v14 }
0x1ed7   : > { %7407 = shalt.err (!%p7404_p8)
}
0x1ed8   : > { %s7408_s15 = scalar_lea.hbm %s9023_s14, 128  ;;  %s7412_s8 = scalar_lea.hbm %s9146_s10, 256 }
0x1ed9   : > { %p7409_p9 = scmp.ne.s32.totalorder %s9023_s14, %s7408_s15  ;;  %p7413_p13 = scmp.lt.u32.totalorder %s9023_s14, %s9146_s10 }
0x1eda   : > { %p7414_p0 = scmp.lt.u32.totalorder %s7412_s8, %s7408_s15  ;;  %p7416_p4 = scmp.lt.u32.totalorder %s7408_s15, %s9023_s14 }
0x1edb   : > { %p7410_p12 = pnand %p7409_p9, %p9147_p10 }
0x1edc   : > { %p7415_p2 = por %p7414_p0, %p7413_p13 }
0x1edd   : > { %p7411_p1 = pneg %p7410_p12 }
0x1ede   : > { %p7417_p5 = por %p7416_p4, %p7415_p2 }
0x1ee0   : > { %p7418_p7 = pnand %p7417_p5, %p7411_p1 }
0x1ee2   : > { %7421 = shalt.err (!%p7418_p7)
}
0x1ee3   : > { %6905 = dma.vmem_to_hbm [thread:$0]  (%p9147_p10), %s9025_s5, 128, %s9023_s14, %s6115_s24  }
0x1ee4 PF: > { %s6140_s9 = sand.u32 1, %s7468_s18   ;;  %p9148_p3 = scmp.ne.s32.totalorder %s9124_s30, 0 }
0x1ee5   : > { %p9149_p6 = scmp.ge.s32.totalorder %s7480_s21, 2  ;;  %s6141_s29 = scalar_lea.sflag [#allocation4], %s6140_s9 }
0x1ee7   : > { %p6934_p11 = pnand %p9149_p6, %p9148_p3 }
0x1ee9   : > { %7463 = dma.done.wait (!%p6934_p11), %s6141_s29, 128  }
0x1eea   : > { %7465 = vsyncadd (!%p6934_p11), %s6141_s29, 4294967168  ;;  %p34_p8 = scmp.ge.s32.totalorder %s7773_s26, 4   ;;  %s9150_s18 = smov %s7472_s19 }
0x1eeb   : > { %s9151_s19 = smov %s7476_s20  ;;  %s9152_s20 = smov %s7784_s17 }
0x1eec   : > { %s9153_s21 = smov %s7773_s26  ;;  %36 = sbr.rel (!%p34_p8) target bundleno = 23 (0x17), region = 170 }
0x1ef3   :  { %6146 = vsyncpa [#allocation3], 1 }
0x1ef4   :  { %6148 = vsyncpa [#allocation3 + $0x1], 1 }
0x1ef5   :  { %6149 = vsyncpa [#allocation6], 1 }
0x1ef6   :  { %6151 = vsyncpa [#allocation6 + $0x1], 1 }
0x1ef7   :  { %6152 = vsyncpa [#allocation9], 1 }
0x1ef8   :  { %6153 = vsyncpa [#allocation12], 1 }
0x1ef9   :  { %6154 = vsyncpa [#allocation15], 1 }
0x1efa   :  { %6155 = vsyncpa [#allocation4], 1 }
0x1efb   :  { %6157 = vsyncpa [#allocation4 + $0x1], 1 }

</bundles_post_ra>
